<compile_context>
chip_gen: v5e
topology: v5e:2x2
jax: 0.10.0
libtpu: 0.0.40
codegen_flags: <defaults>
</compile_context>

<pallas_src>
import functools

import jax
import jax.numpy as jnp
from jax.experimental import pallas as pl
from jax.experimental.pallas import tpu as pltpu

HIDDEN = 512
DEPTH = 4          # number of (Linear(512,512) + Tanh) blocks after layer 0
LANE = 128
SUBLANE = 8


def _round_up(x, m):
    return ((x + m - 1) // m) * m


def _actor_kernel(x_ref, w0_ref, b0_ref, wh_ref, bh_ref, wout_ref, o_ref):
    """One batch tile of the fused actor MLP (all layers, weights resident)."""
    depth = wh_ref.shape[0]
    tb = x_ref.shape[0]

    # Split the tile into two independent row halves (when sublane-aligned) so
    # the scheduler can overlap one half's tanh (EUP) with the other half's
    # matmul (MXU); the two chains only share the (resident) weights.
    if tb >= 2 * SUBLANE and tb % (2 * SUBLANE) == 0:
        bounds = [(0, tb // 2), (tb // 2, tb)]
    else:
        bounds = [(0, tb)]

    b0 = b0_ref[...].astype(jnp.float32)

    # Layer 0: input_dim -> 512, bias, tanh.
    hs = []
    for lo, hi in bounds:
        y = jnp.dot(x_ref[lo:hi, :].astype(jnp.bfloat16), w0_ref[...],
                    preferred_element_type=jnp.float32)
        hs.append(jnp.tanh(y + b0).astype(jnp.bfloat16))

    # Hidden layers: 512 -> 512, bias, tanh.  Static unroll, static indices
    # into the resident stacked weights.
    for l in range(depth):
        wl = wh_ref[l]                               # (512, 512) bf16
        bl = bh_ref[l].astype(jnp.float32)           # (1, 512)
        hs = [jnp.tanh(jnp.dot(h, wl, preferred_element_type=jnp.float32) + bl
                       ).astype(jnp.bfloat16)
              for h in hs]

    # Output layer: 512 -> out_pad (zero-padded, lane dense), no bias/act.
    wout = wout_ref[...]
    for (lo, hi), h in zip(bounds, hs):
        o_ref[lo:hi, :] = jnp.dot(h, wout, preferred_element_type=jnp.float32
                                  ).astype(o_ref.dtype)


@functools.partial(jax.jit, static_argnames=("output_dim", "tile_b"))
def _actor_forward_2d(x, kernel_params, *, output_dim, tile_b):
    """x: (B, input_dim) f32.  kernel_params: packed bf16 params (see
    pack_actor_params).  Returns (B, output_dim) f32."""
    w0, b0, wh, bh, wout_p = kernel_params
    B, input_dim = x.shape
    depth = wh.shape[0]
    out_pad = wout_p.shape[1]

    # Batch tiling: sublane-aligned tiles, capped at `tile_b` rows.
    tile_b_eff = min(tile_b, _round_up(B, SUBLANE))
    # Megacore (v7x): if a moderate batch would fit a single tile, split it in
    # two so the "parallel" batch axis can shard across both TensorCores.
    # Cheap elsewhere: resident weights are fetched once per core regardless.
    if B >= 2 * SUBLANE and _round_up(B, SUBLANE) <= tile_b_eff:
        tile_b_eff = _round_up((B + 1) // 2, SUBLANE)

    b_pad = _round_up(B, tile_b_eff)
    if b_pad != B:
        x = jnp.pad(x, ((0, b_pad - B), (0, 0)))
    nb = b_pad // tile_b_eff

    out = pl.pallas_call(
        _actor_kernel,
        out_shape=jax.ShapeDtypeStruct((b_pad, out_pad), jnp.float32),
        grid_spec=pltpu.PrefetchScalarGridSpec(
            num_scalar_prefetch=0,
            grid=(nb,),
            in_specs=[
                # Per-tile activations.
                pl.BlockSpec((tile_b_eff, input_dim), lambda b: (b, 0)),
                # All parameters: constant index maps -> fetched once, resident.
                pl.BlockSpec((input_dim, HIDDEN), lambda b: (0, 0)),
                pl.BlockSpec((1, HIDDEN), lambda b: (0, 0)),
                pl.BlockSpec((depth, HIDDEN, HIDDEN), lambda b: (0, 0, 0)),
                pl.BlockSpec((depth, 1, HIDDEN), lambda b: (0, 0, 0)),
                pl.BlockSpec((HIDDEN, out_pad), lambda b: (0, 0)),
            ],
            out_specs=pl.BlockSpec((tile_b_eff, out_pad), lambda b: (b, 0)),
        ),
        compiler_params=pltpu.CompilerParams(
            dimension_semantics=("parallel",),
            vmem_limit_bytes=32 * 1024 * 1024,
        ),
    )(x, w0, b0, wh, bh, wout_p)

    return out[:B, :output_dim]


def actor_layer_forward(x, kernel_params, output_dim, *, tile_b=512):
    """ActorLayer forward. x: (B, input_dim) or (input_dim,) float32."""
    squeeze = (x.ndim == 1)
    if squeeze:
        x = x[None, :]
    out = _actor_forward_2d(x, kernel_params, output_dim=output_dim,
                            tile_b=tile_b)
    return out[0] if squeeze else out


def init_actor_params(key, input_dim, output_dim, depth=DEPTH):
    """Reference f32 parameters, PyTorch nn.Linear default init
    (U(-1/sqrt(fan_in), +1/sqrt(fan_in))).  Weights are stored transposed vs.
    PyTorch, i.e. (in, out), so every layer is y = x @ W + b."""
    def linear(k, fan_in, fan_out, bias=True):
        kw, kb = jax.random.split(k)
        bound = 1.0 / jnp.sqrt(fan_in)
        w = jax.random.uniform(kw, (fan_in, fan_out), jnp.float32, -bound, bound)
        b = (jax.random.uniform(kb, (1, fan_out), jnp.float32, -bound, bound)
             if bias else None)
        return w, b

    keys = jax.random.split(key, depth + 2)
    w0, b0 = linear(keys[0], input_dim, HIDDEN)
    whs, bhs = [], []
    for i in range(depth):
        w, b = linear(keys[1 + i], HIDDEN, HIDDEN)
        whs.append(w)
        bhs.append(b)
    wout, _ = linear(keys[-1], HIDDEN, output_dim, bias=False)
    return {
        "w0": w0, "b0": b0,
        "wh": jnp.stack(whs), "bh": jnp.stack(bhs),
        "wout": wout,
    }


def pack_actor_params(params):
    """Pack f32 params into the kernel layout: bf16 weights/biases, hidden
    layers stacked, output projection zero-padded to a 128-lane multiple.

    Note: bf16 weights / bf16 matmul inputs (f32 accumulate) are a deliberate
    numerics change vs. the f32 PyTorch module (validated to ~2e-3)."""
    output_dim = params["wout"].shape[1]
    out_pad = _round_up(output_dim, LANE)
    wout_p = jnp.zeros((HIDDEN, out_pad), jnp.bfloat16)
    wout_p = wout_p.at[:, :output_dim].set(params["wout"].astype(jnp.bfloat16))
    return (params["w0"].astype(jnp.bfloat16),
            params["b0"].astype(jnp.bfloat16),
            params["wh"].astype(jnp.bfloat16),
            params["bh"].astype(jnp.bfloat16),
            wout_p)


def actor_layer_reference(x, params, *, mimic_bf16=True):
    """Pure-JAX reference.  With mimic_bf16=True it reproduces the kernel's
    bf16-weight / bf16-activation-input / f32-accumulate numerics."""
    def dense(h, w, b=None, act=True):
        if mimic_bf16:
            y = jnp.dot(h.astype(jnp.bfloat16), w.astype(jnp.bfloat16),
                        preferred_element_type=jnp.float32)
            if b is not None:
                y = y + b.astype(jnp.bfloat16).astype(jnp.float32)
        else:
            y = jnp.dot(h, w)
            if b is not None:
                y = y + b
        return jnp.tanh(y) if act else y

    h = dense(x, params["w0"], params["b0"])
    for i in range(params["wh"].shape[0]):
        h = dense(h.astype(jnp.float32), params["wh"][i], params["bh"][i])
    return dense(h.astype(jnp.float32), params["wout"], None, act=False)


if __name__ == "__main__":
    key = jax.random.PRNGKey(0)
    input_dim, output_dim = 32, 6

    key, kp = jax.random.split(key)
    params = init_actor_params(kp, input_dim, output_dim)
    kparams = pack_actor_params(params)

    # Small case matching the module's documented usage: (B=2, input_dim).
    key, kx = jax.random.split(key)
    x_small = jax.random.normal(kx, (2, input_dim), dtype=jnp.float32)
    out_small = jax.block_until_ready(
        actor_layer_forward(x_small, kparams, output_dim))
    ref_small = actor_layer_reference(x_small, params)
    assert out_small.shape == (2, output_dim), out_small.shape
    assert jnp.allclose(out_small, ref_small, atol=2e-3, rtol=2e-3), \
        "small-batch mismatch vs reference"

    # Batched case: exercises the two-tile split (megacore-friendly on v7x)
    # and the resident-weight path.
    key, kx = jax.random.split(key)
    x_big = jax.random.normal(kx, (384, input_dim), dtype=jnp.float32)
    out_big = jax.block_until_ready(
        actor_layer_forward(x_big, kparams, output_dim))
    ref_big = actor_layer_reference(x_big, params)
    assert out_big.shape == (384, output_dim), out_big.shape
    assert jnp.allclose(out_big, ref_big, atol=2e-3, rtol=2e-3), \
        "batched mismatch vs reference"

    # Large batch: multiple full 512-row tiles.
    key, kx = jax.random.split(key)
    x_huge = jax.random.normal(kx, (1536, input_dim), dtype=jnp.float32)
    out_huge = jax.block_until_ready(
        actor_layer_forward(x_huge, kparams, output_dim))
    ref_huge = actor_layer_reference(x_huge, params)
    assert out_huge.shape == (1536, output_dim), out_huge.shape
    assert jnp.allclose(out_huge, ref_huge, atol=2e-3, rtol=2e-3), \
        "large-batch mismatch vs reference"

    # 1-D input path: (input_dim,) -> (output_dim,), as in the PyTorch module.
    out_1d = jax.block_until_ready(
        actor_layer_forward(x_small[0], kparams, output_dim))
    assert out_1d.shape == (output_dim,), out_1d.shape
    assert jnp.allclose(out_1d, out_small[0], atol=2e-3, rtol=2e-3)

    print("KERNEL_OK")
</pallas_src>

<mosaic_0001>
module attributes {stable_mosaic.version = 11 : i64} {
  func.func @_actor_kernel(%arg0: i32, %arg1: memref<8x32xf32, #tpu.memory_space<vmem>>, %arg2: memref<32x512xbf16, #tpu.memory_space<vmem>>, %arg3: memref<1x512xbf16, #tpu.memory_space<vmem>>, %arg4: memref<4x512x512xbf16, #tpu.memory_space<vmem>>, %arg5: memref<4x1x512xbf16, #tpu.memory_space<vmem>>, %arg6: memref<512x128xbf16, #tpu.memory_space<vmem>>, %arg7: memref<8x128xf32, #tpu.memory_space<vmem>>) attributes {dimension_semantics = [#tpu.dimension_semantics<parallel>], iteration_bounds = array<i64: 1>, scalar_prefetch = 0 : i64, scratch_operands = 0 : i64, tpu.core_type = #tpu.core_type<tc>, window_params = [{transform_indices = @transform_0, window_bounds = array<i64: 8, 32>}, {pipeline_mode = #tpu.pipeline_mode<synchronous>, transform_indices = @transform_1, window_bounds = array<i64: 32, 512>}, {pipeline_mode = #tpu.pipeline_mode<synchronous>, transform_indices = @transform_2, window_bounds = array<i64: 1, 512>}, {pipeline_mode = #tpu.pipeline_mode<synchronous>, transform_indices = @transform_3, window_bounds = array<i64: 4, 512, 512>}, {pipeline_mode = #tpu.pipeline_mode<synchronous>, transform_indices = @transform_4, window_bounds = array<i64: 4, 1, 512>}, {pipeline_mode = #tpu.pipeline_mode<synchronous>, transform_indices = @transform_5, window_bounds = array<i64: 512, 128>}, {transform_indices = @transform_6, window_bounds = array<i64: 8, 128>}]} {
    %c0 = arith.constant 0 : index
    %c0_0 = arith.constant 0 : index
    %0 = vector.load %arg3[%c0, %c0_0] : memref<1x512xbf16, #tpu.memory_space<vmem>>, vector<1x512xbf16>
    %1 = arith.extf %0 : vector<1x512xbf16> to vector<1x512xf32>
    %c0_1 = arith.constant 0 : index
    %c0_2 = arith.constant 0 : index
    %2 = vector.load %arg1[%c0_1, %c0_2] : memref<8x32xf32, #tpu.memory_space<vmem>>, vector<8x32xf32>
    %3 = arith.truncf %2 : vector<8x32xf32> to vector<8x32xbf16>
    %c0_3 = arith.constant 0 : index
    %c0_4 = arith.constant 0 : index
    %4 = vector.load %arg2[%c0_3, %c0_4] : memref<32x512xbf16, #tpu.memory_space<vmem>>, vector<32x512xbf16>
    %cst = arith.constant dense<0.000000e+00> : vector<8x512xf32>
    %5 = tpu.matmul %3, %4, %cst {dimension_numbers = #tpu.dot_dimension_numbers<[1], [0], [0], [1], [0, 0, 1, 1], [], []>} : vector<8x32xbf16>, vector<32x512xbf16>, vector<8x512xf32> -> vector<8x512xf32>
    %6 = vector.broadcast %1 : vector<1x512xf32> to vector<8x512xf32>
    %7 = arith.addf %5, %6 : vector<8x512xf32>
    %8 = math.tanh %7 : vector<8x512xf32>
    %9 = arith.truncf %8 : vector<8x512xf32> to vector<8x512xbf16>
    %c0_5 = arith.constant 0 : index
    %c0_6 = arith.constant 0 : index
    %c0_7 = arith.constant 0 : index
    %10 = vector.load %arg4[%c0_5, %c0_6, %c0_7] : memref<4x512x512xbf16, #tpu.memory_space<vmem>>, vector<1x512x512xbf16>
    %11 = vector.shape_cast %10 : vector<1x512x512xbf16> to vector<512x512xbf16>
    %c0_8 = arith.constant 0 : index
    %c0_9 = arith.constant 0 : index
    %c0_10 = arith.constant 0 : index
    %12 = vector.load %arg5[%c0_8, %c0_9, %c0_10] : memref<4x1x512xbf16, #tpu.memory_space<vmem>>, vector<1x1x512xbf16>
    %13 = vector.shape_cast %12 : vector<1x1x512xbf16> to vector<1x512xbf16>
    %14 = arith.extf %13 : vector<1x512xbf16> to vector<1x512xf32>
    %cst_11 = arith.constant dense<0.000000e+00> : vector<8x512xf32>
    %15 = tpu.matmul %9, %11, %cst_11 {dimension_numbers = #tpu.dot_dimension_numbers<[1], [0], [0], [1], [0, 0, 1, 1], [], []>} : vector<8x512xbf16>, vector<512x512xbf16>, vector<8x512xf32> -> vector<8x512xf32>
    %16 = vector.broadcast %14 : vector<1x512xf32> to vector<8x512xf32>
    %17 = arith.addf %15, %16 : vector<8x512xf32>
    %18 = math.tanh %17 : vector<8x512xf32>
    %19 = arith.truncf %18 : vector<8x512xf32> to vector<8x512xbf16>
    %c1 = arith.constant 1 : index
    %c0_12 = arith.constant 0 : index
    %c0_13 = arith.constant 0 : index
    %20 = vector.load %arg4[%c1, %c0_12, %c0_13] : memref<4x512x512xbf16, #tpu.memory_space<vmem>>, vector<1x512x512xbf16>
    %21 = vector.shape_cast %20 : vector<1x512x512xbf16> to vector<512x512xbf16>
    %c1_14 = arith.constant 1 : index
    %c0_15 = arith.constant 0 : index
    %c0_16 = arith.constant 0 : index
    %22 = vector.load %arg5[%c1_14, %c0_15, %c0_16] : memref<4x1x512xbf16, #tpu.memory_space<vmem>>, vector<1x1x512xbf16>
    %23 = vector.shape_cast %22 : vector<1x1x512xbf16> to vector<1x512xbf16>
    %24 = arith.extf %23 : vector<1x512xbf16> to vector<1x512xf32>
    %cst_17 = arith.constant dense<0.000000e+00> : vector<8x512xf32>
    %25 = tpu.matmul %19, %21, %cst_17 {dimension_numbers = #tpu.dot_dimension_numbers<[1], [0], [0], [1], [0, 0, 1, 1], [], []>} : vector<8x512xbf16>, vector<512x512xbf16>, vector<8x512xf32> -> vector<8x512xf32>
    %26 = vector.broadcast %24 : vector<1x512xf32> to vector<8x512xf32>
    %27 = arith.addf %25, %26 : vector<8x512xf32>
    %28 = math.tanh %27 : vector<8x512xf32>
    %29 = arith.truncf %28 : vector<8x512xf32> to vector<8x512xbf16>
    %c2 = arith.constant 2 : index
    %c0_18 = arith.constant 0 : index
    %c0_19 = arith.constant 0 : index
    %30 = vector.load %arg4[%c2, %c0_18, %c0_19] : memref<4x512x512xbf16, #tpu.memory_space<vmem>>, vector<1x512x512xbf16>
    %31 = vector.shape_cast %30 : vector<1x512x512xbf16> to vector<512x512xbf16>
    %c2_20 = arith.constant 2 : index
    %c0_21 = arith.constant 0 : index
    %c0_22 = arith.constant 0 : index
    %32 = vector.load %arg5[%c2_20, %c0_21, %c0_22] : memref<4x1x512xbf16, #tpu.memory_space<vmem>>, vector<1x1x512xbf16>
    %33 = vector.shape_cast %32 : vector<1x1x512xbf16> to vector<1x512xbf16>
    %34 = arith.extf %33 : vector<1x512xbf16> to vector<1x512xf32>
    %cst_23 = arith.constant dense<0.000000e+00> : vector<8x512xf32>
    %35 = tpu.matmul %29, %31, %cst_23 {dimension_numbers = #tpu.dot_dimension_numbers<[1], [0], [0], [1], [0, 0, 1, 1], [], []>} : vector<8x512xbf16>, vector<512x512xbf16>, vector<8x512xf32> -> vector<8x512xf32>
    %36 = vector.broadcast %34 : vector<1x512xf32> to vector<8x512xf32>
    %37 = arith.addf %35, %36 : vector<8x512xf32>
    %38 = math.tanh %37 : vector<8x512xf32>
    %39 = arith.truncf %38 : vector<8x512xf32> to vector<8x512xbf16>
    %c3 = arith.constant 3 : index
    %c0_24 = arith.constant 0 : index
    %c0_25 = arith.constant 0 : index
    %40 = vector.load %arg4[%c3, %c0_24, %c0_25] : memref<4x512x512xbf16, #tpu.memory_space<vmem>>, vector<1x512x512xbf16>
    %41 = vector.shape_cast %40 : vector<1x512x512xbf16> to vector<512x512xbf16>
    %c3_26 = arith.constant 3 : index
    %c0_27 = arith.constant 0 : index
    %c0_28 = arith.constant 0 : index
    %42 = vector.load %arg5[%c3_26, %c0_27, %c0_28] : memref<4x1x512xbf16, #tpu.memory_space<vmem>>, vector<1x1x512xbf16>
    %43 = vector.shape_cast %42 : vector<1x1x512xbf16> to vector<1x512xbf16>
    %44 = arith.extf %43 : vector<1x512xbf16> to vector<1x512xf32>
    %cst_29 = arith.constant dense<0.000000e+00> : vector<8x512xf32>
    %45 = tpu.matmul %39, %41, %cst_29 {dimension_numbers = #tpu.dot_dimension_numbers<[1], [0], [0], [1], [0, 0, 1, 1], [], []>} : vector<8x512xbf16>, vector<512x512xbf16>, vector<8x512xf32> -> vector<8x512xf32>
    %46 = vector.broadcast %44 : vector<1x512xf32> to vector<8x512xf32>
    %47 = arith.addf %45, %46 : vector<8x512xf32>
    %48 = math.tanh %47 : vector<8x512xf32>
    %49 = arith.truncf %48 : vector<8x512xf32> to vector<8x512xbf16>
    %c0_30 = arith.constant 0 : index
    %c0_31 = arith.constant 0 : index
    %50 = vector.load %arg6[%c0_30, %c0_31] : memref<512x128xbf16, #tpu.memory_space<vmem>>, vector<512x128xbf16>
    %cst_32 = arith.constant dense<0.000000e+00> : vector<8x128xf32>
    %51 = tpu.matmul %49, %50, %cst_32 {dimension_numbers = #tpu.dot_dimension_numbers<[1], [0], [0], [1], [0, 0, 1, 1], [], []>} : vector<8x512xbf16>, vector<512x128xbf16>, vector<8x128xf32> -> vector<8x128xf32>
    %c0_33 = arith.constant 0 : index
    %c0_34 = arith.constant 0 : index
    %52 = vector.load %arg7[%c0_33, %c0_34] : memref<8x128xf32, #tpu.memory_space<vmem>>, vector<8x128xf32>
    tpu.vector_store %arg7[%c0_33, %c0_34], %51 {strides = array<i32>} : memref<8x128xf32, #tpu.memory_space<vmem>>, vector<8x128xf32>,
    return
  }
  func.func @transform_0(%arg0: i32) -> (i32, i32) {
    %c0_i32 = arith.constant 0 : i32
    %c0_i32_0 = arith.constant 0 : i32
    return %arg0, %c0_i32 : i32, i32
  }
  func.func @transform_1(%arg0: i32) -> (i32, i32) {
    %c0_i32 = arith.constant 0 : i32
    %c0_i32_0 = arith.constant 0 : i32
    %c0_i32_1 = arith.constant 0 : i32
    return %c0_i32, %c0_i32_0 : i32, i32
  }
  func.func @transform_2(%arg0: i32) -> (i32, i32) {
    %c0_i32 = arith.constant 0 : i32
    %c0_i32_0 = arith.constant 0 : i32
    %c0_i32_1 = arith.constant 0 : i32
    return %c0_i32, %c0_i32_0 : i32, i32
  }
  func.func @transform_3(%arg0: i32) -> (i32, i32, i32) {
    %c0_i32 = arith.constant 0 : i32
    %c0_i32_0 = arith.constant 0 : i32
    %c0_i32_1 = arith.constant 0 : i32
    %c0_i32_2 = arith.constant 0 : i32
    return %c0_i32, %c0_i32_0, %c0_i32_1 : i32, i32, i32
  }
  func.func @transform_4(%arg0: i32) -> (i32, i32, i32) {
    %c0_i32 = arith.constant 0 : i32
    %c0_i32_0 = arith.constant 0 : i32
    %c0_i32_1 = arith.constant 0 : i32
    %c0_i32_2 = arith.constant 0 : i32
    return %c0_i32, %c0_i32_0, %c0_i32_1 : i32, i32, i32
  }
  func.func @transform_5(%arg0: i32) -> (i32, i32) {
    %c0_i32 = arith.constant 0 : i32
    %c0_i32_0 = arith.constant 0 : i32
    %c0_i32_1 = arith.constant 0 : i32
    return %c0_i32, %c0_i32_0 : i32, i32
  }
  func.func @transform_6(%arg0: i32) -> (i32, i32) {
    %c0_i32 = arith.constant 0 : i32
    %c0_i32_0 = arith.constant 0 : i32
    return %arg0, %c0_i32 : i32, i32
  }
}

</mosaic_0001>

<bundles_post_ra>
// kernel: _actor_forward_2d.1
= control target key start
LH: loop header
LB: loop body
LE: loop exit
PB: predicated region body
PF: predicated region fallthrough
CT: control target
= control target key end

     0   :  { %11 = vsyncpa [#allocation3], 0  ;;  %s7733_s0 = inlined_call_operand.vmem [shape: f32[8,32], index: 0, kind: input, shape index: {}]   ;;  %s7734_s1 = inlined_call_operand.hbm [shape: bf16[32,512], index: 1, kind: input, shape index: {}]   ;;  %s7735_s2 = inlined_call_operand.hbm [shape: bf16[1,512], index: 2, kind: input, shape index: {}]   ;;  %s7736_s3 = inlined_call_operand.hbm [shape: bf16[4,512,512], index: 3, kind: input, shape index: {}]   ;;  %s7737_s4 = inlined_call_operand.vmem [shape: bf16[4,1,512], index: 4, kind: input, shape index: {}]   ;;  %s7738_s5 = inlined_call_operand.hbm [shape: bf16[512,128], index: 5, kind: input, shape index: {}]   ;;  %s7739_s6 = inlined_call_operand.vmem [shape: f32[8,128], index: 6, kind: output, shape index: {}]  }
   0x1   :  { %12 = vsyncpa [#allocation5], 0  ;;  %s34_s23 = sshll.u32 %s7735_s2, 4  ;;  %s35_s23 = int_to_ptr.hbm [resolvable:$true] %s34_s23 }
   0x2   :  { %13 = vsyncpa [#allocation8], 0  ;;  %s7449_s24 = smov [#allocation4]   ;;  %s20_s28 = sshll.u32 %s7734_s1, 4  ;;  %s21_s28 = int_to_ptr.hbm [resolvable:$true] %s20_s28 }
   0x3   :  { %s36_s25 = sshll.u32 %s7449_s24, 4  ;;  %s7450_s29 = smov [#allocation2]   ;;  %s37_s25 = int_to_ptr.vmem [resolvable:$true] %s36_s25 }
   0x4   :  { %39 = dma.hbm_to_vmem [thread:$0]  %s35_s23, 64, %s37_s25, [#allocation5]  }
   0x5   :  { %s22_s30 = sshll.u32 %s7450_s29, 4  ;;  %s7451_s7 = smov 256   ;;  %s23_s30 = int_to_ptr.vmem [resolvable:$true] %s22_s30 }
   0x6   :  { %s7452_s8 = smov 16   ;;  %s44_s2 = sshll.u32 %s7736_s3, 4  ;;  %s45_s2 = int_to_ptr.hbm [resolvable:$true] %s44_s2 }
   0x7   :  { %28 = dma.hbm_to_vmem [thread:$0]  %s21_s28, 1024, %s23_s30, [#allocation3], %s7451_s7, %s7451_s7, %s7452_s8  }
   0x8   :  { %s7453_s11 = smov [#allocation6]   ;;  %s59_s1 = sshll.u32 %s7738_s5, 4  ;;  %s60_s1 = int_to_ptr.hbm [resolvable:$true] %s59_s1 }
   0x9   :  { %s46_s12 = sshll.u32 %s7453_s11, 4  ;;  %s7454_s15 = smov [#allocation7]   ;;  %s47_s12 = int_to_ptr.vmem [resolvable:$true] %s46_s12 }
   0xa   :  { %52 = dma.hbm_to_vmem [thread:$0]  %s45_s2, 65536, %s47_s12, [#allocation5], %s7451_s7, %s7451_s7, %s7452_s8  }
   0xb   :  { %s61_s16 = sshll.u32 %s7454_s15, 4  ;;  %s7455_s17 = smov 64   ;;  %s62_s16 = int_to_ptr.vmem [resolvable:$true] %s61_s16 }
   0xc   :  { %s7456_s18 = smov 4  }
   0xd   :  { %67 = dma.hbm_to_vmem [thread:$0]  %s60_s1, 4096, %s62_s16, [#allocation8], %s7455_s17, %s7455_s17, %s7456_s18  }
   0xe   :  { %7443 = dma.done.wait [#allocation3], 1024  }
   0xf   :  { %7444 = vsyncadd [#allocation3], 4294966272 }
  0x10   :  { %7445 = dma.done.wait [#allocation5], 65600  }
  0x11   :  { %7446 = vsyncadd [#allocation5], 4294901696 }
  0x12   :  { %7447 = dma.done.wait [#allocation8], 4096  }
  0x13   :  { %7448 = vsyncadd [#allocation8], 4294963200  ;;  %v4550_v0 = vld [vmem:[#allocation2 + $0x20] sm:$0xf]  ;;  %v6753_v1 = vld [vmem:[#allocation2 + $0x2c] sm:$0xf0] }
  0x14   :  { %v6751_v2 = vld [vmem:[#allocation2 + $0x24] sm:$0xf]  ;;  %v4551_v3 = vor.u32 %v6753_v1, %v4550_v0  ;;  %v4552_v4 = vld [vmem:[#allocation2 + $0x30] sm:$0xf0]  ;;  %v4558_v5 = vld [vmem:[#allocation2 + $0x28] sm:$0xf] }
  0x15   :  { %v6754_v6 = vld [vmem:[#allocation2 + $0x34] sm:$0xf0]  ;;  %v4555_v7 = vor.u32 %v6751_v2, %v4552_v4  ;;  %v6752_v9 = vld [vmem:[#allocation2 + $0x2c] sm:$0xf]  ;;  %v4560_v10 = vld [vmem:[#allocation2 + $0x38] sm:$0xf0] }
  0x16   :  { %v4559_v8 = vor.u32 %v6754_v6, %v4558_v5  ;;  %v4534_v11 = vld [vmem:[#allocation2] sm:$0xf]  ;;  %160 = vmatpush.bf16.msra.mxu0 %v4551_v3  ;;  %v4563_v12 = vor.u32 %v6752_v9, %v4560_v10  ;;  %v6749_v13 = vld [vmem:[#allocation2 + $0xc] sm:$0xf0]  ;;  %v6747_v14 = vld [vmem:[#allocation2 + $0x4] sm:$0xf] }
  0x17   :  { %v4536_v15 = vld [vmem:[#allocation2 + $0x10] sm:$0xf0]  ;;  %173 = vmatpush.bf16.msra.mxu1 %v4555_v7  ;;  %v4535_v16 = vor.u32 %v6749_v13, %v4534_v11  ;;  %v4542_v18 = vld [vmem:[#allocation2 + $0x8] sm:$0xf]  ;;  %v6750_v19 = vld [vmem:[#allocation2 + $0x14] sm:$0xf0] }
  0x18   :  { %186 = vmatpush.bf16.msra.mxu2 %v4559_v8  ;;  %v4539_v17 = vor.u32 %v6747_v14, %v4536_v15  ;;  %v6748_v20 = vld [vmem:[#allocation2 + $0xc] sm:$0xf]  ;;  %199 = vmatpush.bf16.msra.mxu3 %v4563_v12  ;;  %v4543_v21 = vor.u32 %v6750_v19, %v4542_v18  ;;  %v4544_v22 = vld [vmem:[#allocation2 + $0x18] sm:$0xf0]  ;;  %v87_v23 = vld [vmem:[%s7733_s0] sm:$0xff]  ;;  %vm150_vm0 = vcmask 261120  }
  0x19   :  { %v4682_v24 = vld [vmem:[#allocation6 + $0xe0] sm:$0xf]  ;;  %v4547_v25 = vor.u32 %v6748_v20, %v4544_v22  ;;  %v88_v26 = vpack.c.bf16 %v87_v23, %v87_v23  ;;  %v6785_v27 = vld [vmem:[#allocation6 + $0xec] sm:$0xf0] }
  0x1a   :  { %v4810_v28 = vld [vmem:[#allocation6 + $0x1e0] sm:$0xf]  ;;  %v6817_v29 = vld [vmem:[#allocation6 + $0x1ec] sm:$0xf0]  ;;  %161 = vmatpush.bf16.msra.mxu0 %v4535_v16  ;;  %v4683_v30 = vor.u32 %v6785_v27, %v4682_v24 }
  0x1b   :  { %v4811_v31 = vor.u32 %v6817_v29, %v4810_v28  ;;  %v4666_v32 = vld [vmem:[#allocation6 + $0xc0] sm:$0xf]  ;;  %v6781_v33 = vld [vmem:[#allocation6 + $0xcc] sm:$0xf0]  ;;  %174 = vmatpush.bf16.msra.mxu1 %v4539_v17 }
  0x1c   :  { %v4794_v34 = vld [vmem:[#allocation6 + $0x1c0] sm:$0xf]  ;;  %187 = vmatpush.bf16.msra.mxu2 %v4543_v21  ;;  %v6813_v35 = vld [vmem:[#allocation6 + $0x1cc] sm:$0xf0]  ;;  %200 = vmatpush.bf16.msra.mxu3 %v4547_v25  ;;  %v4667_v38 = vor.u32 %v6781_v33, %v4666_v32 }
  0x1d   :  { %v4938_v36 = vld [vmem:[#allocation6 + $0x2e0] sm:$0xf]  ;;  %v6849_v37 = vld [vmem:[#allocation6 + $0x2ec] sm:$0xf0]  ;;  %4564 = vmatmul.msk.bf16.vlgmr.msra.gmra.mxu0 %vm150_vm0, %v88_v26  ;;  %v4795_v43 = vor.u32 %v6813_v35, %v4794_v34 }
  0x1e   :  { %997 = vmatpush.bf16.msrb.mxu0 %v4683_v30  ;;  %v4939_v39 = vor.u32 %v6849_v37, %v4938_v36  ;;  %v5066_v40 = vld [vmem:[#allocation6 + $0x3e0] sm:$0xf]  ;;  %v6881_v41 = vld [vmem:[#allocation6 + $0x3ec] sm:$0xf0]  ;;  %4565 = vmatmul.msk.bf16.vlgmr.msra.gmra.mxu1 %vm150_vm0, %v88_v26 }
  0x1f   :  { %v4650_v42 = vld [vmem:[#allocation6 + $0xa0] sm:$0xf]  ;;  %1010 = vmatpush.bf16.msrb.mxu1 %v4811_v31  ;;  %v5067_v44 = vor.u32 %v6881_v41, %v5066_v40  ;;  %v6777_v45 = vld [vmem:[#allocation6 + $0xac] sm:$0xf0]  ;;  %4566 = vmatmul.msk.bf16.vlgmr.msra.gmra.mxu2 %vm150_vm0, %v88_v26 }
  0x20   :  { %v4778_v46 = vld [vmem:[#allocation6 + $0x1a0] sm:$0xf]  ;;  %v6809_v47 = vld [vmem:[#allocation6 + $0x1ac] sm:$0xf0]  ;;  %4567 = vmatmul.msk.bf16.vlgmr.msra.gmra.mxu3 %vm150_vm0, %v88_v26  ;;  %1023 = vmatpush.bf16.msrb.mxu2 %v4939_v39  ;;  %v4651_v53 = vor.u32 %v6777_v45, %v4650_v42 }
  0x21   :  { %v4922_v48 = vld [vmem:[#allocation6 + $0x2c0] sm:$0xf]  ;;  %v6845_v49 = vld [vmem:[#allocation6 + $0x2cc] sm:$0xf0]  ;;  %1036 = vmatpush.bf16.msrb.mxu3 %v5067_v44  ;;  %v4779_v58 = vor.u32 %v6809_v47, %v4778_v46 }
  0x22   :  { %v5050_v50 = vld [vmem:[#allocation6 + $0x3c0] sm:$0xf]  ;;  %v4923_v51 = vor.u32 %v6845_v49, %v4922_v48  ;;  %v6877_v52 = vld [vmem:[#allocation6 + $0x3cc] sm:$0xf0]  ;;  %998 = vmatpush.bf16.msrb.mxu0 %v4667_v38  ;;  %v6783_v48 = vld [vmem:[#allocation6 + $0xe4] sm:$0xf] }
  0x23   :  { %v5051_v54 = vor.u32 %v6877_v52, %v5050_v50  ;;  %v4634_v55 = vld [vmem:[#allocation6 + $0x80] sm:$0xf]  ;;  %v6773_v56 = vld [vmem:[#allocation6 + $0x8c] sm:$0xf0]  ;;  %1011 = vmatpush.bf16.msrb.mxu1 %v4795_v43  ;;  %v4684_v49 = vld [vmem:[#allocation6 + $0xf0] sm:$0xf0] }
  0x24   :  { %v4906_v57 = vld [vmem:[#allocation6 + $0x2a0] sm:$0xf]  ;;  %v6841_v59 = vld [vmem:[#allocation6 + $0x2ac] sm:$0xf0]  ;;  %1024 = vmatpush.bf16.msrb.mxu2 %v4923_v51  ;;  %v4635_v1 = vor.u32 %v6773_v56, %v4634_v55  ;;  %v6815_v50 = vld [vmem:[#allocation6 + $0x1e4] sm:$0xf] }
  0x25   :  { %v5034_v60 = vld [vmem:[#allocation6 + $0x3a0] sm:$0xf]  ;;  %v6873_v61 = vld [vmem:[#allocation6 + $0x3ac] sm:$0xf0]  ;;  %v4907_v0 = vor.u32 %v6841_v59, %v4906_v57  ;;  %1037 = vmatpush.bf16.msrb.mxu3 %v5051_v54  ;;  %v4812_v51 = vld [vmem:[#allocation6 + $0x1f0] sm:$0xf0] }
  0x26   :  { %v4762_v62 = vld [vmem:[#allocation6 + $0x180] sm:$0xf]  ;;  %v6805_v63 = vld [vmem:[#allocation6 + $0x18c] sm:$0xf0]  ;;  %999 = vmatpush.bf16.msrb.mxu0 %v4651_v53  ;;  %v5035_v2 = vor.u32 %v6873_v61, %v5034_v60  ;;  %v6779_v55 = vld [vmem:[#allocation6 + $0xc4] sm:$0xf]  ;;  %v4687_v60 = vor.u32 %v6783_v48, %v4684_v49 }
  0x27   :  { %v4618_v3 = vld [vmem:[#allocation6 + $0x60] sm:$0xf]  ;;  %v6837_v5 = vld [vmem:[#allocation6 + $0x28c] sm:$0xf0]  ;;  %1012 = vmatpush.bf16.msrb.mxu1 %v4779_v58  ;;  %v4763_v6 = vor.u32 %v6805_v63, %v4762_v62  ;;  %v6847_v62 = vld [vmem:[#allocation6 + $0x2e4] sm:$0xf] }
  0x28   :  { %v4890_v4 = vld [vmem:[#allocation6 + $0x280] sm:$0xf]  ;;  %v6769_v7 = vld [vmem:[#allocation6 + $0x6c] sm:$0xf0]  ;;  %1025 = vmatpush.bf16.msrb.mxu2 %v4907_v0  ;;  %v4940_v63 = vld [vmem:[#allocation6 + $0x2f0] sm:$0xf0]  ;;  %v4815_v0 = vor.u32 %v6815_v50, %v4812_v51 }
  0x29   :  { %v5018_v8 = vld [vmem:[#allocation6 + $0x380] sm:$0xf]  ;;  %v6869_v9 = vld [vmem:[#allocation6 + $0x38c] sm:$0xf0]  ;;  %v4891_v12 = vor.u32 %v6837_v5, %v4890_v4  ;;  %1038 = vmatpush.bf16.msrb.mxu3 %v5035_v2  ;;  %v4619_v13 = vor.u32 %v6769_v7, %v4618_v3  ;;  %v6879_v2 = vld [vmem:[#allocation6 + $0x3e4] sm:$0xf] }
  0x2a   :  { %v4746_v10 = vld [vmem:[#allocation6 + $0x160] sm:$0xf]  ;;  %v6801_v11 = vld [vmem:[#allocation6 + $0x16c] sm:$0xf0]  ;;  %1000 = vmatpush.bf16.msrb.mxu0 %v4635_v1  ;;  %v5019_v14 = vor.u32 %v6869_v9, %v5018_v8  ;;  %v4668_v1 = vld [vmem:[#allocation6 + $0xd0] sm:$0xf0]  ;;  %v4943_v8 = vor.u32 %v6847_v62, %v4940_v63 }
  0x2b   :  { %v4602_v15 = vld [vmem:[#allocation6 + $0x40] sm:$0xf]  ;;  %v6833_v17 = vld [vmem:[#allocation6 + $0x26c] sm:$0xf0]  ;;  %1013 = vmatpush.bf16.msrb.mxu1 %v4763_v6  ;;  %v4747_v18 = vor.u32 %v6801_v11, %v4746_v10  ;;  %v5068_v3 = vld [vmem:[#allocation6 + $0x3f0] sm:$0xf0]  ;;  %v4671_v9 = vor.u32 %v6779_v55, %v4668_v1 }
  0x2c   :  { %v4874_v16 = vld [vmem:[#allocation6 + $0x260] sm:$0xf]  ;;  %v6765_v19 = vld [vmem:[#allocation6 + $0x4c] sm:$0xf0]  ;;  %1026 = vmatpush.bf16.msrb.mxu2 %v4891_v12  ;;  %v6811_v4 = vld [vmem:[#allocation6 + $0x1c4] sm:$0xf]  ;;  %v5071_v10 = vor.u32 %v6879_v2, %v5068_v3 }
  0x2d   :  { %v5002_v20 = vld [vmem:[#allocation6 + $0x360] sm:$0xf]  ;;  %v6865_v21 = vld [vmem:[#allocation6 + $0x36c] sm:$0xf0]  ;;  %v4875_v24 = vor.u32 %v6833_v17, %v4874_v16  ;;  %1039 = vmatpush.bf16.msrb.mxu3 %v5019_v14  ;;  %v4603_v25 = vor.u32 %v6765_v19, %v4602_v15  ;;  %v4796_v5 = vld [vmem:[#allocation6 + $0x1d0] sm:$0xf0] }
  0x2e   :  { %v4730_v22 = vld [vmem:[#allocation6 + $0x140] sm:$0xf]  ;;  %v6797_v23 = vld [vmem:[#allocation6 + $0x14c] sm:$0xf0]  ;;  %1001 = vmatpush.bf16.msrb.mxu0 %v4619_v13  ;;  %v5003_v26 = vor.u32 %v6865_v21, %v5002_v20  ;;  %v6775_v11 = vld [vmem:[#allocation6 + $0xa4] sm:$0xf]  ;;  %v4799_v14 = vor.u32 %v6811_v4, %v4796_v5 }
  0x2f   :  { %v4586_v27 = vld [vmem:[#allocation6 + $0x20] sm:$0xf]  ;;  %v6829_v29 = vld [vmem:[#allocation6 + $0x24c] sm:$0xf0]  ;;  %1014 = vmatpush.bf16.msrb.mxu1 %v4747_v18  ;;  %v4731_v30 = vor.u32 %v6797_v23, %v4730_v22  ;;  %v6843_v12 = vld [vmem:[#allocation6 + $0x2c4] sm:$0xf] }
  0x30   :  { %v4858_v28 = vld [vmem:[#allocation6 + $0x240] sm:$0xf]  ;;  %v6761_v31 = vld [vmem:[#allocation6 + $0x2c] sm:$0xf0]  ;;  %1027 = vmatpush.bf16.msrb.mxu2 %v4875_v24  ;;  %v4924_v13 = vld [vmem:[#allocation6 + $0x2d0] sm:$0xf0] }
  0x31   :  { %v4986_v32 = vld [vmem:[#allocation6 + $0x340] sm:$0xf]  ;;  %v6861_v33 = vld [vmem:[#allocation6 + $0x34c] sm:$0xf0]  ;;  %v4859_v36 = vor.u32 %v6829_v29, %v4858_v28  ;;  %1040 = vmatpush.bf16.msrb.mxu3 %v5003_v26  ;;  %v4587_v38 = vor.u32 %v6761_v31, %v4586_v27  ;;  %v4652_v15 = vld [vmem:[#allocation6 + $0xb0] sm:$0xf0]  ;;  %v4927_v20 = vor.u32 %v6843_v12, %v4924_v13 }
  0x32   :  { %v4714_v34 = vld [vmem:[#allocation6 + $0x120] sm:$0xf]  ;;  %v6793_v35 = vld [vmem:[#allocation6 + $0x12c] sm:$0xf0]  ;;  %1002 = vmatpush.bf16.msrb.mxu0 %v4603_v25  ;;  %v4987_v39 = vor.u32 %v6861_v33, %v4986_v32  ;;  %v6875_v16 = vld [vmem:[#allocation6 + $0x3c4] sm:$0xf]  ;;  %v4655_v21 = vor.u32 %v6775_v11, %v4652_v15 }
  0x33   :  { %v4570_v37 = vld [vmem:[#allocation6] sm:$0xf]  ;;  %v6757_v40 = vld [vmem:[#allocation6 + $0xc] sm:$0xf0]  ;;  %1015 = vmatpush.bf16.msrb.mxu1 %v4731_v30  ;;  %v4715_v43 = vor.u32 %v6793_v35, %v4714_v34  ;;  %v5052_v17 = vld [vmem:[#allocation6 + $0x3d0] sm:$0xf0] }
  0x34   :  { %v4842_v41 = vld [vmem:[#allocation6 + $0x220] sm:$0xf]  ;;  %v6825_v42 = vld [vmem:[#allocation6 + $0x22c] sm:$0xf0]  ;;  %1028 = vmatpush.bf16.msrb.mxu2 %v4859_v36  ;;  %v4571_v53 = vor.u32 %v6757_v40, %v4570_v37  ;;  %v6807_v18 = vld [vmem:[#allocation6 + $0x1a4] sm:$0xf]  ;;  %v5055_v22 = vor.u32 %v6875_v16, %v5052_v17 }
  0x35   :  { %v4698_v44 = vld [vmem:[#allocation6 + $0x100] sm:$0xf]  ;;  %v6857_v46 = vld [vmem:[#allocation6 + $0x32c] sm:$0xf0]  ;;  %v4843_v52 = vor.u32 %v6825_v42, %v4842_v41  ;;  %1041 = vmatpush.bf16.msrb.mxu3 %v4987_v39  ;;  %v4780_v19 = vld [vmem:[#allocation6 + $0x1b0] sm:$0xf0] }
  0x36   :  { %v4970_v45 = vld [vmem:[#allocation6 + $0x320] sm:$0xf]  ;;  %v6789_v47 = vld [vmem:[#allocation6 + $0x10c] sm:$0xf0]  ;;  %1003 = vmatpush.bf16.msrb.mxu0 %v4587_v38  ;;  %v6771_v23 = vld [vmem:[#allocation6 + $0x84] sm:$0xf]  ;;  %v4783_v26 = vor.u32 %v6807_v18, %v4780_v19 }
  0x37   :  { %v4971_v54 = vor.u32 %v6857_v46, %v4970_v45  ;;  %v4826_v56 = vld [vmem:[#allocation6 + $0x200] sm:$0xf]  ;;  %v6821_v57 = vld [vmem:[#allocation6 + $0x20c] sm:$0xf0]  ;;  %1016 = vmatpush.bf16.msrb.mxu1 %v4715_v43  ;;  %v4699_v59 = vor.u32 %v6789_v47, %v4698_v44  ;;  %v6839_v24 = vld [vmem:[#allocation6 + $0x2a4] sm:$0xf] }
  0x38   :  { %v4954_v58 = vld [vmem:[#allocation6 + $0x300] sm:$0xf]  ;;  %v6853_v61 = vld [vmem:[#allocation6 + $0x30c] sm:$0xf0]  ;;  %1029 = vmatpush.bf16.msrb.mxu2 %v4843_v52  ;;  %v4827_v6 = vor.u32 %v6821_v57, %v4826_v56  ;;  %v4908_v25 = vld [vmem:[#allocation6 + $0x2b0] sm:$0xf0] }
  0x39   :  { %1042 = vmatpush.bf16.msrb.mxu3 %v4971_v54  ;;  %v4955_v7 = vor.u32 %v6853_v61, %v4954_v58  ;;  %v4636_v27 = vld [vmem:[#allocation6 + $0x90] sm:$0xf0]  ;;  %v6871_v28 = vld [vmem:[#allocation6 + $0x3a4] sm:$0xf]  ;;  %v4911_v32 = vor.u32 %v6839_v24, %v4908_v25  ;;  %v85_v25 = vld [vmem:[#allocation4] sm:$0xf] }
  0x3a   :  { %1004 = vmatpush.bf16.msrb.mxu0 %v4571_v53  ;;  %v5036_v29 = vld [vmem:[#allocation6 + $0x3b0] sm:$0xf0]  ;;  %v6803_v30 = vld [vmem:[#allocation6 + $0x184] sm:$0xf]  ;;  %v4639_v33 = vor.u32 %v6771_v23, %v4636_v27  ;;  %v86_v27 = vunpack.c.l.bf16 %v85_v25 }
  0x3b   :  { %1017 = vmatpush.bf16.msrb.mxu1 %v4699_v59  ;;  %v4764_v31 = vld [vmem:[#allocation6 + $0x190] sm:$0xf0]  ;;  %v5039_v34 = vor.u32 %v6871_v28, %v5036_v29  ;;  %v6767_v36 = vld [vmem:[#allocation6 + $0x64] sm:$0xf] }
  0x3c   :  { %1030 = vmatpush.bf16.msrb.mxu2 %v4827_v6  ;;  %v4767_v35 = vor.u32 %v6803_v30, %v4764_v31  ;;  %v4620_v37 = vld [vmem:[#allocation6 + $0x70] sm:$0xf0]  ;;  %v6799_v38 = vld [vmem:[#allocation6 + $0x164] sm:$0xf]  ;;  %v98_v28 = vperm.slane %v86_v27, 0  ;;  %v99_v29 = vperm.slane %v86_v27, 2 }
  0x3d   :  { %1043 = vmatpush.bf16.msrb.mxu3 %v4955_v7  ;;  %v4748_v39 = vld [vmem:[#allocation6 + $0x170] sm:$0xf0]  ;;  %v4623_v40 = vor.u32 %v6767_v36, %v4620_v37  ;;  %v6835_v42 = vld [vmem:[#allocation6 + $0x284] sm:$0xf]  ;;  %v101_v36 = vperm.slane %v86_v27, 6 }
  0x3e   :  { %1049 = vmatpush.bf16.msra.mxu0 %v4687_v60  ;;  %v4751_v41 = vor.u32 %v6799_v38, %v4748_v39  ;;  %v4892_v43 = vld [vmem:[#allocation6 + $0x290] sm:$0xf0]  ;;  %v6867_v44 = vld [vmem:[#allocation6 + $0x384] sm:$0xf]  ;;  %v106_v30 = vperm.slane %v98_v28, 0  ;;  %v107_v31 = vperm.slane %v99_v29, 0 }
  0x3f   :  { %1062 = vmatpush.bf16.msra.mxu1 %v4815_v0  ;;  %v4895_v45 = vor.u32 %v6835_v42, %v4892_v43  ;;  %v5020_v46 = vld [vmem:[#allocation6 + $0x390] sm:$0xf0]  ;;  %v6763_v48 = vld [vmem:[#allocation6 + $0x44] sm:$0xf]  ;;  %v109_v39 = vperm.slane %v101_v36, 0 }
  0x40   :  { %1075 = vmatpush.bf16.msra.mxu2 %v4943_v8  ;;  %v5023_v47 = vor.u32 %v6867_v44, %v5020_v46  ;;  %v4604_v49 = vld [vmem:[#allocation6 + $0x50] sm:$0xf0]  ;;  %v6795_v50 = vld [vmem:[#allocation6 + $0x144] sm:$0xf]  ;;  %v4818_v43 = vld [vmem:[#allocation6 + $0x1e8] sm:$0xf] }
  0x41   :  { %1088 = vmatpush.bf16.msra.mxu3 %v5071_v10  ;;  %v4607_v51 = vor.u32 %v6763_v48, %v4604_v49  ;;  %v4732_v52 = vld [vmem:[#allocation6 + $0x150] sm:$0xf0]  ;;  %v6831_v54 = vld [vmem:[#allocation6 + $0x264] sm:$0xf]  ;;  %v6818_v44 = vld [vmem:[#allocation6 + $0x1f4] sm:$0xf0] }
  0x42   :  { %1050 = vmatpush.bf16.msra.mxu0 %v4671_v9  ;;  %v4735_v53 = vor.u32 %v6795_v50, %v4732_v52  ;;  %v4876_v55 = vld [vmem:[#allocation6 + $0x270] sm:$0xf0]  ;;  %v6863_v56 = vld [vmem:[#allocation6 + $0x364] sm:$0xf]  ;;  %v6842_v28 = vld [vmem:[#allocation6 + $0x2b4] sm:$0xf0] }
  0x43   :  { %1063 = vmatpush.bf16.msra.mxu1 %v4799_v14  ;;  %v4879_v57 = vor.u32 %v6831_v54, %v4876_v55  ;;  %v5004_v58 = vld [vmem:[#allocation6 + $0x370] sm:$0xf0]  ;;  %v6759_v60 = vld [vmem:[#allocation6 + $0x24] sm:$0xf]  ;;  %v4819_v54 = vor.u32 %v6818_v44, %v4818_v43  ;;  %v4674_v55 = vld [vmem:[#allocation6 + $0xc8] sm:$0xf] }
  0x44   :  { %1076 = vmatpush.bf16.msra.mxu2 %v4927_v20  ;;  %v5007_v59 = vor.u32 %v6863_v56, %v5004_v58  ;;  %v4588_v61 = vld [vmem:[#allocation6 + $0x30] sm:$0xf0]  ;;  %v6791_v62 = vld [vmem:[#allocation6 + $0x124] sm:$0xf]  ;;  %v6782_v56 = vld [vmem:[#allocation6 + $0xd4] sm:$0xf0] }
  0x45   :  { %1089 = vmatpush.bf16.msra.mxu3 %v5055_v22  ;;  %v4591_v63 = vor.u32 %v6759_v60, %v4588_v61  ;;  %v4716_v0 = vld [vmem:[#allocation6 + $0x130] sm:$0xf0]  ;;  %v6827_v2 = vld [vmem:[#allocation6 + $0x244] sm:$0xf]  ;;  %v4802_v58 = vld [vmem:[#allocation6 + $0x1c8] sm:$0xf]  ;;  %v4675_v60 = vor.u32 %v6782_v56, %v4674_v55 }
  0x46   :  { %1051 = vmatpush.bf16.msra.mxu0 %v4655_v21  ;;  %v4719_v1 = vor.u32 %v6791_v62, %v4716_v0  ;;  %v4860_v3 = vld [vmem:[#allocation6 + $0x250] sm:$0xf0]  ;;  %v6859_v4 = vld [vmem:[#allocation6 + $0x344] sm:$0xf]  ;;  %v4946_v61 = vld [vmem:[#allocation6 + $0x2e8] sm:$0xf] }
  0x47   :  { %1064 = vmatpush.bf16.msra.mxu1 %v4783_v26  ;;  %v4863_v5 = vor.u32 %v6827_v2, %v4860_v3  ;;  %v4988_v6 = vld [vmem:[#allocation6 + $0x350] sm:$0xf0]  ;;  %v6755_v8 = vld [vmem:[#allocation6 + $0x4] sm:$0xf]  ;;  %v6850_v62 = vld [vmem:[#allocation6 + $0x2f4] sm:$0xf0] }
  0x48   :  { %1077 = vmatpush.bf16.msra.mxu2 %v4911_v32  ;;  %v4991_v7 = vor.u32 %v6859_v4, %v4988_v6  ;;  %v4572_v9 = vld [vmem:[#allocation6 + $0x10] sm:$0xf0]  ;;  %v6787_v10 = vld [vmem:[#allocation6 + $0x104] sm:$0xf]  ;;  %v4658_v2 = vld [vmem:[#allocation6 + $0xa8] sm:$0xf] }
  0x49   :  { %1090 = vmatpush.bf16.msra.mxu3 %v5039_v34  ;;  %v4575_v11 = vor.u32 %v6755_v8, %v4572_v9  ;;  %v4700_v12 = vld [vmem:[#allocation6 + $0x110] sm:$0xf0]  ;;  %v6823_v14 = vld [vmem:[#allocation6 + $0x224] sm:$0xf]  ;;  %v6778_v3 = vld [vmem:[#allocation6 + $0xb4] sm:$0xf0]  ;;  %v4947_v9 = vor.u32 %v6850_v62, %v4946_v61 }
  0x4a   :  { %1052 = vmatpush.bf16.msra.mxu0 %v4639_v33  ;;  %v4703_v13 = vor.u32 %v6787_v10, %v4700_v12  ;;  %v4844_v15 = vld [vmem:[#allocation6 + $0x230] sm:$0xf0]  ;;  %v6855_v16 = vld [vmem:[#allocation6 + $0x324] sm:$0xf]  ;;  %v100_v33 = vperm.slane %v86_v27, 4 }
  0x4b   :  { %1065 = vmatpush.bf16.msra.mxu1 %v4767_v35  ;;  %v4972_v17 = vld [vmem:[#allocation6 + $0x330] sm:$0xf0]  ;;  %v4847_v18 = vor.u32 %v6823_v14, %v4844_v15  ;;  %v6819_v20 = vld [vmem:[#allocation6 + $0x204] sm:$0xf]  ;;  %v6810_v6 = vld [vmem:[#allocation6 + $0x1b4] sm:$0xf0] }
  0x4c   :  { %1078 = vmatpush.bf16.msra.mxu2 %v4895_v45  ;;  %v4975_v19 = vor.u32 %v6855_v16, %v4972_v17  ;;  %v4828_v21 = vld [vmem:[#allocation6 + $0x210] sm:$0xf0]  ;;  %v6851_v23 = vld [vmem:[#allocation6 + $0x304] sm:$0xf]  ;;  %v108_v38 = vperm.slane %v100_v33, 0 }
  0x4d   :  { %1091 = vmatpush.bf16.msra.mxu3 %v5023_v47  ;;  %v4831_v22 = vor.u32 %v6819_v20, %v4828_v21  ;;  %v4956_v24 = vld [vmem:[#allocation6 + $0x310] sm:$0xf0]  ;;  %v4930_v14 = vld [vmem:[#allocation6 + $0x2c8] sm:$0xf]  ;;  %v6846_v15 = vld [vmem:[#allocation6 + $0x2d4] sm:$0xf0] }
  0x4e   :  { %1053 = vmatpush.bf16.msra.mxu0 %v4623_v40  ;;  %v4959_v26 = vor.u32 %v6851_v23, %v4956_v24  ;;  %v4690_v40 = vld [vmem:[#allocation6 + $0xe8] sm:$0xf]  ;;  %v6774_v21 = vld [vmem:[#allocation6 + $0x94] sm:$0xf0]  ;;  %v4931_v24 = vor.u32 %v6846_v15, %v4930_v14  ;;  %v6816_v14 = vld [vmem:[#allocation6 + $0x1ec] sm:$0xf] }
  0x4f   :  { %1066 = vmatpush.bf16.msra.mxu1 %v4751_v41  ;;  %v6786_v41 = vld [vmem:[#allocation6 + $0xf4] sm:$0xf0]  ;;  %v5058_v16 = vld [vmem:[#allocation6 + $0x3c8] sm:$0xf]  ;;  %v4820_v15 = vld [vmem:[#allocation6 + $0x1f8] sm:$0xf0] }
  0x50   :  { %1079 = vmatpush.bf16.msra.mxu2 %v4879_v57  ;;  %v4642_v20 = vld [vmem:[#allocation6 + $0x88] sm:$0xf]  ;;  %v6806_v23 = vld [vmem:[#allocation6 + $0x194] sm:$0xf0] }
  0x51   :  { %1092 = vmatpush.bf16.msra.mxu3 %v5007_v59  ;;  %v6814_v59 = vld [vmem:[#allocation6 + $0x1d4] sm:$0xf0]  ;;  %v4914_v27 = vld [vmem:[#allocation6 + $0x2a8] sm:$0xf] }
  0x52   :  { %1054 = vmatpush.bf16.msra.mxu0 %v4607_v51  ;;  %v4691_v51 = vor.u32 %v6786_v41, %v4690_v40  ;;  %v4803_v0 = vor.u32 %v6814_v59, %v4802_v58  ;;  %v6770_v33 = vld [vmem:[#allocation6 + $0x74] sm:$0xf0]  ;;  %v4915_v36 = vor.u32 %v6842_v28, %v4914_v27  ;;  %v4610_v44 = vld [vmem:[#allocation6 + $0x48] sm:$0xf]  ;;  %v4676_v28 = vld [vmem:[#allocation6 + $0xd8] sm:$0xf0] }
  0x53   :  { %1067 = vmatpush.bf16.msra.mxu1 %v4735_v53  ;;  %v6870_v43 = vld [vmem:[#allocation6 + $0x394] sm:$0xf0]  ;;  %v5010_v55 = vld [vmem:[#allocation6 + $0x368] sm:$0xf] }
  0x54   :  { %1080 = vmatpush.bf16.msra.mxu2 %v4863_v5  ;;  %v4786_v5 = vld [vmem:[#allocation6 + $0x1a8] sm:$0xf]  ;;  %v6866_v56 = vld [vmem:[#allocation6 + $0x374] sm:$0xf0] }
  0x55   :  { %1093 = vmatpush.bf16.msra.mxu3 %v4991_v7  ;;  %v4594_v58 = vld [vmem:[#allocation6 + $0x28] sm:$0xf]  ;;  %v6762_v59 = vld [vmem:[#allocation6 + $0x34] sm:$0xf0] }
  0x56   :  { %1055 = vmatpush.bf16.msra.mxu0 %v4591_v63  ;;  %v5074_v63 = vld [vmem:[#allocation6 + $0x3e8] sm:$0xf]  ;;  %v6794_v61 = vld [vmem:[#allocation6 + $0x134] sm:$0xf0] }
  0x57   :  { %1068 = vmatpush.bf16.msra.mxu1 %v4719_v1  ;;  %v6882_v1 = vld [vmem:[#allocation6 + $0x3f4] sm:$0xf0] }
  0x58   :  { %1081 = vmatpush.bf16.msra.mxu2 %v4847_v18  ;;  %v5075_v12 = vor.u32 %v6882_v1, %v5074_v63  ;;  %v4787_v18 = vor.u32 %v6810_v6, %v4786_v5  ;;  %v5011_v63 = vor.u32 %v6866_v56, %v5010_v55  ;;  %v6830_v1 = vld [vmem:[#allocation6 + $0x254] sm:$0xf0]  ;;  %v4578_v6 = vld [vmem:[#allocation6 + $0x8] sm:$0xf]  ;;  %v6876_v55 = vld [vmem:[#allocation6 + $0x3cc] sm:$0xf] }
  0x59   :  { %1094 = vmatpush.bf16.msra.mxu3 %v4975_v19  ;;  %v6878_v19 = vld [vmem:[#allocation6 + $0x3d4] sm:$0xf0]  ;;  %v5060_v56 = vld [vmem:[#allocation6 + $0x3d8] sm:$0xf0] }
  0x5a   :  { %1056 = vmatpush.bf16.msra.mxu0 %v4575_v11  ;;  %v5059_v25 = vor.u32 %v6878_v19, %v5058_v16  ;;  %v6862_v5 = vld [vmem:[#allocation6 + $0x354] sm:$0xf0] }
  0x5b   :  { %1069 = vmatpush.bf16.msra.mxu1 %v4703_v13  ;;  %v4659_v13 = vor.u32 %v6778_v3, %v4658_v2  ;;  %v4994_v2 = vld [vmem:[#allocation6 + $0x348] sm:$0xf]  ;;  %v4595_v3 = vor.u32 %v6762_v59, %v4594_v58  ;;  %v6826_v19 = vld [vmem:[#allocation6 + $0x234] sm:$0xf0]  ;;  %v6772_v58 = vld [vmem:[#allocation6 + $0x8c] sm:$0xf] }
  0x5c   :  { %1082 = vmatpush.bf16.msra.mxu2 %v4831_v22  ;;  %v4770_v22 = vld [vmem:[#allocation6 + $0x188] sm:$0xf]  ;;  %v4995_v16 = vor.u32 %v6862_v5, %v4994_v2  ;;  %v4644_v59 = vld [vmem:[#allocation6 + $0x98] sm:$0xf0] }
  0x5d   :  { %1095 = vmatpush.bf16.msra.mxu3 %v4959_v26  ;;  %v4643_v26 = vor.u32 %v6774_v21, %v4642_v20  ;;  %v4771_v29 = vor.u32 %v6806_v23, %v4770_v22  ;;  %v4978_v22 = vld [vmem:[#allocation6 + $0x328] sm:$0xf]  ;;  %v6858_v23 = vld [vmem:[#allocation6 + $0x334] sm:$0xf0]  ;;  %v4647_v2 = vor.u32 %v6772_v58, %v4644_v59  ;;  %v5044_v5 = vld [vmem:[#allocation6 + $0x3b8] sm:$0xf0] }
  0x9a   :  { %v163_v32 = vpop.f32.mrf.mxu0 }
  0x9b   :  { %v164_v34 = vadd.f32 %v163_v32, %v106_v30  ;;  %v176_v35 = vpop.f32.mrf.mxu1  ;;  %v5042_v30 = vld [vmem:[#allocation6 + $0x3a8] sm:$0xf] }
  0x9c   :  { %v177_v37 = vadd.f32 %v176_v35, %v107_v31  ;;  %v6874_v31 = vld [vmem:[#allocation6 + $0x3b4] sm:$0xf0]  ;;  %v4626_v32 = vld [vmem:[#allocation6 + $0x68] sm:$0xf] }
  0x9d   :  { %7307 = vtanh.f32 %v164_v34  ;;  %v4754_v34 = vld [vmem:[#allocation6 + $0x168] sm:$0xf]  ;;  %v6802_v35 = vld [vmem:[#allocation6 + $0x174] sm:$0xf0]  ;;  %v4627_v40 = vor.u32 %v6770_v33, %v4626_v32 }
  0x9e   :  { %7309 = vtanh.f32 %v177_v37  ;;  %v5043_v37 = vor.u32 %v6874_v31, %v5042_v30  ;;  %v4755_v41 = vor.u32 %v6802_v35, %v4754_v34  ;;  %v4804_v30 = vld [vmem:[#allocation6 + $0x1d8] sm:$0xf0]  ;;  %v4979_v31 = vor.u32 %v6858_v23, %v4978_v22  ;;  %v4834_v32 = vld [vmem:[#allocation6 + $0x208] sm:$0xf]  ;;  %v6822_v33 = vld [vmem:[#allocation6 + $0x214] sm:$0xf0] }
  0x9f   :  { %v4962_v34 = vld [vmem:[#allocation6 + $0x308] sm:$0xf]  ;;  %v6854_v35 = vld [vmem:[#allocation6 + $0x314] sm:$0xf0]  ;;  %v6796_v22 = vld [vmem:[#allocation6 + $0x14c] sm:$0xf] }
  0xa0   :  { %v4740_v23 = vld [vmem:[#allocation6 + $0x158] sm:$0xf0] }
  0xa2   :  { %v189_v42 = vpop.f32.mrf.mxu2  ;;  %v165_v47 = vpop.f32.mrf.mxu0 }
  0xa3   :  { %v190_v45 = vadd.f32 %v189_v42, %v108_v38  ;;  %v202_v46 = vpop.f32.mrf.mxu3  ;;  %v7308_v48 = vpop.eup %7307  ;;  %v4898_v38 = vld [vmem:[#allocation6 + $0x288] sm:$0xf]  ;;  %v6798_v47 = vld [vmem:[#allocation6 + $0x154] sm:$0xf0] }
  0xa4   :  { %v203_v49 = vadd.f32 %v202_v46, %v109_v39  ;;  %v178_v50 = vpop.f32.mrf.mxu1  ;;  %v7310_v52 = vpop.eup %7309  ;;  %v7511_v53 = vpack.c.bf16 %v7308_v48, %v7308_v48  ;;  %v6838_v39 = vld [vmem:[#allocation6 + $0x294] sm:$0xf0]  ;;  %v5026_v42 = vld [vmem:[#allocation6 + $0x388] sm:$0xf] }
  0xa5   :  { %7311 = vtanh.f32 %v190_v45  ;;  %v7513_v57 = vpack.c.bf16 %v7310_v52, %v7310_v52  ;;  %v6766_v45 = vld [vmem:[#allocation6 + $0x54] sm:$0xf0]  ;;  %v4738_v46 = vld [vmem:[#allocation6 + $0x148] sm:$0xf]  ;;  %v4899_v48 = vor.u32 %v6838_v39, %v4898_v38 }
  0xa6   :  { %7313 = vtanh.f32 %v203_v49  ;;  %1005 = vmatmul.bf16.vlgmr.msrb.gmra.mxu0 %v7511_v53  ;;  %v5027_v49 = vor.u32 %v6870_v43, %v5026_v42  ;;  %v4882_v50 = vld [vmem:[#allocation6 + $0x268] sm:$0xf]  ;;  %v4611_v52 = vor.u32 %v6766_v45, %v4610_v44  ;;  %v6776_v42 = vld [vmem:[#allocation6 + $0xac] sm:$0xf]  ;;  %v4835_v43 = vor.u32 %v6822_v33, %v4834_v32  ;;  %v4660_v44 = vld [vmem:[#allocation6 + $0xb8] sm:$0xf0] }
  0xa7   :  { %1018 = vmatmul.bf16.vlgmr.msrb.gmra.mxu1 %v7513_v57  ;;  %1101 = vmatpush.bf16.msrb.mxu0 %v4691_v51  ;;  %v6834_v51 = vld [vmem:[#allocation6 + $0x274] sm:$0xf0]  ;;  %v6808_v45 = vld [vmem:[#allocation6 + $0x1ac] sm:$0xf]  ;;  %v4596_v33 = vld [vmem:[#allocation6 + $0x38] sm:$0xf0] }
  0xa8   :  { %1114 = vmatpush.bf16.msrb.mxu1 %v4819_v54  ;;  %v4739_v54 = vor.u32 %v6798_v47, %v4738_v46  ;;  %v4883_v62 = vor.u32 %v6834_v51, %v4882_v50  ;;  %v4788_v46 = vld [vmem:[#allocation6 + $0x1b8] sm:$0xf0]  ;;  %v4963_v47 = vor.u32 %v6854_v35, %v4962_v34  ;;  %v6844_v50 = vld [vmem:[#allocation6 + $0x2cc] sm:$0xf] }
  0xa9   :  { %v4932_v51 = vld [vmem:[#allocation6 + $0x2d8] sm:$0xf0]  ;;  %v6760_v32 = vld [vmem:[#allocation6 + $0x2c] sm:$0xf] }
  0xaa   :  { %v191_v4 = vpop.f32.mrf.mxu2  ;;  %v6792_v34 = vld [vmem:[#allocation6 + $0x12c] sm:$0xf]  ;;  %v4724_v35 = vld [vmem:[#allocation6 + $0x138] sm:$0xf0] }
  0xab   :  { %v7312_v7 = vpop.eup %7311  ;;  %v204_v8 = vpop.f32.mrf.mxu3  ;;  %1102 = vmatpush.bf16.msrb.mxu0 %v4675_v60  ;;  %v4722_v60 = vld [vmem:[#allocation6 + $0x128] sm:$0xf] }
  0xac   :  { %v7314_v10 = vpop.eup %7313  ;;  %v7517_v11 = vpack.c.bf16 %v7312_v7, %v7312_v7  ;;  %1115 = vmatpush.bf16.msrb.mxu1 %v4803_v0  ;;  %v4866_v0 = vld [vmem:[#allocation6 + $0x248] sm:$0xf]  ;;  %v4723_v4 = vor.u32 %v6794_v61, %v4722_v60  ;;  %v6758_v7 = vld [vmem:[#allocation6 + $0x14] sm:$0xf0]  ;;  %v6804_v60 = vld [vmem:[#allocation6 + $0x18c] sm:$0xf] }
  0xad   :  { %v7519_v17 = vpack.c.bf16 %v7314_v10, %v7314_v10  ;;  %v4706_v8 = vld [vmem:[#allocation6 + $0x108] sm:$0xf]  ;;  %v6784_v10 = vld [vmem:[#allocation6 + $0xec] sm:$0xf]  ;;  %v4579_v20 = vor.u32 %v6758_v7, %v4578_v6  ;;  %v4772_v61 = vld [vmem:[#allocation6 + $0x198] sm:$0xf0] }
  0xae   :  { %1031 = vmatmul.bf16.vlgmr.msrb.gmra.mxu2 %v7517_v11  ;;  %v6768_v6 = vld [vmem:[#allocation6 + $0x6c] sm:$0xf]  ;;  %v4628_v7 = vld [vmem:[#allocation6 + $0x78] sm:$0xf0] }
  0xaf   :  { %1044 = vmatmul.bf16.vlgmr.msrb.gmra.mxu3 %v7519_v17  ;;  %1127 = vmatpush.bf16.msrb.mxu2 %v4947_v9  ;;  %v6790_v9 = vld [vmem:[#allocation6 + $0x114] sm:$0xf0] }
  0xb0   :  { %1140 = vmatpush.bf16.msrb.mxu3 %v5075_v12  ;;  %1103 = vmatpush.bf16.msrb.mxu0 %v4659_v13  ;;  %v4867_v12 = vor.u32 %v6830_v1, %v4866_v0  ;;  %v4692_v13 = vld [vmem:[#allocation6 + $0xf8] sm:$0xf0]  ;;  %v4707_v21 = vor.u32 %v6790_v9, %v4706_v8  ;;  %v6840_v0 = vld [vmem:[#allocation6 + $0x2ac] sm:$0xf] }
  0xb1   :  { %1116 = vmatpush.bf16.msrb.mxu1 %v4787_v18  ;;  %v4850_v18 = vld [vmem:[#allocation6 + $0x228] sm:$0xf]  ;;  %v4916_v1 = vld [vmem:[#allocation6 + $0x2b8] sm:$0xf0]  ;;  %v6800_v8 = vld [vmem:[#allocation6 + $0x16c] sm:$0xf] }
  0xb2   :  { %v4851_v27 = vor.u32 %v6826_v19, %v4850_v18  ;;  %v4756_v9 = vld [vmem:[#allocation6 + $0x178] sm:$0xf0]  ;;  %v6868_v18 = vld [vmem:[#allocation6 + $0x38c] sm:$0xf] }
  0xb3   :  { %1128 = vmatpush.bf16.msrb.mxu2 %v4931_v24  ;;  %v4695_v24 = vor.u32 %v6784_v10, %v4692_v13  ;;  %v4919_v10 = vor.u32 %v6840_v0, %v4916_v1  ;;  %v6836_v13 = vld [vmem:[#allocation6 + $0x28c] sm:$0xf]  ;;  %v5028_v19 = vld [vmem:[#allocation6 + $0x398] sm:$0xf0] }
  0xb4   :  { %1141 = vmatpush.bf16.msrb.mxu3 %v5059_v25  ;;  %1104 = vmatpush.bf16.msrb.mxu0 %v4643_v26  ;;  %v4823_v25 = vor.u32 %v6816_v14, %v4820_v15  ;;  %v6780_v26 = vld [vmem:[#allocation6 + $0xcc] sm:$0xf]  ;;  %v4900_v14 = vld [vmem:[#allocation6 + $0x298] sm:$0xf0]  ;;  %v4631_v15 = vor.u32 %v6768_v6, %v4628_v7 }
  0xb5   :  { %1117 = vmatpush.bf16.msrb.mxu1 %v4771_v29  ;;  %v6812_v29 = vld [vmem:[#allocation6 + $0x1cc] sm:$0xf]  ;;  %v4679_v38 = vor.u32 %v6780_v26, %v4676_v28  ;;  %v4836_v7 = vld [vmem:[#allocation6 + $0x218] sm:$0xf0] }
  0xb6   :  { %1057 = vmatmul.bf16.vlgmr.msra.gmra.mxu0 %v7511_v53  ;;  %v4807_v39 = vor.u32 %v6812_v29, %v4804_v30  ;;  %v6832_v26 = vld [vmem:[#allocation6 + $0x26c] sm:$0xf]  ;;  %v4743_v29 = vor.u32 %v6796_v22, %v4740_v23  ;;  %v6901_v22 = vld [vmem:[#allocation6 + $0x48c] sm:$0xf0] }
  0xb7   :  { %1129 = vmatpush.bf16.msrb.mxu2 %v4915_v36  ;;  %1070 = vmatmul.bf16.vlgmr.msra.gmra.mxu1 %v7513_v57  ;;  %v6848_v36 = vld [vmem:[#allocation6 + $0x2ec] sm:$0xf] }
  0xb8   :  { %1142 = vmatpush.bf16.msrb.mxu3 %v5043_v37  ;;  %1105 = vmatpush.bf16.msrb.mxu0 %v4627_v40  ;;  %v4948_v37 = vld [vmem:[#allocation6 + $0x2f8] sm:$0xf0]  ;;  %v6880_v40 = vld [vmem:[#allocation6 + $0x3ec] sm:$0xf] }
  0xb9   :  { %1118 = vmatpush.bf16.msrb.mxu1 %v4755_v41  ;;  %v5076_v41 = vld [vmem:[#allocation6 + $0x3f8] sm:$0xf0]  ;;  %v6864_v30 = vld [vmem:[#allocation6 + $0x36c] sm:$0xf] }
  0xba   :  { %v6820_v6 = vld [vmem:[#allocation6 + $0x20c] sm:$0xf] }
  0xbb   :  { %1130 = vmatpush.bf16.msrb.mxu2 %v4899_v48  ;;  %v4951_v48 = vor.u32 %v6848_v36, %v4948_v37 }
  0xbc   :  { %1143 = vmatpush.bf16.msrb.mxu3 %v5027_v49  ;;  %1106 = vmatpush.bf16.msrb.mxu0 %v4611_v52  ;;  %v5079_v49 = vor.u32 %v6880_v40, %v5076_v41  ;;  %v4663_v52 = vor.u32 %v6776_v42, %v4660_v44  ;;  %v6860_v40 = vld [vmem:[#allocation6 + $0x34c] sm:$0xf]  ;;  %v4599_v41 = vor.u32 %v6760_v32, %v4596_v33  ;;  %v5099_v32 = vld [vmem:[#allocation6 + $0x420] sm:$0xf]  ;;  %v6889_v33 = vld [vmem:[#allocation6 + $0x42c] sm:$0xf0] }
  0xbd   :  { %1119 = vmatpush.bf16.msrb.mxu1 %v4739_v54  ;;  %v4791_v54 = vor.u32 %v6808_v45, %v4788_v46  ;;  %v4727_v42 = vor.u32 %v6792_v34, %v4724_v35  ;;  %v6756_v44 = vld [vmem:[#allocation6 + $0xc] sm:$0xf]  ;;  %v4580_v45 = vld [vmem:[#allocation6 + $0x18] sm:$0xf0]  ;;  %v5100_v34 = vor.u32 %v6889_v33, %v5099_v32  ;;  %v6885_v35 = vld [vmem:[#allocation6 + $0x40c] sm:$0xf0] }
  0xbe   :  { %1083 = vmatmul.bf16.vlgmr.msra.gmra.mxu2 %v7517_v11  ;;  %v6788_v46 = vld [vmem:[#allocation6 + $0x10c] sm:$0xf]  ;;  %v4583_v58 = vor.u32 %v6756_v44, %v4580_v45  ;;  %v6907_v44 = vld [vmem:[#allocation6 + $0x4c4] sm:$0xf]  ;;  %v5181_v45 = vld [vmem:[#allocation6 + $0x4d0] sm:$0xf0] }
  0xbf   :  { %1096 = vmatmul.bf16.vlgmr.msra.gmra.mxu3 %v7519_v17  ;;  %1131 = vmatpush.bf16.msrb.mxu2 %v4883_v62  ;;  %v4935_v62 = vor.u32 %v6844_v50, %v4932_v51  ;;  %v6913_v50 = vld [vmem:[#allocation6 + $0x4ec] sm:$0xf0]  ;;  %v5323_v51 = vld [vmem:[#allocation6 + $0x5e0] sm:$0xf]  ;;  %v5293_v32 = vld [vmem:[#allocation6 + $0x5b0] sm:$0xf0] }
  0xc0   :  { %1144 = vmatpush.bf16.msrb.mxu3 %v5011_v63  ;;  %1107 = vmatpush.bf16.msrb.mxu0 %v4595_v3  ;;  %v5063_v63 = vor.u32 %v6876_v55, %v5060_v56  ;;  %v4775_v3 = vor.u32 %v6804_v60, %v4772_v61  ;;  %v6824_v55 = vld [vmem:[#allocation6 + $0x22c] sm:$0xf]  ;;  %v4852_v56 = vld [vmem:[#allocation6 + $0x238] sm:$0xf0] }
  0xc1   :  { %1120 = vmatpush.bf16.msrb.mxu1 %v4723_v4  ;;  %v6872_v4 = vld [vmem:[#allocation6 + $0x3ac] sm:$0xf]  ;;  %v4980_v61 = vld [vmem:[#allocation6 + $0x338] sm:$0xf0]  ;;  %v4855_v1 = vor.u32 %v6824_v55, %v4852_v56  ;;  %v5165_v55 = vld [vmem:[#allocation6 + $0x4b0] sm:$0xf0] }
  0xc2   :  { %v6856_v60 = vld [vmem:[#allocation6 + $0x32c] sm:$0xf]  ;;  %v342_v33 = vld [vmem:[%s7737_s4] sm:$0xf] }
  0xc3   :  { %1132 = vmatpush.bf16.msrb.mxu2 %v4867_v12  ;;  %v5047_v12 = vor.u32 %v6872_v4, %v5044_v5  ;;  %v6941_v4 = vld [vmem:[#allocation6 + $0x5cc] sm:$0xf0]  ;;  %v4983_v5 = vor.u32 %v6856_v60, %v4980_v61  ;;  %v5419_v61 = vld [vmem:[#allocation6 + $0x6a0] sm:$0xf] }
  0xc4   :  { %1145 = vmatpush.bf16.msrb.mxu3 %v4995_v16  ;;  %1108 = vmatpush.bf16.msrb.mxu0 %v4579_v20  ;;  %v4759_v16 = vor.u32 %v6800_v8, %v4756_v9  ;;  %v6764_v20 = vld [vmem:[#allocation6 + $0x4c] sm:$0xf]  ;;  %v4964_v9 = vld [vmem:[#allocation6 + $0x318] sm:$0xf0]  ;;  %v6921_v60 = vld [vmem:[#allocation6 + $0x52c] sm:$0xf0] }
  0xc5   :  { %1121 = vmatpush.bf16.msrb.mxu1 %v4707_v21  ;;  %v4612_v21 = vld [vmem:[#allocation6 + $0x58] sm:$0xf0]  ;;  %v6852_v8 = vld [vmem:[#allocation6 + $0x30c] sm:$0xf] }
  0xc6   :  { %v4615_v28 = vor.u32 %v6764_v20, %v4612_v21  ;;  %v5147_v21 = vld [vmem:[#allocation6 + $0x480] sm:$0xf] }
  0xc7   :  { %1133 = vmatpush.bf16.msrb.mxu2 %v4851_v27  ;;  %1109 = vmatmul.bf16.vlgmr.msrb.gmra.mxu0 %v7511_v53  ;;  %v4884_v27 = vld [vmem:[#allocation6 + $0x278] sm:$0xf0] }
  0xc8   :  { %1153 = vmatpush.bf16.msra.mxu0 %v4695_v24  ;;  %1146 = vmatpush.bf16.msrb.mxu3 %v4979_v31  ;;  %v4903_v24 = vor.u32 %v6836_v13, %v4900_v14  ;;  %v5012_v31 = vld [vmem:[#allocation6 + $0x378] sm:$0xf0]  ;;  %v4887_v36 = vor.u32 %v6832_v26, %v4884_v27  ;;  %v4839_v13 = vor.u32 %v6820_v6, %v4836_v7  ;;  %v5163_v14 = vld [vmem:[#allocation6 + $0x4a0] sm:$0xf]  ;;  %v6897_v27 = vld [vmem:[#allocation6 + $0x46c] sm:$0xf0] }
  0xc9   :  { %1166 = vmatpush.bf16.msra.mxu1 %v4823_v25  ;;  %v5031_v25 = vor.u32 %v6868_v18, %v5028_v19  ;;  %v5015_v37 = vor.u32 %v6864_v30, %v5012_v31  ;;  %v5291_v18 = vld [vmem:[#allocation6 + $0x5a0] sm:$0xf]  ;;  %v6937_v19 = vld [vmem:[#allocation6 + $0x5ac] sm:$0xf0]  ;;  %v5148_v26 = vor.u32 %v6901_v22, %v5147_v21  ;;  %v6891_v21 = vld [vmem:[#allocation6 + $0x444] sm:$0xf] }
  0xca   :  { %1122 = vmatmul.bf16.vlgmr.msrb.gmra.mxu1 %v7513_v57  ;;  %v5292_v23 = vor.u32 %v6937_v19, %v5291_v18  ;;  %v6893_v30 = vld [vmem:[#allocation6 + $0x44c] sm:$0xf0]  ;;  %v5403_v6 = vld [vmem:[#allocation6 + $0x680] sm:$0xf]  ;;  %v5117_v22 = vld [vmem:[#allocation6 + $0x450] sm:$0xf0] }
  0xcb   :  { %1134 = vmatpush.bf16.msrb.mxu2 %v4835_v43  ;;  %v4996_v43 = vld [vmem:[#allocation6 + $0x358] sm:$0xf0]  ;;  %v5387_v18 = vld [vmem:[#allocation6 + $0x660] sm:$0xf]  ;;  %v6961_v19 = vld [vmem:[#allocation6 + $0x66c] sm:$0xf0] }
  0xcc   :  { %1154 = vmatpush.bf16.msra.mxu0 %v4679_v38  ;;  %1147 = vmatpush.bf16.msrb.mxu3 %v4963_v47  ;;  %v6828_v38 = vld [vmem:[#allocation6 + $0x24c] sm:$0xf]  ;;  %v4708_v47 = vld [vmem:[#allocation6 + $0x118] sm:$0xf0] }
  0xcd   :  { %1167 = vmatpush.bf16.msra.mxu1 %v4807_v39  ;;  %v4868_v39 = vld [vmem:[#allocation6 + $0x258] sm:$0xf0]  ;;  %v4711_v59 = vor.u32 %v6788_v46, %v4708_v47  ;;  %v5184_v47 = vor.u32 %v6907_v44, %v5181_v45  ;;  %v6949_v44 = vld [vmem:[#allocation6 + $0x60c] sm:$0xf0]  ;;  %v5579_v45 = vld [vmem:[#allocation6 + $0x7e0] sm:$0xf] }
  0xce   :  { %1135 = vmatmul.bf16.vlgmr.msrb.gmra.mxu2 %v7517_v11 }
  0xcf   :  { %1179 = vmatpush.bf16.msra.mxu2 %v4951_v48  ;;  %1148 = vmatmul.bf16.vlgmr.msrb.gmra.mxu3 %v7519_v17  ;;  %v5195_v48 = vld [vmem:[#allocation6 + $0x4e0] sm:$0xf] }
  0xd0   :  { %1192 = vmatpush.bf16.msra.mxu3 %v5079_v49  ;;  %1155 = vmatpush.bf16.msra.mxu0 %v4663_v52  ;;  %v4871_v49 = vor.u32 %v6828_v38, %v4868_v39  ;;  %v6945_v52 = vld [vmem:[#allocation6 + $0x5ec] sm:$0xf0]  ;;  %v5259_v39 = vld [vmem:[#allocation6 + $0x560] sm:$0xf] }
  0xd1   :  { %1168 = vmatpush.bf16.msra.mxu1 %v4791_v54  ;;  %v4999_v54 = vor.u32 %v6860_v40, %v4996_v43  ;;  %v5324_v0 = vor.u32 %v6945_v52, %v5323_v51  ;;  %v6929_v40 = vld [vmem:[#allocation6 + $0x56c] sm:$0xf0] }
  0xd2   :  { %v6977_v43 = vld [vmem:[#allocation6 + $0x6ec] sm:$0xf0] }
  0xd3   :  { %1180 = vmatpush.bf16.msra.mxu2 %v4935_v62  ;;  %v5196_v62 = vor.u32 %v6913_v50, %v5195_v48  ;;  %v5243_v48 = vld [vmem:[#allocation6 + $0x540] sm:$0xf]  ;;  %v6973_v52 = vld [vmem:[#allocation6 + $0x6cc] sm:$0xf0] }
  0xd4   :  { %1193 = vmatpush.bf16.msra.mxu3 %v5063_v63  ;;  %1156 = vmatpush.bf16.msra.mxu0 %v4647_v2  ;;  %v5179_v63 = vld [vmem:[#allocation6 + $0x4c0] sm:$0xf]  ;;  %v6909_v2 = vld [vmem:[#allocation6 + $0x4cc] sm:$0xf0] }
  0xd5   :  { %1169 = vmatpush.bf16.msra.mxu1 %v4775_v3  ;;  %v5307_v3 = vld [vmem:[#allocation6 + $0x5c0] sm:$0xf] }
  0xd6   :  { %v5435_v50 = vld [vmem:[#allocation6 + $0x6c0] sm:$0xf] }
  0xd7   :  { %1181 = vmatpush.bf16.msra.mxu2 %v4919_v10  ;;  %v5180_v10 = vor.u32 %v6909_v2, %v5179_v63  ;;  %v5436_v56 = vor.u32 %v6973_v52, %v5435_v50  ;;  %v6969_v63 = vld [vmem:[#allocation6 + $0x6ac] sm:$0xf0] }
  0xd8   :  { %1194 = vmatpush.bf16.msra.mxu3 %v5047_v12  ;;  %1157 = vmatpush.bf16.msra.mxu0 %v4631_v15  ;;  %v5308_v12 = vor.u32 %v6941_v4, %v5307_v3  ;;  %v6905_v15 = vld [vmem:[#allocation6 + $0x4ac] sm:$0xf0]  ;;  %v5420_v2 = vor.u32 %v6969_v63, %v5419_v61  ;;  %v5211_v4 = vld [vmem:[#allocation6 + $0x500] sm:$0xf]  ;;  %v6923_v63 = vld [vmem:[#allocation6 + $0x544] sm:$0xf] }
  0xd9   :  { %1170 = vmatpush.bf16.msra.mxu1 %v4759_v16  ;;  %v4967_v16 = vor.u32 %v6852_v8, %v4964_v9  ;;  %v5164_v20 = vor.u32 %v6905_v15, %v5163_v14  ;;  %v6965_v8 = vld [vmem:[#allocation6 + $0x68c] sm:$0xf0]  ;;  %v6895_v9 = vld [vmem:[#allocation6 + $0x464] sm:$0xf]  ;;  %v5325_v15 = vld [vmem:[#allocation6 + $0x5f0] sm:$0xf0] }
  0xda   :  { %v6943_v14 = vld [vmem:[#allocation6 + $0x5e4] sm:$0xf] }
  0xdb   :  { %1182 = vmatpush.bf16.msra.mxu2 %v4903_v24  ;;  %v5275_v24 = vld [vmem:[#allocation6 + $0x580] sm:$0xf] }
  0xdc   :  { %1195 = vmatpush.bf16.msra.mxu3 %v5031_v25  ;;  %1158 = vmatpush.bf16.msra.mxu0 %v4615_v28  ;;  %v6933_v25 = vld [vmem:[#allocation6 + $0x58c] sm:$0xf0] }
  0xdd   :  { %1171 = vmatpush.bf16.msra.mxu1 %v4743_v29  ;;  %v5115_v29 = vld [vmem:[#allocation6 + $0x440] sm:$0xf] }
  0xde   :  { %v5116_v31 = vor.u32 %v6893_v30, %v5115_v29  ;;  %v5101_v29 = vld [vmem:[#allocation6 + $0x430] sm:$0xf0]  ;;  %v6935_v30 = vld [vmem:[#allocation6 + $0x5a4] sm:$0xf] }
  0xdf   :  { %1183 = vmatpush.bf16.msra.mxu2 %v4887_v36  ;;  %v6911_v36 = vld [vmem:[#allocation6 + $0x4e4] sm:$0xf] }
  0xe0   :  { %1196 = vmatpush.bf16.msra.mxu3 %v5015_v37  ;;  %1159 = vmatpush.bf16.msra.mxu0 %v4599_v41  ;;  %v5197_v37 = vld [vmem:[#allocation6 + $0x4f0] sm:$0xf0]  ;;  %v5451_v41 = vld [vmem:[#allocation6 + $0x6e0] sm:$0xf] }
  0xe1   :  { %1172 = vmatpush.bf16.msra.mxu1 %v4727_v42  ;;  %v5200_v38 = vor.u32 %v6911_v36, %v5197_v37  ;;  %v5260_v42 = vor.u32 %v6929_v40, %v5259_v39  ;;  %v5452_v46 = vor.u32 %v6977_v43, %v5451_v41  ;;  %v6883_v37 = vld [vmem:[#allocation6 + $0x404] sm:$0xf]  ;;  %v7538_v39 = vunpack.c.l.bf16 %v342_v33  ;;  %v5277_v41 = vld [vmem:[#allocation6 + $0x590] sm:$0xf0]  ;;  %v5339_v43 = vld [vmem:[#allocation6 + $0x600] sm:$0xf] }
  0xe2   :  { %v5389_v33 = vld [vmem:[#allocation6 + $0x670] sm:$0xf0] }
  0xe3   :  { %1184 = vmatpush.bf16.msra.mxu2 %v4871_v49  ;;  %v6925_v49 = vld [vmem:[#allocation6 + $0x54c] sm:$0xf0]  ;;  %v345_v50 = vperm.slane %v7538_v39, 0 }
  0xe4   :  { %1197 = vmatpush.bf16.msra.mxu3 %v4999_v54  ;;  %1160 = vmatpush.bf16.msra.mxu0 %v4583_v58  ;;  %v5244_v51 = vor.u32 %v6925_v49, %v5243_v48  ;;  %v6903_v54 = vld [vmem:[#allocation6 + $0x4a4] sm:$0xf]  ;;  %v5261_v49 = vld [vmem:[#allocation6 + $0x570] sm:$0xf0] }
  0xe5   :  { %1173 = vmatpush.bf16.msra.mxu1 %v4711_v59  ;;  %v5168_v58 = vor.u32 %v6903_v54, %v5165_v55  ;;  %v5227_v59 = vld [vmem:[#allocation6 + $0x520] sm:$0xf]  ;;  %v6927_v48 = vld [vmem:[#allocation6 + $0x564] sm:$0xf]  ;;  %v5453_v55 = vld [vmem:[#allocation6 + $0x6f0] sm:$0xf0] }
  0xe6   :  { %v5264_v52 = vor.u32 %v6927_v48, %v5261_v49  ;;  %v6975_v54 = vld [vmem:[#allocation6 + $0x6e4] sm:$0xf]  ;;  %v5483_v48 = vld [vmem:[#allocation6 + $0x720] sm:$0xf]  ;;  %v6985_v49 = vld [vmem:[#allocation6 + $0x72c] sm:$0xf0] }
  0xe7   :  { %1185 = vmatpush.bf16.msra.mxu2 %v4855_v1  ;;  %1161 = vmatmul.bf16.vlgmr.msra.gmra.mxu0 %v7511_v53  ;;  %v5131_v53 = vld [vmem:[#allocation6 + $0x460] sm:$0xf]  ;;  %v5149_v1 = vld [vmem:[#allocation6 + $0x490] sm:$0xf0] }
  0xe8   :  { %1998 = vmatpush.bf16.msrb.mxu0 %v5196_v62  ;;  %1198 = vmatpush.bf16.msra.mxu3 %v4983_v5  ;;  %v5132_v28 = vor.u32 %v6897_v27, %v5131_v53  ;;  %v5228_v62 = vor.u32 %v6921_v60, %v5227_v59  ;;  %v6917_v5 = vld [vmem:[#allocation6 + $0x50c] sm:$0xf0]  ;;  %v5371_v53 = vld [vmem:[#allocation6 + $0x640] sm:$0xf] }
  0xe9   :  { %2011 = vmatpush.bf16.msrb.mxu1 %v5324_v0  ;;  %v6899_v0 = vld [vmem:[#allocation6 + $0x484] sm:$0xf]  ;;  %v5212_v7 = vor.u32 %v6917_v5, %v5211_v4  ;;  %v6957_v27 = vld [vmem:[#allocation6 + $0x64c] sm:$0xf0]  ;;  %v5563_v59 = vld [vmem:[#allocation6 + $0x7c0] sm:$0xf] }
  0xea   :  { %1174 = vmatmul.bf16.vlgmr.msra.gmra.mxu1 %v7513_v57  ;;  %v5276_v57 = vor.u32 %v6933_v25, %v5275_v24  ;;  %v5152_v3 = vor.u32 %v6899_v0, %v5149_v1  ;;  %v5120_v24 = vor.u32 %v6891_v21, %v5117_v22  ;;  %v5309_v25 = vld [vmem:[#allocation6 + $0x5d0] sm:$0xf0]  ;;  %v7005_v60 = vld [vmem:[#allocation6 + $0x7cc] sm:$0xf0]  ;;  %v6971_v1 = vld [vmem:[#allocation6 + $0x6c4] sm:$0xf] }
  0xeb   :  { %1186 = vmatpush.bf16.msra.mxu2 %v4839_v13  ;;  %v5245_v0 = vld [vmem:[#allocation6 + $0x550] sm:$0xf0] }
  0xec   :  { %1999 = vmatpush.bf16.msrb.mxu0 %v5180_v10  ;;  %1199 = vmatpush.bf16.msra.mxu3 %v4967_v16  ;;  %v5133_v10 = vld [vmem:[#allocation6 + $0x470] sm:$0xf0]  ;;  %v5328_v16 = vor.u32 %v6943_v14, %v5325_v15 }
  0xed   :  { %2012 = vmatpush.bf16.msrb.mxu1 %v5308_v12  ;;  %v5404_v12 = vor.u32 %v6965_v8, %v5403_v6  ;;  %v5136_v13 = vor.u32 %v6895_v9, %v5133_v10  ;;  %v5437_v4 = vld [vmem:[#allocation6 + $0x6d0] sm:$0xf0]  ;;  %v5547_v6 = vld [vmem:[#allocation6 + $0x7a0] sm:$0xf]  ;;  %v6919_v9 = vld [vmem:[#allocation6 + $0x524] sm:$0xf] }
  0xee   :  { %1187 = vmatmul.bf16.vlgmr.msra.gmra.mxu2 %v7517_v11  ;;  %v5083_v11 = vld [vmem:[#allocation6 + $0x400] sm:$0xf]  ;;  %v5440_v5 = vor.u32 %v6971_v1, %v5437_v4  ;;  %v5229_v10 = vld [vmem:[#allocation6 + $0x530] sm:$0xf0] }
  0xef   :  { %1200 = vmatmul.bf16.vlgmr.msra.gmra.mxu3 %v7519_v17  ;;  %v5084_v17 = vor.u32 %v6885_v35, %v5083_v11  ;;  %2024 = vmatpush.bf16.msrb.mxu2 %v5452_v46  ;;  %v5355_v11 = vld [vmem:[#allocation6 + $0x620] sm:$0xf]  ;;  %v6953_v35 = vld [vmem:[#allocation6 + $0x62c] sm:$0xf0]  ;;  %v5340_v46 = vor.u32 %v6949_v44, %v5339_v43  ;;  %v5232_v14 = vor.u32 %v6919_v9, %v5229_v10  ;;  %v5421_v15 = vld [vmem:[#allocation6 + $0x6b0] sm:$0xf0] }
  0xf0   :  { %2000 = vmatpush.bf16.msrb.mxu0 %v5164_v20  ;;  %v5388_v20 = vor.u32 %v6961_v19, %v5387_v18  ;;  %v5356_v36 = vor.u32 %v6953_v35, %v5355_v11  ;;  %v5531_v19 = vld [vmem:[#allocation6 + $0x780] sm:$0xf]  ;;  %v6955_v43 = vld [vmem:[#allocation6 + $0x644] sm:$0xf]  ;;  %v5373_v44 = vld [vmem:[#allocation6 + $0x650] sm:$0xf0] }
  0xf1   :  { %2013 = vmatpush.bf16.msrb.mxu1 %v5292_v23  ;;  %v6939_v23 = vld [vmem:[#allocation6 + $0x5c4] sm:$0xf]  ;;  %v5467_v1 = vld [vmem:[#allocation6 + $0x700] sm:$0xf]  ;;  %v5581_v10 = vld [vmem:[#allocation6 + $0x7f0] sm:$0xf0] }
  0xf3   :  { %2025 = vmatpush.bf16.msrb.mxu2 %v5436_v56  ;;  %v5456_v56 = vor.u32 %v6975_v54, %v5453_v55  ;;  %v6951_v54 = vld [vmem:[#allocation6 + $0x624] sm:$0xf]  ;;  %v5357_v55 = vld [vmem:[#allocation6 + $0x630] sm:$0xf0] }
  0xf4   :  { %2001 = vmatpush.bf16.msrb.mxu0 %v5148_v26  ;;  %v5312_v26 = vor.u32 %v6939_v23, %v5309_v25  ;;  %v6915_v23 = vld [vmem:[#allocation6 + $0x504] sm:$0xf] }
  0xf5   :  { %2014 = vmatpush.bf16.msrb.mxu1 %v5276_v57  ;;  %v5372_v57 = vor.u32 %v6957_v27, %v5371_v53  ;;  %v6963_v25 = vld [vmem:[#allocation6 + $0x684] sm:$0xf]  ;;  %v5405_v27 = vld [vmem:[#allocation6 + $0x690] sm:$0xf0] }
  0xf7   :  { %2026 = vmatpush.bf16.msrb.mxu2 %v5420_v2  ;;  %v353_v2 = vperm.slane %v345_v50, 0 }
  0xf8   :  { %2002 = vmatpush.bf16.msrb.mxu0 %v5132_v28  ;;  %v6887_v28 = vld [vmem:[#allocation6 + $0x424] sm:$0xf] }
  0xf9   :  { %2015 = vmatpush.bf16.msrb.mxu1 %v5260_v42 }
  0xfb   :  { %2027 = vmatpush.bf16.msrb.mxu2 %v5404_v12  ;;  %v6967_v12 = vld [vmem:[#allocation6 + $0x6a4] sm:$0xf] }
  0xfc   :  { %2003 = vmatpush.bf16.msrb.mxu0 %v5116_v31  ;;  %v5104_v31 = vor.u32 %v6887_v28, %v5101_v29  ;;  %v5515_v28 = vld [vmem:[#allocation6 + $0x760] sm:$0xf]  ;;  %v6993_v29 = vld [vmem:[#allocation6 + $0x76c] sm:$0xf0] }
  0xfd   :  { %2016 = vmatpush.bf16.msrb.mxu1 %v5244_v51 }
  0xff   :  { %2028 = vmatpush.bf16.msrb.mxu2 %v5388_v20  ;;  %v6997_v20 = vld [vmem:[#allocation6 + $0x78c] sm:$0xf0] }
 0x100   :  { %2004 = vmatpush.bf16.msrb.mxu0 %v5100_v34  ;;  %v5296_v34 = vor.u32 %v6935_v30, %v5293_v32  ;;  %v5532_v22 = vor.u32 %v6997_v20, %v5531_v19  ;;  %v6959_v32 = vld [vmem:[#allocation6 + $0x664] sm:$0xf]  ;;  %v5565_v20 = vld [vmem:[#allocation6 + $0x7d0] sm:$0xf0] }
 0x101   :  { %2017 = vmatpush.bf16.msrb.mxu1 %v5228_v62  ;;  %v5564_v62 = vor.u32 %v7005_v60, %v5563_v59  ;;  %v5392_v35 = vor.u32 %v6959_v32, %v5389_v33  ;;  %v5187_v59 = vld [vmem:[#allocation6 + $0x4c8] sm:$0xf]  ;;  %v7003_v19 = vld [vmem:[#allocation6 + $0x7c4] sm:$0xf] }
 0x103   :  { %2029 = vmatpush.bf16.msrb.mxu2 %v5372_v57  ;;  %v5408_v57 = vor.u32 %v6963_v25, %v5405_v27 }
 0x104   :  { %2005 = vmatpush.bf16.msrb.mxu0 %v5084_v17  ;;  %v5085_v17 = vld [vmem:[#allocation6 + $0x410] sm:$0xf0] }
 0x105   :  { %2018 = vmatpush.bf16.msrb.mxu1 %v5212_v7  ;;  %v5088_v40 = vor.u32 %v6883_v37, %v5085_v17  ;;  %v7001_v7 = vld [vmem:[#allocation6 + $0x7ac] sm:$0xf0] }
 0x106   :  { %v5548_v8 = vor.u32 %v7001_v7, %v5547_v6  ;;  %v6947_v6 = vld [vmem:[#allocation6 + $0x604] sm:$0xf]  ;;  %v5341_v7 = vld [vmem:[#allocation6 + $0x610] sm:$0xf0] }
 0x107   :  { %2030 = vmatpush.bf16.msrb.mxu2 %v5356_v36  ;;  %v346_v36 = vperm.slane %v7538_v39, 2  ;;  %v5344_v9 = vor.u32 %v6947_v6, %v5341_v7 }
 0x108   :  { %2050 = vmatpush.bf16.msra.mxu0 %v5200_v38  ;;  %v6931_v38 = vld [vmem:[#allocation6 + $0x584] sm:$0xf] }
 0x109   :  { %2063 = vmatpush.bf16.msra.mxu1 %v5328_v16  ;;  %v5280_v42 = vor.u32 %v6931_v38, %v5277_v41  ;;  %v5424_v16 = vor.u32 %v6967_v12, %v5421_v15  ;;  %v5499_v38 = vld [vmem:[#allocation6 + $0x740] sm:$0xf]  ;;  %v5171_v15 = vld [vmem:[#allocation6 + $0x4a8] sm:$0xf] }
 0x10b   :  { %2031 = vmatpush.bf16.msrb.mxu2 %v5340_v46  ;;  %v354_v46 = vperm.slane %v346_v36, 0 }
 0x10c   :  { %2051 = vmatpush.bf16.msra.mxu0 %v5184_v47  ;;  %v7009_v47 = vld [vmem:[#allocation6 + $0x7ec] sm:$0xf0] }
 0x10d   :  { %2064 = vmatpush.bf16.msra.mxu1 %v5312_v26  ;;  %v5580_v51 = vor.u32 %v7009_v47, %v5579_v45  ;;  %v5376_v45 = vor.u32 %v6955_v43, %v5373_v44  ;;  %v5203_v47 = vld [vmem:[#allocation6 + $0x4e8] sm:$0xf] }
 0x10f   :  { %2037 = vmatpush.bf16.msrb.mxu3 %v5580_v51  ;;  %2076 = vmatpush.bf16.msra.mxu2 %v5456_v56  ;;  %v6914_v51 = vld [vmem:[#allocation6 + $0x4f4] sm:$0xf0] }
 0x110   :  { %2052 = vmatpush.bf16.msra.mxu0 %v5168_v58 }
 0x111   :  { %2065 = vmatpush.bf16.msra.mxu1 %v5296_v34 }
 0x113   :  { %2038 = vmatpush.bf16.msrb.mxu3 %v5564_v62  ;;  %2077 = vmatpush.bf16.msra.mxu2 %v5440_v5 }
 0x114   :  { %2053 = vmatpush.bf16.msra.mxu0 %v5152_v3  ;;  %v5248_v3 = vor.u32 %v6923_v63, %v5245_v0  ;;  %v5204_v63 = vor.u32 %v6914_v51, %v5203_v47  ;;  %v6910_v0 = vld [vmem:[#allocation6 + $0x4d4] sm:$0xf0]  ;;  %v5315_v47 = vld [vmem:[#allocation6 + $0x5c8] sm:$0xf] }
 0x115   :  { %2066 = vmatpush.bf16.msra.mxu1 %v5280_v42  ;;  %v6942_v51 = vld [vmem:[#allocation6 + $0x5d4] sm:$0xf0] }
 0x117   :  { %2039 = vmatpush.bf16.msrb.mxu3 %v5548_v8  ;;  %2078 = vmatpush.bf16.msra.mxu2 %v5424_v16  ;;  %v7007_v8 = vld [vmem:[#allocation6 + $0x7e4] sm:$0xf] }
 0x118   :  { %2054 = vmatpush.bf16.msra.mxu0 %v5136_v13  ;;  %v5584_v12 = vor.u32 %v7007_v8, %v5581_v10  ;;  %v5091_v10 = vld [vmem:[#allocation6 + $0x408] sm:$0xf] }
 0x119   :  { %2067 = vmatpush.bf16.msra.mxu1 %v5264_v52  ;;  %v5484_v52 = vor.u32 %v6985_v49, %v5483_v48 }
 0x11b   :  { %2040 = vmatpush.bf16.msrb.mxu3 %v5532_v22  ;;  %2079 = vmatpush.bf16.msra.mxu2 %v5408_v57  ;;  %v6902_v57 = vld [vmem:[#allocation6 + $0x494] sm:$0xf0] }
 0x11c   :  { %2055 = vmatpush.bf16.msra.mxu0 %v5120_v24  ;;  %v5213_v24 = vld [vmem:[#allocation6 + $0x510] sm:$0xf0] }
 0x11d   :  { %2068 = vmatpush.bf16.msra.mxu1 %v5248_v3  ;;  %v5216_v53 = vor.u32 %v6915_v23, %v5213_v24  ;;  %v5568_v23 = vor.u32 %v7003_v19, %v5565_v20  ;;  %v347_v24 = vperm.slane %v7538_v39, 4  ;;  %v6912_v19 = vld [vmem:[#allocation6 + $0x4ec] sm:$0xf]  ;;  %v5205_v20 = vld [vmem:[#allocation6 + $0x4f8] sm:$0xf0] }
 0x11f   :  { %2080 = vmatpush.bf16.msra.mxu2 %v5392_v35  ;;  %v355_v32 = vperm.slane %v347_v24, 0  ;;  %v5331_v35 = vld [vmem:[#allocation6 + $0x5e8] sm:$0xf] }
 0x120   :  { %2056 = vmatpush.bf16.msra.mxu0 %v5104_v31  ;;  %v5516_v31 = vor.u32 %v6993_v29, %v5515_v28  ;;  %v6999_v28 = vld [vmem:[#allocation6 + $0x7a4] sm:$0xf]  ;;  %v5549_v29 = vld [vmem:[#allocation6 + $0x7b0] sm:$0xf0]  ;;  %v5267_v24 = vld [vmem:[#allocation6 + $0x568] sm:$0xf] }
 0x121   :  { %2069 = vmatpush.bf16.msra.mxu1 %v5232_v14  ;;  %v5188_v14 = vor.u32 %v6910_v0, %v5187_v59  ;;  %v5316_v59 = vor.u32 %v6942_v51, %v5315_v47  ;;  %v6938_v0 = vld [vmem:[#allocation6 + $0x5b4] sm:$0xf0]  ;;  %v5427_v51 = vld [vmem:[#allocation6 + $0x6a8] sm:$0xf] }
 0x122   :  { %2041 = vmatpush.bf16.msrb.mxu3 %v5516_v31  ;;  %v5552_v31 = vor.u32 %v6999_v28, %v5549_v29 }
 0x123   :  { %v1006_v58 = vpop.f32.mrf.mxu0  ;;  %2081 = vmatpush.bf16.msra.mxu2 %v5376_v45  ;;  %v5123_v45 = vld [vmem:[#allocation6 + $0x448] sm:$0xf] }
 0x124   :  { %2057 = vmatpush.bf16.msra.mxu0 %v5088_v40  ;;  %v1019_v61 = vpop.f32.mrf.mxu1  ;;  %v1007_v13 = vadd.f32 %v1006_v58, %v353_v2  ;;  %v6989_v40 = vld [vmem:[#allocation6 + $0x74c] sm:$0xf0]  ;;  %v5360_v58 = vor.u32 %v6951_v54, %v5357_v55  ;;  %v5517_v54 = vld [vmem:[#allocation6 + $0x770] sm:$0xf0] }
 0x125   :  { %2070 = vmatpush.bf16.msra.mxu1 %v5216_v53  ;;  %v5500_v42 = vor.u32 %v6989_v40, %v5499_v38  ;;  %v6981_v2 = vld [vmem:[#allocation6 + $0x70c] sm:$0xf0]  ;;  %v5155_v53 = vld [vmem:[#allocation6 + $0x488] sm:$0xf]  ;;  %v5533_v38 = vld [vmem:[#allocation6 + $0x790] sm:$0xf0] }
 0x126   :  { %v1020_v26 = vadd.f32 %v1019_v61, %v1007_v13  ;;  %v5468_v5 = vor.u32 %v6981_v2, %v5467_v1  ;;  %v5156_v33 = vor.u32 %v6902_v57, %v5155_v53  ;;  %v6987_v1 = vld [vmem:[#allocation6 + $0x744] sm:$0xf]  ;;  %v5501_v2 = vld [vmem:[#allocation6 + $0x750] sm:$0xf0]  ;;  %v5459_v53 = vld [vmem:[#allocation6 + $0x6e8] sm:$0xf] }
 0x127   :  { %2042 = vmatpush.bf16.msrb.mxu3 %v5500_v42  ;;  %2082 = vmatpush.bf16.msra.mxu2 %v5360_v58  ;;  %v5504_v6 = vor.u32 %v6987_v1, %v5501_v2  ;;  %v5469_v57 = vld [vmem:[#allocation6 + $0x710] sm:$0xf0]  ;;  %v6966_v1 = vld [vmem:[#allocation6 + $0x694] sm:$0xf0]  ;;  %v6896_v2 = vld [vmem:[#allocation6 + $0x46c] sm:$0xf] }
 0x12b   :  { %v1008_v18 = vpop.f32.mrf.mxu0  ;;  %2043 = vmatpush.bf16.msrb.mxu3 %v5484_v52  ;;  %2083 = vmatpush.bf16.msra.mxu2 %v5344_v9  ;;  %v6991_v52 = vld [vmem:[#allocation6 + $0x764] sm:$0xf] }
 0x12c   :  { %v1021_v21 = vpop.f32.mrf.mxu1  ;;  %v6906_v18 = vld [vmem:[#allocation6 + $0x4b4] sm:$0xf0] }
 0x12f   :  { %2044 = vmatpush.bf16.msrb.mxu3 %v5468_v5 }
 0x131   :  { %v1032_v30 = vpop.f32.mrf.mxu2 }
 0x132   :  { %v1033_v34 = vadd.f32 %v1032_v30, %v1020_v26  ;;  %v1045_v11 = vpop.f32.mrf.mxu3  ;;  %v5172_v26 = vor.u32 %v6906_v18, %v5171_v15  ;;  %v6934_v15 = vld [vmem:[#allocation6 + $0x594] sm:$0xf0]  ;;  %v5485_v18 = vld [vmem:[#allocation6 + $0x730] sm:$0xf0] }
 0x133   :  { %v1058_v17 = vpop.f32.mrf.mxu0  ;;  %2089 = vmatpush.bf16.msra.mxu3 %v5584_v12  ;;  %v6886_v12 = vld [vmem:[#allocation6 + $0x414] sm:$0xf0] }
 0x134   :  { %v1046_v37 = vadd.f32 %v1045_v11, %v1033_v34  ;;  %v1071_v41 = vpop.f32.mrf.mxu1  ;;  %v1059_v61 = vadd.f32 %v1058_v17, %v354_v46  ;;  %v5139_v34 = vld [vmem:[#allocation6 + $0x468] sm:$0xf]  ;;  %v6898_v11 = vld [vmem:[#allocation6 + $0x474] sm:$0xf0]  ;;  %v6995_v17 = vld [vmem:[#allocation6 + $0x784] sm:$0xf] }
 0x135   :  { %v5140_v43 = vor.u32 %v6898_v11, %v5139_v34  ;;  %v6894_v46 = vld [vmem:[#allocation6 + $0x454] sm:$0xf0] }
 0x136   :  { %7315 = vtanh.f32 %v1046_v37  ;;  %v1072_v13 = vadd.f32 %v1071_v41, %v1059_v61  ;;  %v6946_v37 = vld [vmem:[#allocation6 + $0x5f4] sm:$0xf0]  ;;  %v5536_v41 = vor.u32 %v6995_v17, %v5533_v38  ;;  %v5124_v58 = vor.u32 %v6894_v46, %v5123_v45  ;;  %v5443_v38 = vld [vmem:[#allocation6 + $0x6c8] sm:$0xf] }
 0x137   :  { %2090 = vmatpush.bf16.msra.mxu3 %v5568_v23  ;;  %v5332_v44 = vor.u32 %v6946_v37, %v5331_v35  ;;  %v6890_v61 = vld [vmem:[#allocation6 + $0x434] sm:$0xf0]  ;;  %v5251_v37 = vld [vmem:[#allocation6 + $0x548] sm:$0xf] }
 0x138   :  { %v6926_v17 = vld [vmem:[#allocation6 + $0x554] sm:$0xf0] }
 0x139   :  { %v1034_v50 = vpop.f32.mrf.mxu2  ;;  %v5252_v45 = vor.u32 %v6926_v17, %v5251_v37  ;;  %v6954_v37 = vld [vmem:[#allocation6 + $0x634] sm:$0xf0]  ;;  %v6884_v17 = vld [vmem:[#allocation6 + $0x40c] sm:$0xf] }
 0x13a   :  { %v1047_v56 = vpop.f32.mrf.mxu3 }
 0x13b   :  { %v1060_v62 = vpop.f32.mrf.mxu0  ;;  %2091 = vmatpush.bf16.msra.mxu3 %v5552_v31  ;;  %v5520_v56 = vor.u32 %v6991_v52, %v5517_v54  ;;  %v6908_v31 = vld [vmem:[#allocation6 + $0x4cc] sm:$0xf]  ;;  %v6970_v54 = vld [vmem:[#allocation6 + $0x6b4] sm:$0xf0] }
 0x13c   :  { %v7316_v60 = vpop.eup %7315  ;;  %v1073_v4 = vpop.f32.mrf.mxu1  ;;  %v5299_v62 = vld [vmem:[#allocation6 + $0x5a8] sm:$0xf] }
 0x13d   :  { %v7542_v3 = vpack.c.bf16 %v7316_v60, %v7316_v60  ;;  %v5107_v60 = vld [vmem:[#allocation6 + $0x428] sm:$0xf]  ;;  %v5300_v9 = vor.u32 %v6938_v0, %v5299_v62 }
 0x13e   :  { %v5108_v8 = vor.u32 %v6890_v61, %v5107_v60  ;;  %v5428_v61 = vor.u32 %v6970_v54, %v5427_v51  ;;  %v5219_v62 = vld [vmem:[#allocation6 + $0x508] sm:$0xf]  ;;  %v7010_v51 = vld [vmem:[#allocation6 + $0x7f4] sm:$0xf0] }
 0x13f   :  { %2006 = vmatmul.bf16.vlgmr.msrb.gmra.mxu0 %v7542_v3  ;;  %2092 = vmatpush.bf16.msra.mxu3 %v5536_v41  ;;  %v6974_v41 = vld [vmem:[#allocation6 + $0x6d4] sm:$0xf0]  ;;  %v5411_v0 = vld [vmem:[#allocation6 + $0x688] sm:$0xf] }
 0x140   :  { %2102 = vmatpush.bf16.msrb.mxu0 %v5204_v63  ;;  %v5444_v46 = vor.u32 %v6974_v41, %v5443_v38  ;;  %v5093_v38 = vld [vmem:[#allocation6 + $0x418] sm:$0xf0]  ;;  %v6932_v41 = vld [vmem:[#allocation6 + $0x58c] sm:$0xf] }
 0x141   :  { %v1084_v16 = vpop.f32.mrf.mxu2 }
 0x142   :  { %v1085_v21 = vadd.f32 %v1084_v16, %v1072_v13  ;;  %v1097_v22 = vpop.f32.mrf.mxu3  ;;  %v5283_v13 = vld [vmem:[#allocation6 + $0x588] sm:$0xf]  ;;  %v6983_v16 = vld [vmem:[#allocation6 + $0x724] sm:$0xf] }
 0x143   :  { %2093 = vmatpush.bf16.msra.mxu3 %v5520_v56  ;;  %v5284_v23 = vor.u32 %v6934_v15, %v5283_v13  ;;  %v5157_v56 = vld [vmem:[#allocation6 + $0x498] sm:$0xf0]  ;;  %v6962_v15 = vld [vmem:[#allocation6 + $0x674] sm:$0xf0] }
 0x144   :  { %v1098_v25 = vadd.f32 %v1097_v22, %v1085_v21  ;;  %2103 = vmatpush.bf16.msrb.mxu0 %v5188_v14  ;;  %v1110_v27 = vpop.f32.mrf.mxu0  ;;  %v5488_v21 = vor.u32 %v6983_v16, %v5485_v18  ;;  %v5092_v22 = vor.u32 %v6886_v12, %v5091_v10  ;;  %v5395_v12 = vld [vmem:[#allocation6 + $0x668] sm:$0xf]  ;;  %v6892_v16 = vld [vmem:[#allocation6 + $0x44c] sm:$0xf]  ;;  %v5125_v18 = vld [vmem:[#allocation6 + $0x458] sm:$0xf0] }
 0x145   :  { %v1111_v49 = vadd.f32 %v1110_v27, %v355_v32  ;;  %v6979_v27 = vld [vmem:[#allocation6 + $0x704] sm:$0xf]  ;;  %v5189_v32 = vld [vmem:[#allocation6 + $0x4d8] sm:$0xf0] }
 0x146   :  { %7317 = vtanh.f32 %v1098_v25  ;;  %v6930_v25 = vld [vmem:[#allocation6 + $0x574] sm:$0xf0] }
 0x147   :  { %v1123_v30 = vpop.f32.mrf.mxu1  ;;  %2094 = vmatpush.bf16.msra.mxu3 %v5504_v6  ;;  %v5268_v34 = vor.u32 %v6930_v25, %v5267_v24  ;;  %v5333_v6 = vld [vmem:[#allocation6 + $0x5f8] sm:$0xf0]  ;;  %v5128_v24 = vor.u32 %v6892_v16, %v5125_v18  ;;  %v5379_v25 = vld [vmem:[#allocation6 + $0x648] sm:$0xf] }
 0x148   :  { %2104 = vmatpush.bf16.msrb.mxu0 %v5172_v26  ;;  %v1124_v63 = vadd.f32 %v1123_v30, %v1111_v49  ;;  %v5208_v26 = vor.u32 %v6912_v19, %v5205_v20  ;;  %v6978_v30 = vld [vmem:[#allocation6 + $0x6f4] sm:$0xf0]  ;;  %v5235_v49 = vld [vmem:[#allocation6 + $0x528] sm:$0xf]  ;;  %v6940_v20 = vld [vmem:[#allocation6 + $0x5cc] sm:$0xf] }
 0x149   :  { %v1086_v36 = vpop.f32.mrf.mxu2  ;;  %v5460_v35 = vor.u32 %v6978_v30, %v5459_v53  ;;  %v5429_v16 = vld [vmem:[#allocation6 + $0x6b8] sm:$0xf0] }
 0x14a   :  { %v1099_v40 = vpop.f32.mrf.mxu3  ;;  %v5192_v36 = vor.u32 %v6908_v31, %v5189_v32  ;;  %v6936_v31 = vld [vmem:[#allocation6 + $0x5ac] sm:$0xf]  ;;  %v5301_v32 = vld [vmem:[#allocation6 + $0x5b8] sm:$0xf0] }
 0x14b   :  { %2095 = vmatpush.bf16.msra.mxu3 %v5488_v21  ;;  %v5317_v21 = vld [vmem:[#allocation6 + $0x5d8] sm:$0xf0] }
 0x14c   :  { %v7318_v42 = vpop.eup %7317  ;;  %2105 = vmatpush.bf16.msrb.mxu0 %v5156_v33  ;;  %v1112_v50 = vpop.f32.mrf.mxu0  ;;  %v5472_v33 = vor.u32 %v6979_v27, %v5469_v57  ;;  %v5320_v53 = vor.u32 %v6940_v20, %v5317_v21  ;;  %v6958_v27 = vld [vmem:[#allocation6 + $0x654] sm:$0xf0]  ;;  %v6888_v57 = vld [vmem:[#allocation6 + $0x42c] sm:$0xf]  ;;  %v5539_v20 = vld [vmem:[#allocation6 + $0x788] sm:$0xf] }
 0x14d   :  { %v7546_v48 = vpack.c.bf16 %v7318_v42, %v7318_v42  ;;  %v6904_v42 = vld [vmem:[#allocation6 + $0x4ac] sm:$0xf]  ;;  %v6922_v50 = vld [vmem:[#allocation6 + $0x534] sm:$0xf0] }
 0x14e   :  { %v5236_v60 = vor.u32 %v6922_v50, %v5235_v49  ;;  %v5587_v50 = vld [vmem:[#allocation6 + $0x7e8] sm:$0xf]  ;;  %v6998_v21 = vld [vmem:[#allocation6 + $0x794] sm:$0xf0] }
 0x14f   :  { %v1125_v55 = vpop.f32.mrf.mxu1  ;;  %2019 = vmatmul.bf16.vlgmr.msrb.gmra.mxu1 %v7546_v48  ;;  %2058 = vmatmul.bf16.vlgmr.msra.gmra.mxu0 %v7542_v3 }
 0x150   :  { %2106 = vmatpush.bf16.msrb.mxu0 %v5140_v43  ;;  %2115 = vmatpush.bf16.msrb.mxu1 %v5332_v44  ;;  %v5173_v43 = vld [vmem:[#allocation6 + $0x4b8] sm:$0xf0]  ;;  %v348_v44 = vperm.slane %v7538_v39, 6  ;;  %v6900_v55 = vld [vmem:[#allocation6 + $0x48c] sm:$0xf] }
 0x151   :  { %v1136_v4 = vpop.f32.mrf.mxu2  ;;  %2096 = vmatpush.bf16.msra.mxu3 %v5472_v33  ;;  %v5176_v47 = vor.u32 %v6904_v42, %v5173_v43  ;;  %v5160_v39 = vor.u32 %v6900_v55, %v5157_v56  ;;  %v5285_v42 = vld [vmem:[#allocation6 + $0x598] sm:$0xf0]  ;;  %v6976_v56 = vld [vmem:[#allocation6 + $0x6ec] sm:$0xf] }
 0x152   :  { %v1149_v5 = vpop.f32.mrf.mxu3  ;;  %v1137_v7 = vadd.f32 %v1136_v4, %v1124_v63  ;;  %v6918_v63 = vld [vmem:[#allocation6 + $0x514] sm:$0xf0]  ;;  %v5141_v4 = vld [vmem:[#allocation6 + $0x478] sm:$0xf0]  ;;  %v5288_v49 = vor.u32 %v6932_v41, %v5285_v42  ;;  %v6952_v41 = vld [vmem:[#allocation6 + $0x62c] sm:$0xf] }
 0x153   :  { %v5144_v10 = vor.u32 %v6896_v2, %v5141_v4  ;;  %v5269_v55 = vld [vmem:[#allocation6 + $0x578] sm:$0xf0]  ;;  %v6924_v2 = vld [vmem:[#allocation6 + $0x54c] sm:$0xf] }
 0x154   :  { %2107 = vmatpush.bf16.msrb.mxu0 %v5124_v58  ;;  %2116 = vmatpush.bf16.msrb.mxu1 %v5316_v59  ;;  %v1150_v14 = vadd.f32 %v1149_v5, %v1137_v7  ;;  %v356_v59 = vperm.slane %v348_v44, 0  ;;  %v6944_v5 = vld [vmem:[#allocation6 + $0x5ec] sm:$0xf]  ;;  %v5220_v7 = vor.u32 %v6918_v63, %v5219_v62  ;;  %v5096_v44 = vor.u32 %v6884_v17, %v5093_v38  ;;  %v5253_v4 = vld [vmem:[#allocation6 + $0x558] sm:$0xf0] }
 0x155   :  { %v5491_v17 = vld [vmem:[#allocation6 + $0x728] sm:$0xf]  ;;  %v6986_v38 = vld [vmem:[#allocation6 + $0x734] sm:$0xf0]  ;;  %v5365_v42 = vld [vmem:[#allocation6 + $0x638] sm:$0xf0] }
 0x156   :  { %7319 = vtanh.f32 %v1150_v14  ;;  %v5336_v14 = vor.u32 %v6944_v5, %v5333_v6  ;;  %v6972_v5 = vld [vmem:[#allocation6 + $0x6cc] sm:$0xf]  ;;  %v5445_v6 = vld [vmem:[#allocation6 + $0x6d8] sm:$0xf0] }
 0x158   :  { %2108 = vmatpush.bf16.msrb.mxu0 %v5108_v8  ;;  %2117 = vmatpush.bf16.msrb.mxu1 %v5300_v9  ;;  %v5412_v9 = vor.u32 %v6966_v1, %v5411_v0  ;;  %v5571_v0 = vld [vmem:[#allocation6 + $0x7c8] sm:$0xf]  ;;  %v7006_v1 = vld [vmem:[#allocation6 + $0x7d4] sm:$0xf0] }
 0x159   :  { %v1138_v28 = vpop.f32.mrf.mxu2 }
 0x15a   :  { %v1151_v29 = vpop.f32.mrf.mxu3  ;;  %v5109_v28 = vld [vmem:[#allocation6 + $0x438] sm:$0xf0] }
 0x15c   :  { %2109 = vmatpush.bf16.msrb.mxu0 %v5092_v22  ;;  %2118 = vmatpush.bf16.msrb.mxu1 %v5284_v23  ;;  %v7320_v11 = vpop.eup %7319  ;;  %v5396_v23 = vor.u32 %v6962_v15, %v5395_v12  ;;  %v7002_v12 = vld [vmem:[#allocation6 + $0x7b4] sm:$0xf0]  ;;  %v6968_v15 = vld [vmem:[#allocation6 + $0x6ac] sm:$0xf] }
 0x15d   :  { %v7550_v40 = vpack.c.bf16 %v7320_v11, %v7320_v11  ;;  %v5112_v11 = vor.u32 %v6888_v57, %v5109_v28  ;;  %v5523_v57 = vld [vmem:[#allocation6 + $0x768] sm:$0xf]  ;;  %v6994_v28 = vld [vmem:[#allocation6 + $0x774] sm:$0xf0] }
 0x15f   :  { %2071 = vmatmul.bf16.vlgmr.msra.gmra.mxu1 %v7546_v48  ;;  %2110 = vmatmul.bf16.vlgmr.msrb.gmra.mxu0 %v7542_v3 }
 0x160   :  { %2154 = vmatpush.bf16.msra.mxu0 %v5208_v26  ;;  %2032 = vmatmul.bf16.vlgmr.msrb.gmra.mxu2 %v7550_v40 }
 0x161   :  { %2119 = vmatpush.bf16.msrb.mxu1 %v5268_v34  ;;  %2128 = vmatpush.bf16.msrb.mxu2 %v5460_v35  ;;  %v5380_v34 = vor.u32 %v6958_v27, %v5379_v25  ;;  %v5363_v35 = vld [vmem:[#allocation6 + $0x628] sm:$0xf]  ;;  %v5413_v25 = vld [vmem:[#allocation6 + $0x698] sm:$0xf0] }
 0x162   :  { %v5364_v43 = vor.u32 %v6954_v37, %v5363_v35  ;;  %v5381_v35 = vld [vmem:[#allocation6 + $0x658] sm:$0xf0] }
 0x164   :  { %2155 = vmatpush.bf16.msra.mxu0 %v5192_v36  ;;  %v1162_v52 = vpop.f32.mrf.mxu0  ;;  %v5304_v36 = vor.u32 %v6936_v31, %v5301_v32  ;;  %v5524_v31 = vor.u32 %v6994_v28, %v5523_v57  ;;  %v5836_v28 = vld [vmem:[#allocation6 + $0x9e0] sm:$0xf] }
 0x165   :  { %2120 = vmatpush.bf16.msrb.mxu1 %v5252_v45  ;;  %2129 = vmatpush.bf16.msrb.mxu2 %v5444_v46  ;;  %v1163_v8 = vadd.f32 %v1162_v52, %v356_v59  ;;  %v5347_v45 = vld [vmem:[#allocation6 + $0x608] sm:$0xf]  ;;  %v6950_v46 = vld [vmem:[#allocation6 + $0x614] sm:$0xf0]  ;;  %v6928_v52 = vld [vmem:[#allocation6 + $0x56c] sm:$0xf] }
 0x166   :  { %v5272_v62 = vor.u32 %v6928_v52, %v5269_v55  ;;  %v7004_v55 = vld [vmem:[#allocation6 + $0x7cc] sm:$0xf] }
 0x167   :  { %v1175_v58 = vpop.f32.mrf.mxu1 }
 0x168   :  { %2156 = vmatpush.bf16.msra.mxu0 %v5176_v47  ;;  %v1176_v22 = vadd.f32 %v1175_v58, %v1163_v8  ;;  %v5461_v58 = vld [vmem:[#allocation6 + $0x6f8] sm:$0xf0]  ;;  %v5256_v8 = vor.u32 %v6924_v2, %v5253_v4 }
 0x169   :  { %2121 = vmatpush.bf16.msrb.mxu1 %v5236_v60  ;;  %2130 = vmatpush.bf16.msrb.mxu2 %v5428_v61  ;;  %v5348_v60 = vor.u32 %v6950_v46, %v5347_v45  ;;  %v5588_v61 = vor.u32 %v7010_v51, %v5587_v50  ;;  %v5464_v63 = vor.u32 %v6976_v56, %v5461_v58  ;;  %v5475_v45 = vld [vmem:[#allocation6 + $0x708] sm:$0xf]  ;;  %v6982_v46 = vld [vmem:[#allocation6 + $0x714] sm:$0xf0]  ;;  %v7008_v50 = vld [vmem:[#allocation6 + $0x7ec] sm:$0xf] }
 0x16a   :  { %v5589_v51 = vld [vmem:[#allocation6 + $0x7f8] sm:$0xf0]  ;;  %v5476_v52 = vor.u32 %v6982_v46, %v5475_v45  ;;  %v5788_v45 = vld [vmem:[#allocation6 + $0x980] sm:$0xf] }
 0x16b   :  { %v5573_v56 = vld [vmem:[#allocation6 + $0x7d8] sm:$0xf0] }
 0x16c   :  { %2157 = vmatpush.bf16.msra.mxu0 %v5160_v39  ;;  %v1164_v13 = vpop.f32.mrf.mxu0  ;;  %v5576_v58 = vor.u32 %v7004_v55, %v5573_v56  ;;  %v5525_v2 = vld [vmem:[#allocation6 + $0x778] sm:$0xf0]  ;;  %v5772_v55 = vld [vmem:[#allocation6 + $0x960] sm:$0xf]  ;;  %v7057_v56 = vld [vmem:[#allocation6 + $0x96c] sm:$0xf0] }
 0x16d   :  { %2122 = vmatpush.bf16.msrb.mxu1 %v5220_v7  ;;  %2131 = vmatpush.bf16.msrb.mxu2 %v5412_v9  ;;  %v5572_v7 = vor.u32 %v7006_v1, %v5571_v0  ;;  %v5448_v9 = vor.u32 %v6972_v5, %v5445_v6  ;;  %v6920_v13 = vld [vmem:[#allocation6 + $0x52c] sm:$0xf]  ;;  %v5509_v6 = vld [vmem:[#allocation6 + $0x758] sm:$0xf0] }
 0x16e   :  { %v6992_v1 = vld [vmem:[#allocation6 + $0x76c] sm:$0xf] }
 0x16f   :  { %v1177_v19 = vpop.f32.mrf.mxu1  ;;  %v5528_v4 = vor.u32 %v6992_v1, %v5525_v2  ;;  %v6988_v5 = vld [vmem:[#allocation6 + $0x74c] sm:$0xf]  ;;  %v5756_v1 = vld [vmem:[#allocation6 + $0x940] sm:$0xf]  ;;  %v7053_v2 = vld [vmem:[#allocation6 + $0x94c] sm:$0xf0] }
 0x170   :  { %2158 = vmatpush.bf16.msra.mxu0 %v5144_v10  ;;  %2123 = vmatmul.bf16.vlgmr.msrb.gmra.mxu1 %v7546_v48  ;;  %v5555_v10 = vld [vmem:[#allocation6 + $0x7a8] sm:$0xf]  ;;  %v5432_v19 = vor.u32 %v6968_v15, %v5429_v16  ;;  %v5477_v15 = vld [vmem:[#allocation6 + $0x718] sm:$0xf0] }
 0x171   :  { %2167 = vmatpush.bf16.msra.mxu1 %v5336_v14  ;;  %v1188_v26 = vpop.f32.mrf.mxu2  ;;  %2084 = vmatmul.bf16.vlgmr.msra.gmra.mxu2 %v7550_v40  ;;  %v5237_v14 = vld [vmem:[#allocation6 + $0x538] sm:$0xf0]  ;;  %v5556_v18 = vor.u32 %v7002_v12, %v5555_v10  ;;  %v5708_v10 = vld [vmem:[#allocation6 + $0x8e0] sm:$0xf]  ;;  %v7041_v12 = vld [vmem:[#allocation6 + $0x8ec] sm:$0xf0] }
 0x172   :  { %v1189_v29 = vadd.f32 %v1188_v26, %v1176_v22  ;;  %v1201_v30 = vpop.f32.mrf.mxu3  ;;  %2132 = vmatpush.bf16.msrb.mxu2 %v5396_v23  ;;  %v6916_v22 = vld [vmem:[#allocation6 + $0x50c] sm:$0xf]  ;;  %v5221_v23 = vld [vmem:[#allocation6 + $0x518] sm:$0xf0]  ;;  %v5540_v26 = vor.u32 %v6998_v21, %v5539_v20  ;;  %v5676_v20 = vld [vmem:[#allocation6 + $0x8a0] sm:$0xf] }
 0x173   :  { %v7033_v21 = vld [vmem:[#allocation6 + $0x8ac] sm:$0xf0] }
 0x174   :  { %v1202_v33 = vadd.f32 %v1201_v30, %v1189_v29  ;;  %2159 = vmatpush.bf16.msra.mxu0 %v5128_v24  ;;  %v6964_v24 = vld [vmem:[#allocation6 + $0x68c] sm:$0xf]  ;;  %v5397_v30 = vld [vmem:[#allocation6 + $0x678] sm:$0xf0] }
 0x175   :  { %2168 = vmatpush.bf16.msra.mxu1 %v5320_v53  ;;  %v5224_v53 = vor.u32 %v6916_v22, %v5221_v23  ;;  %v5416_v27 = vor.u32 %v6964_v24, %v5413_v25  ;;  %v6960_v29 = vld [vmem:[#allocation6 + $0x66c] sm:$0xf]  ;;  %v5677_v22 = vor.u32 %v7033_v21, %v5676_v20  ;;  %v5660_v23 = vld [vmem:[#allocation6 + $0x880] sm:$0xf]  ;;  %v7029_v24 = vld [vmem:[#allocation6 + $0x88c] sm:$0xf0] }
 0x176   :  { %7321 = vtanh.f32 %v1202_v33  ;;  %2133 = vmatpush.bf16.msrb.mxu2 %v5380_v34  ;;  %v5400_v32 = vor.u32 %v6960_v29, %v5397_v30  ;;  %v5507_v33 = vld [vmem:[#allocation6 + $0x748] sm:$0xf]  ;;  %v6990_v34 = vld [vmem:[#allocation6 + $0x754] sm:$0xf0]  ;;  %v7073_v29 = vld [vmem:[#allocation6 + $0x9ec] sm:$0xf0] }
 0x177   :  { %v5837_v30 = vor.u32 %v7073_v29, %v5836_v28  ;;  %v5662_v20 = vld [vmem:[#allocation6 + $0x890] sm:$0xf0]  ;;  %v7023_v28 = vld [vmem:[#allocation6 + $0x864] sm:$0xf] }
 0x178   :  { %2160 = vmatpush.bf16.msra.mxu0 %v5112_v11  ;;  %v6956_v11 = vld [vmem:[#allocation6 + $0x64c] sm:$0xf]  ;;  %v5646_v29 = vld [vmem:[#allocation6 + $0x870] sm:$0xf0] }
 0x179   :  { %2169 = vmatpush.bf16.msra.mxu1 %v5304_v36  ;;  %v1190_v47 = vpop.f32.mrf.mxu2  ;;  %v5508_v36 = vor.u32 %v6990_v34, %v5507_v33  ;;  %v5384_v37 = vor.u32 %v6956_v11, %v5381_v35  ;;  %v5820_v33 = vld [vmem:[#allocation6 + $0x9c0] sm:$0xf]  ;;  %v7069_v11 = vld [vmem:[#allocation6 + $0x9cc] sm:$0xf0] }
 0x17a   :  { %v1203_v54 = vpop.f32.mrf.mxu3  ;;  %2134 = vmatpush.bf16.msrb.mxu2 %v5364_v43  ;;  %v5492_v43 = vor.u32 %v6986_v38, %v5491_v17  ;;  %v6948_v47 = vld [vmem:[#allocation6 + $0x60c] sm:$0xf]  ;;  %v5612_v35 = vld [vmem:[#allocation6 + $0x820] sm:$0xf]  ;;  %v7065_v38 = vld [vmem:[#allocation6 + $0x9ac] sm:$0xf0] }
 0x17b   :  { %v5592_v54 = vor.u32 %v7008_v50, %v5589_v51  ;;  %v5804_v17 = vld [vmem:[#allocation6 + $0x9a0] sm:$0xf]  ;;  %v7061_v50 = vld [vmem:[#allocation6 + $0x98c] sm:$0xf0]  ;;  %v7039_v51 = vld [vmem:[#allocation6 + $0x8e4] sm:$0xf] }
 0x17c   :  { %v7322_v59 = vpop.eup %7321  ;;  %2161 = vmatpush.bf16.msra.mxu0 %v5096_v44  ;;  %v5368_v44 = vor.u32 %v6952_v41, %v5365_v42  ;;  %v5805_v42 = vor.u32 %v7065_v38, %v5804_v17  ;;  %v7067_v17 = vld [vmem:[#allocation6 + $0x9c4] sm:$0xf] }
 0x17d   :  { %v7558_v39 = vpack.c.bf16 %v7322_v59, %v7322_v59  ;;  %2170 = vmatpush.bf16.msra.mxu1 %v5288_v49  ;;  %v5349_v49 = vld [vmem:[#allocation6 + $0x618] sm:$0xf0]  ;;  %v7000_v59 = vld [vmem:[#allocation6 + $0x7ac] sm:$0xf] }
 0x17e   :  { %2135 = vmatpush.bf16.msrb.mxu2 %v5348_v60  ;;  %v5557_v60 = vld [vmem:[#allocation6 + $0x7b8] sm:$0xf0] }
 0x17f   :  { %2045 = vmatmul.bf16.vlgmr.msrb.gmra.mxu3 %v7558_v39  ;;  %2162 = vmatmul.bf16.vlgmr.msra.gmra.mxu0 %v7542_v3  ;;  %v5240_v3 = vor.u32 %v6920_v13, %v5237_v14  ;;  %v5709_v13 = vor.u32 %v7041_v12, %v5708_v10  ;;  %v6980_v14 = vld [vmem:[#allocation6 + $0x70c] sm:$0xf]  ;;  %v5678_v10 = vld [vmem:[#allocation6 + $0x8b0] sm:$0xf0] }
 0x180   :  { %2141 = vmatpush.bf16.msrb.mxu3 %v5588_v61  ;;  %v5560_v61 = vor.u32 %v7000_v59, %v5557_v60  ;;  %v5480_v16 = vor.u32 %v6980_v14, %v5477_v15  ;;  %v7105_v59 = vld [vmem:[#allocation6 + $0xaec] sm:$0xf0]  ;;  %v7035_v60 = vld [vmem:[#allocation6 + $0x8c4] sm:$0xf] }
 0x181   :  { %2171 = vmatpush.bf16.msra.mxu1 %v5272_v62  ;;  %2136 = vmatmul.bf16.vlgmr.msrb.gmra.mxu2 %v7550_v40  ;;  %v6996_v62 = vld [vmem:[#allocation6 + $0x78c] sm:$0xf]  ;;  %v7049_v14 = vld [vmem:[#allocation6 + $0x92c] sm:$0xf0] }
 0x182   :  { %2180 = vmatpush.bf16.msra.mxu2 %v5464_v63  ;;  %v5541_v63 = vld [vmem:[#allocation6 + $0x798] sm:$0xf0]  ;;  %2999 = vmatpush.bf16.msrb.mxu0 %v5709_v13  ;;  %v5740_v13 = vld [vmem:[#allocation6 + $0x920] sm:$0xf] }
 0x183   :  { %v5544_v0 = vor.u32 %v6996_v62, %v5541_v63  ;;  %v5773_v62 = vor.u32 %v7057_v56, %v5772_v55  ;;  %v5741_v15 = vor.u32 %v7049_v14, %v5740_v13  ;;  %v5806_v56 = vld [vmem:[#allocation6 + $0x9b0] sm:$0xf0]  ;;  %v7055_v13 = vld [vmem:[#allocation6 + $0x964] sm:$0xf] }
 0x184   :  { %2142 = vmatpush.bf16.msrb.mxu3 %v5572_v7  ;;  %v5512_v7 = vor.u32 %v6988_v5, %v5509_v6  ;;  %v5774_v14 = vld [vmem:[#allocation6 + $0x970] sm:$0xf0] }
 0x185   :  { %2172 = vmatpush.bf16.msra.mxu1 %v5256_v8  ;;  %v6984_v8 = vld [vmem:[#allocation6 + $0x72c] sm:$0xf] }
 0x186   :  { %2181 = vmatpush.bf16.msra.mxu2 %v5448_v9  ;;  %v5493_v9 = vld [vmem:[#allocation6 + $0x738] sm:$0xf0] }
 0x188   :  { %2143 = vmatpush.bf16.msrb.mxu3 %v5556_v18  ;;  %v5692_v18 = vld [vmem:[#allocation6 + $0x8c0] sm:$0xf] }
 0x189   :  { %2173 = vmatpush.bf16.msra.mxu1 %v5240_v3  ;;  %v7037_v3 = vld [vmem:[#allocation6 + $0x8cc] sm:$0xf0] }
 0x18a   :  { %2182 = vmatpush.bf16.msra.mxu2 %v5432_v19  ;;  %v5693_v19 = vor.u32 %v7037_v3, %v5692_v18  ;;  %v7097_v18 = vld [vmem:[#allocation6 + $0xaac] sm:$0xf0]  ;;  %v7027_v3 = vld [vmem:[#allocation6 + $0x884] sm:$0xf] }
 0x18b   :  { %v5665_v21 = vor.u32 %v7027_v3, %v5662_v20  ;;  %v5966_v3 = vld [vmem:[#allocation6 + $0xaf0] sm:$0xf0] }
 0x18c   :  { %2144 = vmatpush.bf16.msrb.mxu3 %v5540_v26  ;;  %3000 = vmatpush.bf16.msrb.mxu0 %v5693_v19  ;;  %v5661_v26 = vor.u32 %v7029_v24, %v5660_v23  ;;  %v7045_v23 = vld [vmem:[#allocation6 + $0x90c] sm:$0xf0]  ;;  %v5916_v24 = vld [vmem:[#allocation6 + $0xa80] sm:$0xf] }
 0x18d   :  { %2174 = vmatpush.bf16.msra.mxu1 %v5224_v53  ;;  %v5644_v53 = vld [vmem:[#allocation6 + $0x860] sm:$0xf] }
 0x18e   :  { %2183 = vmatpush.bf16.msra.mxu2 %v5416_v27  ;;  %v7025_v27 = vld [vmem:[#allocation6 + $0x86c] sm:$0xf0] }
 0x18f   :  { %2097 = vmatmul.bf16.vlgmr.msra.gmra.mxu3 %v7558_v39  ;;  %v5645_v57 = vor.u32 %v7025_v27, %v5644_v53 }
 0x190   :  { %2145 = vmatpush.bf16.msrb.mxu3 %v5524_v31  ;;  %2175 = vmatmul.bf16.vlgmr.msra.gmra.mxu1 %v7546_v48  ;;  %v5352_v48 = vor.u32 %v6948_v47, %v5349_v49  ;;  %v5628_v31 = vld [vmem:[#allocation6 + $0x840] sm:$0xf] }
 0x191   :  { %3001 = vmatpush.bf16.msrb.mxu0 %v5677_v22  ;;  %3012 = vmatpush.bf16.msrb.mxu1 %v5837_v30  ;;  %v5724_v22 = vld [vmem:[#allocation6 + $0x900] sm:$0xf] }
 0x192   :  { %2184 = vmatpush.bf16.msra.mxu2 %v5400_v32  ;;  %v7021_v32 = vld [vmem:[#allocation6 + $0x84c] sm:$0xf0]  ;;  %v5725_v27 = vor.u32 %v7045_v23, %v5724_v22 }
 0x193   :  { %v7133_v22 = vld [vmem:[#allocation6 + $0xbcc] sm:$0xf0] }
 0x194   :  { %2146 = vmatpush.bf16.msrb.mxu3 %v5508_v36  ;;  %v7017_v36 = vld [vmem:[#allocation6 + $0x82c] sm:$0xf0] }
 0x195   :  { %3002 = vmatpush.bf16.msrb.mxu0 %v5661_v26  ;;  %v5613_v41 = vor.u32 %v7017_v36, %v5612_v35  ;;  %v7019_v36 = vld [vmem:[#allocation6 + $0x844] sm:$0xf] }
 0x196   :  { %2185 = vmatpush.bf16.msra.mxu2 %v5384_v37  ;;  %v5821_v37 = vor.u32 %v7069_v11, %v5820_v33  ;;  %v5838_v33 = vld [vmem:[#allocation6 + $0x9f0] sm:$0xf0]  ;;  %v7089_v11 = vld [vmem:[#allocation6 + $0xa6c] sm:$0xf0] }
 0x198   :  { %2147 = vmatpush.bf16.msrb.mxu3 %v5492_v43  ;;  %3013 = vmatpush.bf16.msrb.mxu1 %v5821_v37  ;;  %v5596_v43 = vld [vmem:[#allocation6 + $0x800] sm:$0xf]  ;;  %v5630_v37 = vld [vmem:[#allocation6 + $0x850] sm:$0xf0] }
 0x199   :  { %3003 = vmatpush.bf16.msrb.mxu0 %v5645_v57  ;;  %v7093_v57 = vld [vmem:[#allocation6 + $0xa8c] sm:$0xf0]  ;;  %v5633_v38 = vor.u32 %v7019_v36, %v5630_v37  ;;  %v5742_v36 = vld [vmem:[#allocation6 + $0x930] sm:$0xf0]  ;;  %v7095_v37 = vld [vmem:[#allocation6 + $0xaa4] sm:$0xf] }
 0x19a   :  { %2186 = vmatpush.bf16.msra.mxu2 %v5368_v44  ;;  %v7013_v44 = vld [vmem:[#allocation6 + $0x80c] sm:$0xf0]  ;;  %v5917_v30 = vor.u32 %v7093_v57, %v5916_v24  ;;  %v7051_v24 = vld [vmem:[#allocation6 + $0x944] sm:$0xf] }
 0x19b   :  { %v5597_v49 = vor.u32 %v7013_v44, %v5596_v43  ;;  %v5884_v44 = vld [vmem:[#allocation6 + $0xa40] sm:$0xf]  ;;  %v7099_v57 = vld [vmem:[#allocation6 + $0xac4] sm:$0xf] }
 0x19c   :  { %2148 = vmatpush.bf16.msrb.mxu3 %v5476_v52  ;;  %3014 = vmatpush.bf16.msrb.mxu1 %v5805_v42  ;;  %v5710_v52 = vld [vmem:[#allocation6 + $0x8f0] sm:$0xf0] }
 0x19e   :  { %2187 = vmatpush.bf16.msra.mxu2 %v5352_v48  ;;  %v5789_v48 = vor.u32 %v7061_v50, %v5788_v45  ;;  %v7085_v45 = vld [vmem:[#allocation6 + $0xa4c] sm:$0xf0] }
 0x19f   :  { %2149 = vmatmul.bf16.vlgmr.msrb.gmra.mxu3 %v7558_v39 }
 0x1a0   :  { %2193 = vmatpush.bf16.msra.mxu3 %v5592_v54  ;;  %v5713_v54 = vor.u32 %v7039_v51, %v5710_v52  ;;  %3015 = vmatpush.bf16.msrb.mxu1 %v5789_v48  ;;  %v5885_v51 = vor.u32 %v7085_v45, %v5884_v44  ;;  %v7015_v52 = vld [vmem:[#allocation6 + $0x824] sm:$0xf]  ;;  %v5614_v48 = vld [vmem:[#allocation6 + $0x830] sm:$0xf0]  ;;  %v6044_v44 = vld [vmem:[#allocation6 + $0xb80] sm:$0xf] }
 0x1a1   :  { %2188 = vmatmul.bf16.vlgmr.msra.gmra.mxu2 %v7550_v40  ;;  %v5496_v40 = vor.u32 %v6984_v8, %v5493_v9  ;;  %v7101_v8 = vld [vmem:[#allocation6 + $0xacc] sm:$0xf0]  ;;  %v7031_v9 = vld [vmem:[#allocation6 + $0x8a4] sm:$0xf]  ;;  %v5617_v55 = vor.u32 %v7015_v52, %v5614_v48 }
 0x1a2   :  { %v7125_v45 = vld [vmem:[#allocation6 + $0xb8c] sm:$0xf0]  ;;  %v7091_v52 = vld [vmem:[#allocation6 + $0xa84] sm:$0xf] }
 0x1a4   :  { %2194 = vmatpush.bf16.msra.mxu3 %v5576_v58  ;;  %v5964_v58 = vld [vmem:[#allocation6 + $0xae0] sm:$0xf]  ;;  %3016 = vmatpush.bf16.msrb.mxu1 %v5773_v62  ;;  %v7011_v62 = vld [vmem:[#allocation6 + $0x804] sm:$0xf] }
 0x1a5   :  { %v5965_v63 = vor.u32 %v7105_v59, %v5964_v58  ;;  %v5868_v59 = vld [vmem:[#allocation6 + $0xa20] sm:$0xf] }
 0x1a7   :  { %3025 = vmatpush.bf16.msrb.mxu2 %v5965_v63  ;;  %v5598_v63 = vld [vmem:[#allocation6 + $0x810] sm:$0xf0] }
 0x1a8   :  { %2195 = vmatpush.bf16.msra.mxu3 %v5560_v61  ;;  %v5694_v61 = vld [vmem:[#allocation6 + $0x8d0] sm:$0xf0] }
 0x1ac   :  { %2196 = vmatpush.bf16.msra.mxu3 %v5544_v0  ;;  %v5697_v0 = vor.u32 %v7035_v60, %v5694_v61  ;;  %v7081_v60 = vld [vmem:[#allocation6 + $0xa2c] sm:$0xf0] }
 0x1ad   :  { %v5869_v61 = vor.u32 %v7081_v60, %v5868_v59  ;;  %v6028_v60 = vld [vmem:[#allocation6 + $0xb60] sm:$0xf] }
 0x1b0   :  { %2197 = vmatpush.bf16.msra.mxu3 %v5528_v4  ;;  %v5948_v4 = vld [vmem:[#allocation6 + $0xac0] sm:$0xf] }
 0x1b1   :  { %v5949_v12 = vor.u32 %v7101_v8, %v5948_v4  ;;  %v5080_v4 = vld [vmem:[%s7737_s4 + $0x4] sm:$0xf]  ;;  %v7077_v8 = vld [vmem:[#allocation6 + $0xa0c] sm:$0xf0] }
 0x1b3   :  { %3026 = vmatpush.bf16.msrb.mxu2 %v5949_v12 }
 0x1b4   :  { %2198 = vmatpush.bf16.msra.mxu3 %v5512_v7  ;;  %v5757_v7 = vor.u32 %v7053_v2, %v5756_v1  ;;  %v5601_v1 = vor.u32 %v7011_v62, %v5598_v63  ;;  %v5790_v2 = vld [vmem:[#allocation6 + $0x990] sm:$0xf0] }
 0x1b6   :  { %3017 = vmatpush.bf16.msrb.mxu1 %v5757_v7  ;;  %v5852_v7 = vld [vmem:[#allocation6 + $0xa00] sm:$0xf] }
 0x1b7   :  { %v5853_v12 = vor.u32 %v7077_v8, %v5852_v7  ;;  %v7117_v7 = vld [vmem:[#allocation6 + $0xb4c] sm:$0xf0] }
 0x1b8   :  { %2199 = vmatpush.bf16.msra.mxu3 %v5496_v40  ;;  %v5681_v40 = vor.u32 %v7031_v9, %v5678_v10  ;;  %v6092_v9 = vld [vmem:[#allocation6 + $0xbe0] sm:$0xf] }
 0x1ba   :  { %3018 = vmatpush.bf16.msrb.mxu1 %v5741_v15 }
 0x1bc   :  { %2200 = vmatpush.bf16.msra.mxu3 %v5480_v16  ;;  %v7568_v25 = vpop.f32.mrf.mxu0  ;;  %v5932_v16 = vld [vmem:[#allocation6 + $0xaa0] sm:$0xf] }
 0x1bd   :  { %v5933_v19 = vor.u32 %v7097_v18, %v5932_v16  ;;  %v5777_v16 = vor.u32 %v7055_v13, %v5774_v14  ;;  %v7103_v18 = vld [vmem:[#allocation6 + $0xae4] sm:$0xf] }
 0x1be   :  { %3019 = vmatpush.bf16.msrb.mxu1 %v5725_v27  ;;  %v5969_v20 = vor.u32 %v7103_v18, %v5966_v3  ;;  %v5758_v27 = vld [vmem:[#allocation6 + $0x950] sm:$0xf0]  ;;  %v7079_v18 = vld [vmem:[#allocation6 + $0xa24] sm:$0xf] }
 0x1bf   :  { %2201 = vmatmul.bf16.vlgmr.msra.gmra.mxu3 %v7558_v39  ;;  %v5629_v39 = vor.u32 %v7021_v32, %v5628_v31  ;;  %3027 = vmatpush.bf16.msrb.mxu2 %v5933_v19  ;;  %v5649_v31 = vor.u32 %v7023_v28, %v5646_v29  ;;  %v7071_v32 = vld [vmem:[#allocation6 + $0x9e4] sm:$0xf]  ;;  %v7585_v19 = vunpack.c.l.bf16 %v5080_v4  ;;  %v5761_v28 = vor.u32 %v7051_v24, %v5758_v27  ;;  %v5950_v29 = vld [vmem:[#allocation6 + $0xad0] sm:$0xf0]  ;;  %v5980_v27 = vld [vmem:[#allocation6 + $0xb00] sm:$0xf] }
 0x1c0   :  { %v5870_v3 = vld [vmem:[#allocation6 + $0xa30] sm:$0xf0] }
 0x1c1   :  { %3004 = vmatpush.bf16.msrb.mxu0 %v5629_v39  ;;  %v5900_v39 = vld [vmem:[#allocation6 + $0xa60] sm:$0xf] }
 0x1c2   :  { %v5901_v35 = vor.u32 %v7089_v11, %v5900_v39 }
 0x1c3   :  { %3028 = vmatpush.bf16.msrb.mxu2 %v5917_v30  ;;  %v1346_v30 = vperm.slane %v7585_v19, 0 }
 0x1c4   :  { %v2009_v34 = vpop.f32.mrf.mxu0 }
 0x1c5   :  { %3005 = vmatpush.bf16.msrb.mxu0 %v5613_v41  ;;  %v5841_v34 = vor.u32 %v7071_v32, %v5838_v33  ;;  %v5822_v41 = vld [vmem:[#allocation6 + $0x9d0] sm:$0xf0]  ;;  %v6060_v33 = vld [vmem:[#allocation6 + $0xba0] sm:$0xf] }
 0x1c6   :  { %v5825_v42 = vor.u32 %v7067_v17, %v5822_v41  ;;  %v1354_v41 = vperm.slane %v1346_v30, 0 }
 0x1c7   :  { %3064 = vmatpush.bf16.msra.mxu1 %v5841_v34  ;;  %3029 = vmatpush.bf16.msrb.mxu2 %v5901_v35  ;;  %v7129_v34 = vld [vmem:[#allocation6 + $0xbac] sm:$0xf0]  ;;  %v7047_v35 = vld [vmem:[#allocation6 + $0x924] sm:$0xf] }
 0x1c8   :  { %v6061_v11 = vor.u32 %v7129_v34, %v6060_v33  ;;  %v5745_v17 = vor.u32 %v7047_v35, %v5742_v36  ;;  %v5854_v33 = vld [vmem:[#allocation6 + $0xa10] sm:$0xf0]  ;;  %v7135_v34 = vld [vmem:[#allocation6 + $0xbe4] sm:$0xf]  ;;  %v7038_v35 = vld [vmem:[#allocation6 + $0x8d4] sm:$0xf0] }
 0x1c9   :  { %3006 = vmatpush.bf16.msrb.mxu0 %v5597_v49 }
 0x1cb   :  { %3065 = vmatpush.bf16.msra.mxu1 %v5825_v42  ;;  %3030 = vmatpush.bf16.msrb.mxu2 %v5885_v51  ;;  %v5726_v51 = vld [vmem:[#allocation6 + $0x910] sm:$0xf0] }
 0x1cc   :  { %v7570_v46 = vpop.f32.mrf.mxu1  ;;  %v7572_v47 = vpop.f32.mrf.mxu0 }
 0x1cd   :  { %3051 = vmatpush.bf16.msra.mxu0 %v5713_v54  ;;  %v7063_v54 = vld [vmem:[#allocation6 + $0x9a4] sm:$0xf] }
 0x1ce   :  { %v5809_v58 = vor.u32 %v7063_v54, %v5806_v56  ;;  %v2008_v56 = vadd.f32 %v7568_v25, %v1354_v41 }
 0x1cf   :  { %3031 = vmatpush.bf16.msrb.mxu2 %v5869_v61  ;;  %v7121_v61 = vld [vmem:[#allocation6 + $0xb6c] sm:$0xf0] }
 0x1d0   :  { %3066 = vmatpush.bf16.msra.mxu1 %v5809_v58  ;;  %v2021_v62 = vadd.f32 %v7570_v46, %v2008_v56  ;;  %v6029_v63 = vor.u32 %v7121_v61, %v6028_v60  ;;  %v1347_v46 = vperm.slane %v7585_v19, 2  ;;  %v7030_v60 = vld [vmem:[#allocation6 + $0x894] sm:$0xf0]  ;;  %v7127_v61 = vld [vmem:[#allocation6 + $0xba4] sm:$0xf] }
 0x1d1   :  { %3052 = vmatpush.bf16.msra.mxu0 %v5697_v0  ;;  %v7059_v0 = vld [vmem:[#allocation6 + $0x984] sm:$0xf] }
 0x1d3   :  { %3032 = vmatpush.bf16.msrb.mxu2 %v5853_v12  ;;  %v5886_v12 = vld [vmem:[#allocation6 + $0xa50] sm:$0xf0] }
 0x1d4   :  { %v2022_v5 = vpop.f32.mrf.mxu1  ;;  %v2061_v6 = vpop.f32.mrf.mxu0 }
 0x1d5   :  { %3053 = vmatpush.bf16.msra.mxu0 %v5681_v40  ;;  %v5793_v5 = vor.u32 %v7059_v0, %v5790_v2  ;;  %v7137_v40 = vld [vmem:[#allocation6 + $0xbec] sm:$0xf0]  ;;  %v7087_v0 = vld [vmem:[#allocation6 + $0xa64] sm:$0xf] }
 0x1d6   :  { %v6093_v15 = vor.u32 %v7137_v40, %v6092_v9  ;;  %v7083_v9 = vld [vmem:[#allocation6 + $0xa44] sm:$0xf] }
 0x1d7   :  { %3067 = vmatpush.bf16.msra.mxu1 %v5793_v5  ;;  %3077 = vmatpush.bf16.msra.mxu2 %v5969_v20  ;;  %v5889_v13 = vor.u32 %v7083_v9, %v5886_v12  ;;  %v5716_v20 = vld [vmem:[#allocation6 + $0x8e8] sm:$0xf] }
 0x1d8   :  { %3038 = vmatpush.bf16.msrb.mxu3 %v6093_v15  ;;  %v5996_v15 = vld [vmem:[#allocation6 + $0xb20] sm:$0xf] }
 0x1d9   :  { %3054 = vmatpush.bf16.msra.mxu0 %v5665_v21  ;;  %v6076_v21 = vld [vmem:[#allocation6 + $0xbc0] sm:$0xf] }
 0x1da   :  { %v6077_v23 = vor.u32 %v7133_v22, %v6076_v21  ;;  %v7042_v21 = vld [vmem:[#allocation6 + $0x8f4] sm:$0xf0]  ;;  %v5873_v22 = vor.u32 %v7079_v18, %v5870_v3  ;;  %v7119_v3 = vld [vmem:[#allocation6 + $0xb64] sm:$0xf] }
 0x1db   :  { %3068 = vmatpush.bf16.msra.mxu1 %v5777_v16  ;;  %v7113_v16 = vld [vmem:[#allocation6 + $0xb2c] sm:$0xf0]  ;;  %v7070_v18 = vld [vmem:[#allocation6 + $0x9d4] sm:$0xf0] }
 0x1dc   :  { %v7574_v26 = vpop.f32.mrf.mxu1  ;;  %v7576_v53 = vpop.f32.mrf.mxu0  ;;  %3039 = vmatpush.bf16.msrb.mxu3 %v6077_v23  ;;  %v1355_v23 = vperm.slane %v1347_v46, 0  ;;  %v5636_v46 = vld [vmem:[#allocation6 + $0x848] sm:$0xf] }
 0x1dd   :  { %3055 = vmatpush.bf16.msra.mxu0 %v5649_v31  ;;  %v5953_v31 = vor.u32 %v7099_v57, %v5950_v29  ;;  %v7109_v57 = vld [vmem:[#allocation6 + $0xb0c] sm:$0xf0]  ;;  %v5717_v29 = vor.u32 %v7042_v21, %v5716_v20  ;;  %v6030_v20 = vld [vmem:[#allocation6 + $0xb70] sm:$0xf0] }
 0x1de   :  { %v5981_v30 = vor.u32 %v7109_v57, %v5980_v27  ;;  %v5620_v57 = vld [vmem:[#allocation6 + $0x828] sm:$0xf] }
 0x1df   :  { %3069 = vmatpush.bf16.msra.mxu1 %v5761_v28  ;;  %3078 = vmatpush.bf16.msra.mxu2 %v5953_v31  ;;  %v7075_v31 = vld [vmem:[#allocation6 + $0xa04] sm:$0xf] }
 0x1e0   :  { %3040 = vmatpush.bf16.msrb.mxu3 %v6061_v11  ;;  %v5700_v11 = vld [vmem:[#allocation6 + $0x8c8] sm:$0xf]  ;;  %v5857_v36 = vor.u32 %v7075_v31, %v5854_v33  ;;  %v7115_v31 = vld [vmem:[#allocation6 + $0xb44] sm:$0xf]  ;;  %v6014_v33 = vld [vmem:[#allocation6 + $0xb50] sm:$0xf0] }
 0x1e1   :  { %3056 = vmatpush.bf16.msra.mxu0 %v5633_v38  ;;  %v5934_v38 = vld [vmem:[#allocation6 + $0xab0] sm:$0xf0] }
 0x1e2   :  { %v5937_v42 = vor.u32 %v7095_v37, %v5934_v38  ;;  %v6094_v37 = vld [vmem:[#allocation6 + $0xbf0] sm:$0xf0] }
 0x1e3   :  { %v7578_v43 = vpop.f32.mrf.mxu2  ;;  %3070 = vmatpush.bf16.msra.mxu1 %v5745_v17  ;;  %v2060_v17 = vadd.f32 %v7572_v47, %v1355_v23  ;;  %v6097_v41 = vor.u32 %v7135_v34, %v6094_v37  ;;  %v6017_v34 = vor.u32 %v7115_v31, %v6014_v33  ;;  %v7094_v31 = vld [vmem:[#allocation6 + $0xa94] sm:$0xf0]  ;;  %v7024_v33 = vld [vmem:[#allocation6 + $0x86c] sm:$0xf] }
 0x1e4   :  { %v2074_v49 = vpop.f32.mrf.mxu1  ;;  %v2113_v50 = vpop.f32.mrf.mxu0  ;;  %3079 = vmatpush.bf16.msra.mxu2 %v5937_v42  ;;  %v2034_v4 = vadd.f32 %v7578_v43, %v2021_v62  ;;  %v5997_v43 = vor.u32 %v7113_v16, %v5996_v15  ;;  %v1348_v62 = vperm.slane %v7585_v19, 4  ;;  %v7022_v15 = vld [vmem:[#allocation6 + $0x854] sm:$0xf0]  ;;  %v5828_v16 = vld [vmem:[#allocation6 + $0x9c8] sm:$0xf] }
 0x1e5   :  { %3057 = vmatpush.bf16.msra.mxu0 %v5617_v55  ;;  %v6045_v49 = vor.u32 %v7125_v45, %v6044_v44  ;;  %v7043_v50 = vld [vmem:[#allocation6 + $0x904] sm:$0xf]  ;;  %v5918_v55 = vld [vmem:[#allocation6 + $0xa90] sm:$0xf0]  ;;  %v2073_v44 = vadd.f32 %v7574_v26, %v2060_v17  ;;  %v5701_v45 = vor.u32 %v7038_v35, %v5700_v11  ;;  %v5829_v27 = vor.u32 %v7070_v18, %v5828_v16  ;;  %v5604_v17 = vld [vmem:[#allocation6 + $0x808] sm:$0xf] }
 0x1e6   :  { %v5729_v54 = vor.u32 %v7043_v50, %v5726_v51  ;;  %v5921_v58 = vor.u32 %v7091_v52, %v5918_v55  ;;  %v7034_v50 = vld [vmem:[#allocation6 + $0x8b4] sm:$0xf0]  ;;  %v7131_v51 = vld [vmem:[#allocation6 + $0xbc4] sm:$0xf]  ;;  %v6078_v52 = vld [vmem:[#allocation6 + $0xbd0] sm:$0xf0] }
 0x1e7   :  { %3041 = vmatpush.bf16.msrb.mxu3 %v6045_v49  ;;  %v5684_v49 = vld [vmem:[#allocation6 + $0x8a8] sm:$0xf]  ;;  %v6081_v47 = vor.u32 %v7131_v51, %v6078_v52  ;;  %v6062_v26 = vld [vmem:[#allocation6 + $0xbb0] sm:$0xf0]  ;;  %v5718_v51 = vld [vmem:[#allocation6 + $0x8f8] sm:$0xf0] }
 0x1e8   :  { %3071 = vmatpush.bf16.msra.mxu1 %v5729_v54  ;;  %3080 = vmatpush.bf16.msra.mxu2 %v5921_v58  ;;  %v5685_v58 = vor.u32 %v7034_v50, %v5684_v49  ;;  %v5998_v49 = vld [vmem:[#allocation6 + $0xb30] sm:$0xf0]  ;;  %v7040_v50 = vld [vmem:[#allocation6 + $0x8ec] sm:$0xf]  ;;  %v5748_v16 = vld [vmem:[#allocation6 + $0x928] sm:$0xf] }
 0x1e9   :  { %3058 = vmatpush.bf16.msra.mxu0 %v5601_v1  ;;  %v5902_v1 = vld [vmem:[#allocation6 + $0xa70] sm:$0xf0]  ;;  %v7050_v18 = vld [vmem:[#allocation6 + $0x934] sm:$0xf0] }
 0x1ea   :  { %v5905_v2 = vor.u32 %v7087_v0, %v5902_v1  ;;  %v6065_v0 = vor.u32 %v7127_v61, %v6062_v26  ;;  %v7106_v61 = vld [vmem:[#allocation6 + $0xaf4] sm:$0xf0]  ;;  %v7036_v26 = vld [vmem:[#allocation6 + $0x8cc] sm:$0xf] }
 0x1eb   :  { %v2035_v6 = vpop.f32.mrf.mxu2  ;;  %3042 = vmatpush.bf16.msrb.mxu3 %v6029_v63 }
 0x1ec   :  { %v6012_v6 = vld [vmem:[#allocation6 + $0xb40] sm:$0xf]  ;;  %3081 = vmatpush.bf16.msra.mxu2 %v5905_v2  ;;  %v5652_v2 = vld [vmem:[#allocation6 + $0x868] sm:$0xf] }
 0x1ed   :  { %v7583_v10 = vpop.f32.mrf.mxu1  ;;  %v6013_v8 = vor.u32 %v7117_v7, %v6012_v6  ;;  %v7123_v6 = vld [vmem:[#allocation6 + $0xb84] sm:$0xf]  ;;  %v6046_v7 = vld [vmem:[#allocation6 + $0xb90] sm:$0xf0] }
 0x1ef   :  { %3043 = vmatpush.bf16.msrb.mxu3 %v6013_v8  ;;  %v6049_v8 = vor.u32 %v7123_v6, %v6046_v7  ;;  %v5764_v7 = vld [vmem:[#allocation6 + $0x948] sm:$0xf] }
 0x1f0   :  { %3082 = vmatpush.bf16.msra.mxu2 %v5889_v13 }
 0x1f3   :  { %3044 = vmatpush.bf16.msrb.mxu3 %v5997_v43 }
 0x1f4   :  { %v7588_v32 = vpop.f32.mrf.mxu2  ;;  %3083 = vmatpush.bf16.msra.mxu2 %v5873_v22  ;;  %v6033_v22 = vor.u32 %v7119_v3, %v6030_v20  ;;  %v5940_v3 = vld [vmem:[#allocation6 + $0xaa8] sm:$0xf]  ;;  %v7098_v20 = vld [vmem:[#allocation6 + $0xab4] sm:$0xf0] }
 0x1f5   :  { %v2126_v39 = vpop.f32.mrf.mxu1  ;;  %v2086_v54 = vadd.f32 %v7588_v32, %v2073_v44  ;;  %v5844_v32 = vld [vmem:[#allocation6 + $0x9e8] sm:$0xf]  ;;  %v7062_v44 = vld [vmem:[#allocation6 + $0x994] sm:$0xf0] }
 0x1f7   :  { %3045 = vmatpush.bf16.msrb.mxu3 %v5981_v30  ;;  %v7066_v30 = vld [vmem:[#allocation6 + $0x9b4] sm:$0xf0] }
 0x1f8   :  { %3084 = vmatpush.bf16.msra.mxu2 %v5857_v36 }
 0x1fb   :  { %3090 = vmatpush.bf16.msra.mxu3 %v6097_v41  ;;  %v7014_v41 = vld [vmem:[#allocation6 + $0x814] sm:$0xf0] }
 0x1fc   :  { %v7590_v48 = vpop.f32.mrf.mxu0  ;;  %v2087_v59 = vpop.f32.mrf.mxu2  ;;  %v5605_v52 = vor.u32 %v7014_v41, %v5604_v17  ;;  %v5908_v17 = vld [vmem:[#allocation6 + $0xa68] sm:$0xf] }
 0x1fd   :  { %v5668_v59 = vld [vmem:[#allocation6 + $0x888] sm:$0xf] }
 0x1fe   :  { %v5669_v1 = vor.u32 %v7030_v60, %v5668_v59  ;;  %v7107_v59 = vld [vmem:[#allocation6 + $0xb04] sm:$0xf]  ;;  %v5982_v60 = vld [vmem:[#allocation6 + $0xb10] sm:$0xf0] }
 0x1ff   :  { %3091 = vmatpush.bf16.msra.mxu3 %v6081_v47  ;;  %v5780_v47 = vld [vmem:[#allocation6 + $0x968] sm:$0xf] }
 0x202   :  { %v2046_v5 = vpop.f32.mrf.mxu3 }
 0x203   :  { %v2047_v25 = vadd.f32 %v2046_v5, %v2034_v4  ;;  %v7026_v4 = vld [vmem:[#allocation6 + $0x874] sm:$0xf0]  ;;  %3092 = vmatpush.bf16.msra.mxu3 %v6065_v0 }
 0x204   :  { %v2165_v40 = vpop.f32.mrf.mxu0  ;;  %v7596_v14 = vpop.f32.mrf.mxu2  ;;  %v7074_v5 = vld [vmem:[#allocation6 + $0x9f4] sm:$0xf0] }
 0x205   :  { %7323 = vtanh.f32 %v2047_v25  ;;  %v1356_v25 = vperm.slane %v1348_v62, 0  ;;  %v5653_v40 = vor.u32 %v7026_v4, %v5652_v2  ;;  %v5845_v13 = vor.u32 %v7074_v5, %v5844_v32  ;;  %v5702_v62 = vld [vmem:[#allocation6 + $0x8d8] sm:$0xf0] }
 0x206   :  { %v5705_v6 = vor.u32 %v7036_v26, %v5702_v62 }
 0x207   :  { %3093 = vmatpush.bf16.msra.mxu3 %v6049_v8  ;;  %v2112_v21 = vadd.f32 %v7576_v53, %v1356_v25  ;;  %v7054_v25 = vld [vmem:[#allocation6 + $0x954] sm:$0xf0]  ;;  %v5956_v8 = vld [vmem:[#allocation6 + $0xac8] sm:$0xf] }
 0x209   :  { %v2125_v23 = vadd.f32 %v7583_v10, %v2112_v21  ;;  %v7028_v21 = vld [vmem:[#allocation6 + $0x88c] sm:$0xf] }
 0x20a   :  { %v2048_v24 = vpop.f32.mrf.mxu3 }
 0x20b   :  { %v7324_v28 = vpop.eup %7323  ;;  %v5637_v24 = vor.u32 %v7022_v15, %v5636_v46  ;;  %3094 = vmatpush.bf16.msra.mxu3 %v6033_v22  ;;  %v2138_v53 = vadd.f32 %v7596_v14, %v2125_v23  ;;  %v5670_v22 = vld [vmem:[#allocation6 + $0x898] sm:$0xf0]  ;;  %v1349_v23 = vperm.slane %v7585_v19, 6 }
 0x20c   :  { %v7598_v39 = vpack.c.bf16 %v7324_v28, %v7324_v28  ;;  %v2139_v42 = vpop.f32.mrf.mxu2  ;;  %v7018_v28 = vld [vmem:[#allocation6 + $0x834] sm:$0xf0] }
 0x20d   :  { %v7601_v38 = vpop.f32.mrf.mxu1  ;;  %v5621_v10 = vor.u32 %v7018_v28, %v5620_v57  ;;  %v5796_v42 = vld [vmem:[#allocation6 + $0x988] sm:$0xf]  ;;  %v5673_v57 = vor.u32 %v7028_v21, %v5670_v22 }
 0x20e   :  { %3007 = vmatmul.bf16.vlgmr.msrb.gmra.mxu0 %v7598_v39  ;;  %v5732_v28 = vld [vmem:[#allocation6 + $0x908] sm:$0xf] }
 0x20f   :  { %3103 = vmatpush.bf16.msrb.mxu0 %v5717_v29  ;;  %v5812_v29 = vld [vmem:[#allocation6 + $0x9a8] sm:$0xf]  ;;  %3095 = vmatpush.bf16.msra.mxu3 %v6017_v34  ;;  %v1357_v34 = vperm.slane %v1349_v23, 0 }
 0x210   :  { %v5813_v37 = vor.u32 %v7066_v30, %v5812_v29  ;;  %v7046_v29 = vld [vmem:[#allocation6 + $0x914] sm:$0xf0]  ;;  %v5924_v30 = vld [vmem:[#allocation6 + $0xa88] sm:$0xf] }
 0x211   :  { %v5925_v19 = vor.u32 %v7094_v31, %v5924_v30  ;;  %v5766_v30 = vld [vmem:[#allocation6 + $0x958] sm:$0xf0]  ;;  %v7100_v31 = vld [vmem:[#allocation6 + $0xacc] sm:$0xf] }
 0x212   :  { %v2098_v55 = vpop.f32.mrf.mxu3 }
 0x213   :  { %v2099_v56 = vadd.f32 %v2098_v55, %v2086_v54  ;;  %3104 = vmatpush.bf16.msrb.mxu0 %v5701_v45  ;;  %v7111_v45 = vld [vmem:[#allocation6 + $0xb24] sm:$0xf]  ;;  %v5797_v54 = vor.u32 %v7062_v44, %v5796_v42  ;;  %v7058_v55 = vld [vmem:[#allocation6 + $0x974] sm:$0xf0]  ;;  %v7020_v44 = vld [vmem:[#allocation6 + $0x84c] sm:$0xf] }
 0x214   :  { %v6001_v14 = vor.u32 %v7111_v45, %v5998_v49  ;;  %v5781_v4 = vor.u32 %v7058_v55, %v5780_v47  ;;  %v7090_v42 = vld [vmem:[#allocation6 + $0xa74] sm:$0xf0]  ;;  %v5638_v45 = vld [vmem:[#allocation6 + $0x858] sm:$0xf0]  ;;  %v2164_v49 = vadd.f32 %v7590_v48, %v1357_v34  ;;  %v5892_v47 = vld [vmem:[#allocation6 + $0xa48] sm:$0xf] }
 0x215   :  { %7325 = vtanh.f32 %v2099_v56  ;;  %v2178_v63 = vpop.f32.mrf.mxu1  ;;  %v5721_v56 = vor.u32 %v7040_v50, %v5718_v51  ;;  %v7068_v50 = vld [vmem:[#allocation6 + $0x9cc] sm:$0xf]  ;;  %v5830_v51 = vld [vmem:[#allocation6 + $0x9d8] sm:$0xf0] }
 0x216   :  { %3096 = vmatpush.bf16.msra.mxu3 %v6001_v14  ;;  %v5985_v63 = vor.u32 %v7107_v59, %v5982_v60  ;;  %v2177_v14 = vadd.f32 %v7601_v38, %v2164_v49  ;;  %v5833_v55 = vor.u32 %v7068_v50, %v5830_v51  ;;  %v5622_v59 = vld [vmem:[#allocation6 + $0x838] sm:$0xf0]  ;;  %v7064_v48 = vld [vmem:[#allocation6 + $0x9ac] sm:$0xf]  ;;  %v7126_v49 = vld [vmem:[#allocation6 + $0xb94] sm:$0xf0] }
 0x217   :  { %3105 = vmatpush.bf16.msrb.mxu0 %v5685_v58  ;;  %v5972_v58 = vld [vmem:[#allocation6 + $0xae8] sm:$0xf]  ;;  %v7044_v50 = vld [vmem:[#allocation6 + $0x90c] sm:$0xf]  ;;  %v5734_v51 = vld [vmem:[#allocation6 + $0x918] sm:$0xf0] }
 0x218   :  { %v5973_v5 = vor.u32 %v7106_v61, %v5972_v58  ;;  %v7016_v58 = vld [vmem:[#allocation6 + $0x82c] sm:$0xf]  ;;  %v5814_v61 = vld [vmem:[#allocation6 + $0x9b8] sm:$0xf0] }
 0x21a   :  { %v2100_v9 = vpop.f32.mrf.mxu3  ;;  %3097 = vmatpush.bf16.msra.mxu3 %v5985_v63  ;;  %v5625_v63 = vor.u32 %v7016_v58, %v5622_v59  ;;  %v7122_v58 = vld [vmem:[#allocation6 + $0xb74] sm:$0xf0]  ;;  %v7088_v59 = vld [vmem:[#allocation6 + $0xa6c] sm:$0xf] }
 0x21b   :  { %v7326_v12 = vpop.eup %7325  ;;  %3106 = vmatpush.bf16.msrb.mxu0 %v5669_v1  ;;  %v7102_v9 = vld [vmem:[#allocation6 + $0xad4] sm:$0xf0] }
 0x21c   :  { %v7607_v43 = vpack.c.bf16 %v7326_v12, %v7326_v12  ;;  %v7032_v12 = vld [vmem:[#allocation6 + $0x8ac] sm:$0xf]  ;;  %v5957_v46 = vor.u32 %v7102_v9, %v5956_v8  ;;  %v5860_v8 = vld [vmem:[#allocation6 + $0xa08] sm:$0xf]  ;;  %v7078_v9 = vld [vmem:[#allocation6 + $0xa14] sm:$0xf0] }
 0x21d   :  { %v5861_v21 = vor.u32 %v7078_v9, %v5860_v8  ;;  %v7110_v8 = vld [vmem:[#allocation6 + $0xb14] sm:$0xf0]  ;;  %v7076_v9 = vld [vmem:[#allocation6 + $0xa0c] sm:$0xf] }
 0x21e   :  { %3020 = vmatmul.bf16.vlgmr.msrb.gmra.mxu1 %v7607_v43  ;;  %3059 = vmatmul.bf16.vlgmr.msra.gmra.mxu0 %v7598_v39 }
 0x21f   :  { %3107 = vmatpush.bf16.msrb.mxu0 %v5653_v40  ;;  %3116 = vmatpush.bf16.msrb.mxu1 %v5845_v13  ;;  %v5686_v40 = vld [vmem:[#allocation6 + $0x8b8] sm:$0xf0]  ;;  %v5765_v13 = vor.u32 %v7054_v25, %v5764_v7 }
 0x220   :  { %v5689_v15 = vor.u32 %v7032_v12, %v5686_v40  ;;  %v6100_v40 = vld [vmem:[#allocation6 + $0xbe8] sm:$0xf] }
 0x222   :  { %v2150_v11 = vpop.f32.mrf.mxu3 }
 0x223   :  { %v2151_v35 = vadd.f32 %v2150_v11, %v2138_v53  ;;  %3108 = vmatpush.bf16.msrb.mxu0 %v5637_v24  ;;  %3117 = vmatpush.bf16.msrb.mxu1 %v5829_v27  ;;  %v5749_v24 = vor.u32 %v7050_v18, %v5748_v16  ;;  %v5941_v27 = vor.u32 %v7098_v20, %v5940_v3  ;;  %v5654_v53 = vld [vmem:[#allocation6 + $0x878] sm:$0xf0]  ;;  %v7072_v11 = vld [vmem:[#allocation6 + $0x9ec] sm:$0xf] }
 0x224   :  { %v7614_v36 = vpop.f32.mrf.mxu2  ;;  %v7104_v16 = vld [vmem:[#allocation6 + $0xaec] sm:$0xf]  ;;  %v5974_v18 = vld [vmem:[#allocation6 + $0xaf8] sm:$0xf0] }
 0x225   :  { %7327 = vtanh.f32 %v2151_v35  ;;  %v5846_v35 = vld [vmem:[#allocation6 + $0x9f8] sm:$0xf0]  ;;  %v2190_v60 = vadd.f32 %v7614_v36, %v2177_v14  ;;  %v7060_v36 = vld [vmem:[#allocation6 + $0x98c] sm:$0xf] }
 0x226   :  { %v5849_v41 = vor.u32 %v7072_v11, %v5846_v35  ;;  %v6068_v35 = vld [vmem:[#allocation6 + $0xba8] sm:$0xf]  ;;  %v7092_v14 = vld [vmem:[#allocation6 + $0xa8c] sm:$0xf] }
 0x227   :  { %3109 = vmatpush.bf16.msrb.mxu0 %v5621_v10  ;;  %3118 = vmatpush.bf16.msrb.mxu1 %v5813_v37  ;;  %v5733_v10 = vor.u32 %v7046_v29, %v5732_v28  ;;  %v5657_v37 = vor.u32 %v7024_v33, %v5654_v53  ;;  %v7134_v28 = vld [vmem:[#allocation6 + $0xbd4] sm:$0xf0]  ;;  %v7052_v29 = vld [vmem:[#allocation6 + $0x94c] sm:$0xf]  ;;  %v5958_v33 = vld [vmem:[#allocation6 + $0xad8] sm:$0xf0] }
 0x228   :  { %v5769_v34 = vor.u32 %v7052_v29, %v5766_v30  ;;  %v5961_v11 = vor.u32 %v7100_v31, %v5958_v33  ;;  %v6038_v29 = vld [vmem:[#allocation6 + $0xb78] sm:$0xf0]  ;;  %v7116_v31 = vld [vmem:[#allocation6 + $0xb4c] sm:$0xf] }
 0x229   :  { %v6022_v33 = vld [vmem:[#allocation6 + $0xb58] sm:$0xf0] }
 0x22a   :  { %v2152_v0 = vpop.f32.mrf.mxu3 }
 0x22b   :  { %v7328_v1 = vpop.eup %7327  ;;  %3110 = vmatpush.bf16.msrb.mxu0 %v5605_v52  ;;  %3119 = vmatpush.bf16.msrb.mxu1 %v5797_v54  ;;  %v5909_v52 = vor.u32 %v7090_v42, %v5908_v17  ;;  %v5641_v54 = vor.u32 %v7020_v44, %v5638_v45  ;;  %v5876_v0 = vld [vmem:[#allocation6 + $0xa28] sm:$0xf]  ;;  %v7096_v17 = vld [vmem:[#allocation6 + $0xaac] sm:$0xf] }
 0x22c   :  { %v2191_v2 = vpop.f32.mrf.mxu2  ;;  %v7616_v32 = vpack.c.bf16 %v7328_v1, %v7328_v1  ;;  %v5817_v1 = vor.u32 %v7064_v48, %v5814_v61  ;;  %v6052_v45 = vld [vmem:[#allocation6 + $0xb88] sm:$0xf] }
 0x22d   :  { %v7082_v2 = vld [vmem:[#allocation6 + $0xa34] sm:$0xf0] }
 0x22e   :  { %3033 = vmatmul.bf16.vlgmr.msrb.gmra.mxu2 %v7616_v32  ;;  %3072 = vmatmul.bf16.vlgmr.msra.gmra.mxu1 %v7607_v43  ;;  %v5877_v7 = vor.u32 %v7082_v2, %v5876_v0  ;;  %v6004_v2 = vld [vmem:[#allocation6 + $0xb28] sm:$0xf] }
 0x22f   :  { %3155 = vmatpush.bf16.msra.mxu0 %v5721_v56  ;;  %3120 = vmatpush.bf16.msrb.mxu1 %v5781_v4  ;;  %v7086_v56 = vld [vmem:[#allocation6 + $0xa54] sm:$0xf0]  ;;  %v7012_v4 = vld [vmem:[#allocation6 + $0x80c] sm:$0xf] }
 0x230   :  { %3111 = vmatmul.bf16.vlgmr.msrb.gmra.mxu0 %v7598_v39  ;;  %3129 = vmatpush.bf16.msrb.mxu2 %v5973_v5  ;;  %v5893_v62 = vor.u32 %v7086_v56, %v5892_v47  ;;  %v5606_v5 = vld [vmem:[#allocation6 + $0x818] sm:$0xf0]  ;;  %v5737_v47 = vor.u32 %v7044_v50, %v5734_v51  ;;  %v6036_v56 = vld [vmem:[#allocation6 + $0xb68] sm:$0xf]  ;;  %v6173_v51 = vld [vmem:[#allocation6 + $0xc80] sm:$0xf] }
 0x231   :  { %v5609_v25 = vor.u32 %v7012_v4, %v5606_v5  ;;  %v6037_v48 = vor.u32 %v7122_v58, %v6036_v56  ;;  %v7114_v4 = vld [vmem:[#allocation6 + $0xb34] sm:$0xf0]  ;;  %v7080_v5 = vld [vmem:[#allocation6 + $0xa2c] sm:$0xf]  ;;  %v6349_v56 = vld [vmem:[#allocation6 + $0xde0] sm:$0xf] }
 0x233   :  { %3156 = vmatpush.bf16.msra.mxu0 %v5705_v6  ;;  %3121 = vmatpush.bf16.msrb.mxu1 %v5765_v13  ;;  %v5798_v6 = vld [vmem:[#allocation6 + $0x998] sm:$0xf0]  ;;  %v7138_v13 = vld [vmem:[#allocation6 + $0xbf4] sm:$0xf0] }
 0x234   :  { %3130 = vmatpush.bf16.msrb.mxu2 %v5957_v46  ;;  %v5801_v12 = vor.u32 %v7060_v36, %v5798_v6  ;;  %v7056_v46 = vld [vmem:[#allocation6 + $0x96c] sm:$0xf]  ;;  %v6101_v22 = vor.u32 %v7138_v13, %v6100_v40  ;;  %v5878_v36 = vld [vmem:[#allocation6 + $0xa38] sm:$0xf0]  ;;  %v6005_v6 = vor.u32 %v7114_v4, %v6004_v2  ;;  %v6317_v2 = vld [vmem:[#allocation6 + $0xda0] sm:$0xf] }
 0x235   :  { %v7136_v40 = vld [vmem:[#allocation6 + $0xbec] sm:$0xf]  ;;  %v6102_v13 = vld [vmem:[#allocation6 + $0xbf8] sm:$0xf0] }
 0x237   :  { %3157 = vmatpush.bf16.msra.mxu0 %v5689_v15  ;;  %3122 = vmatpush.bf16.msrb.mxu1 %v5749_v24  ;;  %v5782_v15 = vld [vmem:[#allocation6 + $0x978] sm:$0xf0] }
 0x238   :  { %3131 = vmatpush.bf16.msrb.mxu2 %v5941_v27  ;;  %v5785_v24 = vor.u32 %v7056_v46, %v5782_v15  ;;  %v5977_v27 = vor.u32 %v7104_v16, %v5974_v18  ;;  %v6105_v15 = vor.u32 %v7136_v40, %v6102_v13  ;;  %v7132_v16 = vld [vmem:[#allocation6 + $0xbcc] sm:$0xf]  ;;  %v6086_v18 = vld [vmem:[#allocation6 + $0xbd8] sm:$0xf0]  ;;  %v7189_v40 = vld [vmem:[#allocation6 + $0xd8c] sm:$0xf0] }
 0x239   :  { %v7167_v13 = vld [vmem:[#allocation6 + $0xce4] sm:$0xf] }
 0x23b   :  { %3158 = vmatpush.bf16.msra.mxu0 %v5673_v57  ;;  %3123 = vmatpush.bf16.msrb.mxu1 %v5733_v10  ;;  %v6084_v57 = vld [vmem:[#allocation6 + $0xbc8] sm:$0xf]  ;;  %v7130_v10 = vld [vmem:[#allocation6 + $0xbb4] sm:$0xf0] }
 0x23c   :  { %3132 = vmatpush.bf16.msrb.mxu2 %v5925_v19  ;;  %v6085_v53 = vor.u32 %v7134_v28, %v6084_v57  ;;  %v7048_v19 = vld [vmem:[#allocation6 + $0x92c] sm:$0xf]  ;;  %v6069_v42 = vor.u32 %v7130_v10, %v6068_v35  ;;  %v6221_v35 = vld [vmem:[#allocation6 + $0xce0] sm:$0xf]  ;;  %v7169_v10 = vld [vmem:[#allocation6 + $0xcec] sm:$0xf0] }
 0x23d   :  { %v7120_v28 = vld [vmem:[#allocation6 + $0xb6c] sm:$0xf] }
 0x23e   :  { %3085 = vmatmul.bf16.vlgmr.msra.gmra.mxu2 %v7616_v32  ;;  %3124 = vmatmul.bf16.vlgmr.msrb.gmra.mxu1 %v7607_v43  ;;  %v6041_v30 = vor.u32 %v7120_v28, %v6038_v29  ;;  %v6269_v28 = vld [vmem:[#allocation6 + $0xd40] sm:$0xf]  ;;  %v7181_v29 = vld [vmem:[#allocation6 + $0xd4c] sm:$0xf0] }
 0x23f   :  { %3159 = vmatpush.bf16.msra.mxu0 %v5657_v37  ;;  %3168 = vmatpush.bf16.msra.mxu1 %v5849_v41  ;;  %v5750_v37 = vld [vmem:[#allocation6 + $0x938] sm:$0xf0] }
 0x240   :  { %3133 = vmatpush.bf16.msrb.mxu2 %v5909_v52  ;;  %v5942_v41 = vld [vmem:[#allocation6 + $0xab8] sm:$0xf0] }
 0x241   :  { %v5945_v44 = vor.u32 %v7096_v17, %v5942_v41  ;;  %v5926_v52 = vld [vmem:[#allocation6 + $0xa98] sm:$0xf0] }
 0x242   :  { %v2202_v26 = vpop.f32.mrf.mxu3  ;;  %v5990_v17 = vld [vmem:[#allocation6 + $0xb18] sm:$0xf0] }
 0x243   :  { %v2203_v38 = vadd.f32 %v2202_v26, %v2190_v60  ;;  %3160 = vmatpush.bf16.msra.mxu0 %v5641_v54  ;;  %3169 = vmatpush.bf16.msra.mxu1 %v5833_v55  ;;  %v6053_v54 = vor.u32 %v7126_v49, %v6052_v45  ;;  %v5929_v55 = vor.u32 %v7092_v14, %v5926_v52  ;;  %v5910_v60 = vld [vmem:[#allocation6 + $0xa78] sm:$0xf0]  ;;  %v6020_v26 = vld [vmem:[#allocation6 + $0xb48] sm:$0xf]  ;;  %v6189_v45 = vld [vmem:[#allocation6 + $0xca0] sm:$0xf] }
 0x244   :  { %3134 = vmatpush.bf16.msrb.mxu2 %v5893_v62  ;;  %v5913_v61 = vor.u32 %v7088_v59, %v5910_v60  ;;  %v7084_v62 = vld [vmem:[#allocation6 + $0xa4c] sm:$0xf]  ;;  %v7161_v49 = vld [vmem:[#allocation6 + $0xcac] sm:$0xf0] }
 0x245   :  { %7329 = vtanh.f32 %v2203_v38  ;;  %v7118_v38 = vld [vmem:[#allocation6 + $0xb54] sm:$0xf0]  ;;  %v6190_v50 = vor.u32 %v7161_v49, %v6189_v45  ;;  %v7157_v14 = vld [vmem:[#allocation6 + $0xc8c] sm:$0xf0]  ;;  %v6175_v45 = vld [vmem:[#allocation6 + $0xc90] sm:$0xf0] }
 0x246   :  { %v6021_v0 = vor.u32 %v7118_v38, %v6020_v26  ;;  %v7201_v59 = vld [vmem:[#allocation6 + $0xdec] sm:$0xf0]  ;;  %v6333_v26 = vld [vmem:[#allocation6 + $0xdc0] sm:$0xf] }
 0x247   :  { %3161 = vmatpush.bf16.msra.mxu0 %v5625_v63  ;;  %3170 = vmatpush.bf16.msra.mxu1 %v5817_v1  ;;  %v5894_v63 = vld [vmem:[#allocation6 + $0xa58] sm:$0xf0]  ;;  %v6350_v60 = vor.u32 %v7201_v59, %v6349_v56  ;;  %v6159_v56 = vld [vmem:[#allocation6 + $0xc70] sm:$0xf0] }
 0x248   :  { %3135 = vmatpush.bf16.msrb.mxu2 %v5877_v7  ;;  %v5897_v1 = vor.u32 %v7084_v62, %v5894_v63  ;;  %v5881_v7 = vor.u32 %v7080_v5, %v5878_v36  ;;  %v7197_v62 = vld [vmem:[#allocation6 + $0xdcc] sm:$0xf0] }
 0x249   :  { %v6334_v63 = vor.u32 %v7197_v62, %v6333_v26  ;;  %v7193_v5 = vld [vmem:[#allocation6 + $0xdac] sm:$0xf0] }
 0x24a   :  { %v2204_v3 = vpop.f32.mrf.mxu3  ;;  %v6318_v36 = vor.u32 %v7193_v5, %v6317_v2  ;;  %v7217_v62 = vld [vmem:[#allocation6 + $0xe6c] sm:$0xf0]  ;;  %v7195_v2 = vld [vmem:[#allocation6 + $0xdc4] sm:$0xf]  ;;  %v6335_v5 = vld [vmem:[#allocation6 + $0xdd0] sm:$0xf0] }
 0x24b   :  { %v7330_v20 = vpop.eup %7329  ;;  %3162 = vmatpush.bf16.msra.mxu0 %v5609_v25  ;;  %3171 = vmatpush.bf16.msra.mxu1 %v5801_v12  ;;  %v5988_v25 = vld [vmem:[#allocation6 + $0xb08] sm:$0xf]  ;;  %v5862_v12 = vld [vmem:[#allocation6 + $0xa18] sm:$0xf0]  ;;  %v6089_v3 = vor.u32 %v7132_v16, %v6086_v18  ;;  %v6285_v16 = vld [vmem:[#allocation6 + $0xd60] sm:$0xf] }
 0x24c   :  { %v7627_v23 = vpack.c.bf16 %v7330_v20, %v7330_v20  ;;  %3136 = vmatpush.bf16.msrb.mxu2 %v5861_v21  ;;  %v5989_v46 = vor.u32 %v7110_v8, %v5988_v25  ;;  %v7128_v20 = vld [vmem:[#allocation6 + $0xbac] sm:$0xf]  ;;  %v6070_v21 = vld [vmem:[#allocation6 + $0xbb8] sm:$0xf0]  ;;  %v6301_v25 = vld [vmem:[#allocation6 + $0xd80] sm:$0xf] }
 0x24d   :  { %v7185_v18 = vld [vmem:[#allocation6 + $0xd6c] sm:$0xf0] }
 0x24e   :  { %3046 = vmatmul.bf16.vlgmr.msrb.gmra.mxu3 %v7627_v23  ;;  %3163 = vmatmul.bf16.vlgmr.msra.gmra.mxu0 %v7598_v39  ;;  %v5753_v39 = vor.u32 %v7048_v19, %v5750_v37  ;;  %v6222_v19 = vor.u32 %v7169_v10, %v6221_v35  ;;  %v7108_v37 = vld [vmem:[#allocation6 + $0xb0c] sm:$0xf]  ;;  %v6191_v35 = vld [vmem:[#allocation6 + $0xcb0] sm:$0xf0] }
 0x24f   :  { %3142 = vmatpush.bf16.msrb.mxu3 %v6101_v22  ;;  %3172 = vmatpush.bf16.msra.mxu1 %v5785_v24  ;;  %v6073_v22 = vor.u32 %v7128_v20, %v6070_v21  ;;  %v7124_v24 = vld [vmem:[#allocation6 + $0xb8c] sm:$0xf]  ;;  %v5993_v41 = vor.u32 %v7108_v37, %v5990_v17  ;;  %v7233_v20 = vld [vmem:[#allocation6 + $0xeec] sm:$0xf0]  ;;  %v7163_v21 = vld [vmem:[#allocation6 + $0xcc4] sm:$0xf] }
 0x250   :  { %3181 = vmatpush.bf16.msra.mxu2 %v5977_v27  ;;  %v6054_v27 = vld [vmem:[#allocation6 + $0xb98] sm:$0xf0]  ;;  %4000 = vmatpush.bf16.msrb.mxu0 %v6222_v19  ;;  %v6253_v19 = vld [vmem:[#allocation6 + $0xd20] sm:$0xf]  ;;  %v7177_v37 = vld [vmem:[#allocation6 + $0xd2c] sm:$0xf0] }
 0x251   :  { %3137 = vmatmul.bf16.vlgmr.msrb.gmra.mxu2 %v7616_v32  ;;  %v6057_v57 = vor.u32 %v7124_v24, %v6054_v27  ;;  %v6286_v24 = vor.u32 %v7185_v18, %v6285_v16  ;;  %v6254_v17 = vor.u32 %v7177_v37, %v6253_v19  ;;  %v6319_v18 = vld [vmem:[#allocation6 + $0xdb0] sm:$0xf0]  ;;  %v7183_v19 = vld [vmem:[#allocation6 + $0xd64] sm:$0xf] }
 0x252   :  { %v6287_v37 = vld [vmem:[#allocation6 + $0xd70] sm:$0xf0] }
 0x253   :  { %3143 = vmatpush.bf16.msrb.mxu3 %v6085_v53  ;;  %3173 = vmatpush.bf16.msra.mxu1 %v5769_v34  ;;  %v6025_v53 = vor.u32 %v7116_v31, %v6022_v33  ;;  %v7112_v34 = vld [vmem:[#allocation6 + $0xb2c] sm:$0xf] }
 0x254   :  { %3182 = vmatpush.bf16.msra.mxu2 %v5961_v11  ;;  %v6006_v11 = vld [vmem:[#allocation6 + $0xb38] sm:$0xf0] }
 0x257   :  { %3144 = vmatpush.bf16.msrb.mxu3 %v6069_v42  ;;  %3174 = vmatpush.bf16.msra.mxu1 %v5753_v39  ;;  %v6205_v42 = vld [vmem:[#allocation6 + $0xcc0] sm:$0xf]  ;;  %v7165_v39 = vld [vmem:[#allocation6 + $0xccc] sm:$0xf0] }
 0x258   :  { %3183 = vmatpush.bf16.msra.mxu2 %v5945_v44  ;;  %v6206_v44 = vor.u32 %v7165_v39, %v6205_v42  ;;  %v7225_v42 = vld [vmem:[#allocation6 + $0xeac] sm:$0xf0]  ;;  %v7155_v39 = vld [vmem:[#allocation6 + $0xc84] sm:$0xf] }
 0x259   :  { %v6178_v49 = vor.u32 %v7155_v39, %v6175_v45  ;;  %v6479_v39 = vld [vmem:[#allocation6 + $0xef0] sm:$0xf0] }
 0x25a   :  { %4001 = vmatpush.bf16.msrb.mxu0 %v6206_v44 }
 0x25b   :  { %3145 = vmatpush.bf16.msrb.mxu3 %v6053_v54  ;;  %3175 = vmatpush.bf16.msra.mxu1 %v5737_v47  ;;  %v6174_v54 = vor.u32 %v7157_v14, %v6173_v51  ;;  %v6157_v47 = vld [vmem:[#allocation6 + $0xc60] sm:$0xf]  ;;  %v7173_v51 = vld [vmem:[#allocation6 + $0xd0c] sm:$0xf0] }
 0x25c   :  { %3184 = vmatpush.bf16.msra.mxu2 %v5929_v55  ;;  %v7153_v55 = vld [vmem:[#allocation6 + $0xc6c] sm:$0xf0]  ;;  %v6429_v14 = vld [vmem:[#allocation6 + $0xe80] sm:$0xf] }
 0x25d   :  { %v6158_v58 = vor.u32 %v7153_v55, %v6157_v47  ;;  %v7221_v47 = vld [vmem:[#allocation6 + $0xe8c] sm:$0xf0]  ;;  %v7151_v55 = vld [vmem:[#allocation6 + $0xc64] sm:$0xf] }
 0x25e   :  { %3098 = vmatmul.bf16.vlgmr.msra.gmra.mxu3 %v7627_v23  ;;  %3176 = vmatmul.bf16.vlgmr.msra.gmra.mxu1 %v7607_v43  ;;  %v5865_v43 = vor.u32 %v7076_v9, %v5862_v12  ;;  %v6430_v59 = vor.u32 %v7221_v47, %v6429_v14  ;;  %v7179_v14 = vld [vmem:[#allocation6 + $0xd44] sm:$0xf] }
 0x25f   :  { %3146 = vmatpush.bf16.msrb.mxu3 %v6037_v48  ;;  %4002 = vmatpush.bf16.msrb.mxu0 %v6190_v50  ;;  %v6141_v48 = vld [vmem:[#allocation6 + $0xc40] sm:$0xf]  ;;  %v7227_v47 = vld [vmem:[#allocation6 + $0xec4] sm:$0xf] }
 0x260   :  { %3185 = vmatpush.bf16.msra.mxu2 %v5913_v61  ;;  %4013 = vmatpush.bf16.msrb.mxu1 %v6350_v60  ;;  %v7149_v61 = vld [vmem:[#allocation6 + $0xc4c] sm:$0xf0]  ;;  %v6237_v50 = vld [vmem:[#allocation6 + $0xd00] sm:$0xf]  ;;  %v6162_v60 = vor.u32 %v7151_v55, %v6159_v56  ;;  %v6463_v56 = vld [vmem:[#allocation6 + $0xed0] sm:$0xf0] }
 0x263   :  { %3147 = vmatpush.bf16.msrb.mxu3 %v6021_v0  ;;  %4003 = vmatpush.bf16.msrb.mxu0 %v6174_v54  ;;  %v6125_v0 = vld [vmem:[#allocation6 + $0xc20] sm:$0xf]  ;;  %v6238_v54 = vor.u32 %v7173_v51, %v6237_v50  ;;  %v7261_v50 = vld [vmem:[#allocation6 + $0xfcc] sm:$0xf0] }
 0x264   :  { %3186 = vmatpush.bf16.msra.mxu2 %v5897_v1  ;;  %v7145_v1 = vld [vmem:[#allocation6 + $0xc2c] sm:$0xf0]  ;;  %4014 = vmatpush.bf16.msrb.mxu1 %v6334_v63 }
 0x265   :  { %v6126_v4 = vor.u32 %v7145_v1, %v6125_v0  ;;  %v7147_v0 = vld [vmem:[#allocation6 + $0xc44] sm:$0xf]  ;;  %v6143_v1 = vld [vmem:[#allocation6 + $0xc50] sm:$0xf0] }
 0x267   :  { %3148 = vmatpush.bf16.msrb.mxu3 %v6005_v6  ;;  %4004 = vmatpush.bf16.msrb.mxu0 %v6158_v58  ;;  %v6109_v6 = vld [vmem:[#allocation6 + $0xc00] sm:$0xf] }
 0x268   :  { %3187 = vmatpush.bf16.msra.mxu2 %v5881_v7  ;;  %4015 = vmatpush.bf16.msrb.mxu1 %v6318_v36  ;;  %v7141_v7 = vld [vmem:[#allocation6 + $0xc0c] sm:$0xf0] }
 0x269   :  { %v6110_v12 = vor.u32 %v7141_v7, %v6109_v6  ;;  %v6338_v6 = vor.u32 %v7195_v2, %v6335_v5  ;;  %v6397_v7 = vld [vmem:[#allocation6 + $0xe40] sm:$0xf] }
 0x26b   :  { %3149 = vmatpush.bf16.msrb.mxu3 %v5989_v46  ;;  %v6223_v46 = vld [vmem:[#allocation6 + $0xcf0] sm:$0xf0] }
 0x26c   :  { %3188 = vmatpush.bf16.msra.mxu2 %v5865_v43  ;;  %v6302_v43 = vor.u32 %v7189_v40, %v6301_v25  ;;  %v7213_v25 = vld [vmem:[#allocation6 + $0xe4c] sm:$0xf0] }
 0x26d   :  { %v6398_v40 = vor.u32 %v7213_v25, %v6397_v7  ;;  %v6557_v7 = vld [vmem:[#allocation6 + $0xf80] sm:$0xf]  ;;  %v7253_v25 = vld [vmem:[#allocation6 + $0xf8c] sm:$0xf0] }
 0x26e   :  { %3150 = vmatmul.bf16.vlgmr.msrb.gmra.mxu3 %v7627_v23  ;;  %4016 = vmatpush.bf16.msrb.mxu1 %v6302_v43  ;;  %v7191_v43 = vld [vmem:[#allocation6 + $0xda4] sm:$0xf] }
 0x26f   :  { %3194 = vmatpush.bf16.msra.mxu3 %v6105_v15  ;;  %3189 = vmatmul.bf16.vlgmr.msra.gmra.mxu2 %v7616_v32  ;;  %v6009_v32 = vor.u32 %v7112_v34, %v6006_v11  ;;  %v6226_v15 = vor.u32 %v7167_v13, %v6223_v46  ;;  %v7229_v34 = vld [vmem:[#allocation6 + $0xecc] sm:$0xf0]  ;;  %v7159_v11 = vld [vmem:[#allocation6 + $0xca4] sm:$0xf]  ;;  %v6127_v46 = vld [vmem:[#allocation6 + $0xc30] sm:$0xf0] }
 0x270   :  { %v7143_v13 = vld [vmem:[#allocation6 + $0xc24] sm:$0xf] }
 0x271   :  { %v6130_v16 = vor.u32 %v7143_v13, %v6127_v46  ;;  %v6239_v13 = vld [vmem:[#allocation6 + $0xd10] sm:$0xf0]  ;;  %v7219_v46 = vld [vmem:[#allocation6 + $0xe84] sm:$0xf] }
 0x272   :  { %4017 = vmatpush.bf16.msrb.mxu1 %v6286_v24  ;;  %v7139_v24 = vld [vmem:[#allocation6 + $0xc04] sm:$0xf] }
 0x273   :  { %3195 = vmatpush.bf16.msra.mxu3 %v6089_v3  ;;  %v6477_v3 = vld [vmem:[#allocation6 + $0xee0] sm:$0xf] }
 0x274   :  { %v6478_v27 = vor.u32 %v7233_v20, %v6477_v3  ;;  %v6322_v3 = vor.u32 %v7191_v43, %v6319_v18  ;;  %v6381_v20 = vld [vmem:[#allocation6 + $0xe20] sm:$0xf] }
 0x276   :  { %4026 = vmatpush.bf16.msrb.mxu2 %v6478_v27  ;;  %v6111_v27 = vld [vmem:[#allocation6 + $0xc10] sm:$0xf0] }
 0x277   :  { %3196 = vmatpush.bf16.msra.mxu3 %v6073_v22  ;;  %v6207_v22 = vld [vmem:[#allocation6 + $0xcd0] sm:$0xf0] }
 0x27b   :  { %3197 = vmatpush.bf16.msra.mxu3 %v6057_v57  ;;  %v6210_v57 = vor.u32 %v7163_v21, %v6207_v22  ;;  %v7209_v21 = vld [vmem:[#allocation6 + $0xe2c] sm:$0xf0] }
 0x27c   :  { %v6382_v22 = vor.u32 %v7209_v21, %v6381_v20  ;;  %v6541_v21 = vld [vmem:[#allocation6 + $0xf60] sm:$0xf] }
 0x27f   :  { %3198 = vmatpush.bf16.msra.mxu3 %v6041_v30  ;;  %v6461_v30 = vld [vmem:[#allocation6 + $0xec0] sm:$0xf] }
 0x280   :  { %v6462_v10 = vor.u32 %v7229_v34, %v6461_v30  ;;  %v5593_v30 = vld [vmem:[%s7737_s4 + $0x8] sm:$0xf]  ;;  %v7205_v34 = vld [vmem:[#allocation6 + $0xe0c] sm:$0xf0] }
 0x282   :  { %4027 = vmatpush.bf16.msrb.mxu2 %v6462_v10 }
 0x283   :  { %3199 = vmatpush.bf16.msra.mxu3 %v6025_v53  ;;  %v6270_v53 = vor.u32 %v7181_v29, %v6269_v28  ;;  %v6114_v28 = vor.u32 %v7139_v24, %v6111_v27  ;;  %v6303_v29 = vld [vmem:[#allocation6 + $0xd90] sm:$0xf0] }
 0x285   :  { %4018 = vmatpush.bf16.msrb.mxu1 %v6270_v53  ;;  %v6365_v53 = vld [vmem:[#allocation6 + $0xe00] sm:$0xf] }
 0x286   :  { %v6366_v10 = vor.u32 %v7205_v34, %v6365_v53  ;;  %v7245_v53 = vld [vmem:[#allocation6 + $0xf4c] sm:$0xf0] }
 0x287   :  { %3200 = vmatpush.bf16.msra.mxu3 %v6009_v32  ;;  %v6194_v32 = vor.u32 %v7159_v11, %v6191_v35  ;;  %v6605_v11 = vld [vmem:[#allocation6 + $0xfe0] sm:$0xf] }
 0x289   :  { %4019 = vmatpush.bf16.msrb.mxu1 %v6254_v17 }
 0x28b   :  { %3201 = vmatpush.bf16.msra.mxu3 %v5993_v41  ;;  %v7637_v52 = vpop.f32.mrf.mxu0  ;;  %v6445_v41 = vld [vmem:[#allocation6 + $0xea0] sm:$0xf] }
 0x28c   :  { %v6446_v44 = vor.u32 %v7225_v42, %v6445_v41  ;;  %v6290_v41 = vor.u32 %v7183_v19, %v6287_v37  ;;  %v7231_v42 = vld [vmem:[#allocation6 + $0xee4] sm:$0xf] }
 0x28d   :  { %4020 = vmatpush.bf16.msrb.mxu1 %v6238_v54  ;;  %v6482_v45 = vor.u32 %v7231_v42, %v6479_v39  ;;  %v6271_v54 = vld [vmem:[#allocation6 + $0xd50] sm:$0xf0]  ;;  %v7207_v42 = vld [vmem:[#allocation6 + $0xe24] sm:$0xf] }
 0x28e   :  { %3202 = vmatmul.bf16.vlgmr.msra.gmra.mxu3 %v7627_v23  ;;  %v6142_v23 = vor.u32 %v7149_v61, %v6141_v48  ;;  %4028 = vmatpush.bf16.msrb.mxu2 %v6446_v44  ;;  %v7199_v48 = vld [vmem:[#allocation6 + $0xde4] sm:$0xf]  ;;  %v6351_v61 = vld [vmem:[#allocation6 + $0xdf0] sm:$0xf0]  ;;  %v7654_v44 = vunpack.c.l.bf16 %v5593_v30  ;;  %v6274_v55 = vor.u32 %v7179_v14, %v6271_v54  ;;  %v6493_v54 = vld [vmem:[#allocation6 + $0xf00] sm:$0xf] }
 0x28f   :  { %v6383_v39 = vld [vmem:[#allocation6 + $0xe30] sm:$0xf0] }
 0x290   :  { %4005 = vmatpush.bf16.msrb.mxu0 %v6142_v23  ;;  %v6413_v23 = vld [vmem:[#allocation6 + $0xe60] sm:$0xf] }
 0x291   :  { %v6414_v63 = vor.u32 %v7217_v62, %v6413_v23 }
 0x292   :  { %4029 = vmatpush.bf16.msrb.mxu2 %v6430_v59  ;;  %v2347_v59 = vperm.slane %v7654_v44, 0 }
 0x293   :  { %v3010_v38 = vpop.f32.mrf.mxu0 }
 0x294   :  { %4006 = vmatpush.bf16.msrb.mxu0 %v6126_v4  ;;  %v6354_v38 = vor.u32 %v7199_v48, %v6351_v61  ;;  %v6146_v4 = vor.u32 %v7147_v0, %v6143_v1  ;;  %v6466_v48 = vor.u32 %v7227_v47, %v6463_v56  ;;  %v6573_v61 = vld [vmem:[#allocation6 + $0xfa0] sm:$0xf]  ;;  %v6255_v0 = vld [vmem:[#allocation6 + $0xd30] sm:$0xf0]  ;;  %v7223_v1 = vld [vmem:[#allocation6 + $0xea4] sm:$0xf] }
 0x295   :  { %v2355_v5 = vperm.slane %v2347_v59, 0  ;;  %v7237_v47 = vld [vmem:[#allocation6 + $0xf0c] sm:$0xf0] }
 0x296   :  { %4065 = vmatpush.bf16.msra.mxu1 %v6354_v38  ;;  %4030 = vmatpush.bf16.msrb.mxu2 %v6414_v63  ;;  %v7257_v38 = vld [vmem:[#allocation6 + $0xfac] sm:$0xf0]  ;;  %v7175_v63 = vld [vmem:[#allocation6 + $0xd24] sm:$0xf]  ;;  %v6494_v59 = vor.u32 %v7237_v47, %v6493_v54  ;;  %v6133_v47 = vld [vmem:[#allocation6 + $0xc28] sm:$0xf] }
 0x297   :  { %v6574_v62 = vor.u32 %v7257_v38, %v6573_v61  ;;  %v6258_v2 = vor.u32 %v7175_v63, %v6255_v0  ;;  %v3009_v18 = vadd.f32 %v7637_v52, %v2355_v5  ;;  %v6367_v61 = vld [vmem:[#allocation6 + $0xe10] sm:$0xf0]  ;;  %v7263_v38 = vld [vmem:[#allocation6 + $0xfe4] sm:$0xf]  ;;  %v7166_v63 = vld [vmem:[#allocation6 + $0xcd4] sm:$0xf0] }
 0x298   :  { %4007 = vmatpush.bf16.msrb.mxu0 %v6110_v12 }
 0x29a   :  { %4066 = vmatpush.bf16.msra.mxu1 %v6338_v6  ;;  %4031 = vmatpush.bf16.msrb.mxu2 %v6398_v40  ;;  %v7171_v40 = vld [vmem:[#allocation6 + $0xd04] sm:$0xf] }
 0x29b   :  { %v7639_v8 = vpop.f32.mrf.mxu1  ;;  %v7641_v9 = vpop.f32.mrf.mxu0 }
 0x29c   :  { %4052 = vmatpush.bf16.msra.mxu0 %v6226_v15  ;;  %v3022_v24 = vadd.f32 %v7639_v8, %v3009_v18  ;;  %v2348_v8 = vperm.slane %v7654_v44, 2 }
 0x29e   :  { %4067 = vmatpush.bf16.msra.mxu1 %v6322_v3  ;;  %4032 = vmatpush.bf16.msrb.mxu2 %v6382_v22  ;;  %v7249_v22 = vld [vmem:[#allocation6 + $0xf6c] sm:$0xf0] }
 0x29f   :  { %v6542_v27 = vor.u32 %v7249_v22, %v6541_v21  ;;  %v7158_v21 = vld [vmem:[#allocation6 + $0xc94] sm:$0xf0]  ;;  %v7255_v22 = vld [vmem:[#allocation6 + $0xfa4] sm:$0xf] }
 0x2a0   :  { %4053 = vmatpush.bf16.msra.mxu0 %v6210_v57  ;;  %v7187_v57 = vld [vmem:[#allocation6 + $0xd84] sm:$0xf] }
 0x2a2   :  { %4033 = vmatpush.bf16.msrb.mxu2 %v6366_v10  ;;  %v6399_v10 = vld [vmem:[#allocation6 + $0xe50] sm:$0xf0] }
 0x2a3   :  { %v3023_v31 = vpop.f32.mrf.mxu1  ;;  %v3062_v33 = vpop.f32.mrf.mxu0 }
 0x2a4   :  { %4054 = vmatpush.bf16.msra.mxu0 %v6194_v32  ;;  %v6306_v33 = vor.u32 %v7187_v57, %v6303_v29  ;;  %v7265_v32 = vld [vmem:[#allocation6 + $0xfec] sm:$0xf0]  ;;  %v7215_v57 = vld [vmem:[#allocation6 + $0xe64] sm:$0xf] }
 0x2a5   :  { %v6606_v17 = vor.u32 %v7265_v32, %v6605_v11  ;;  %v7211_v11 = vld [vmem:[#allocation6 + $0xe44] sm:$0xf] }
 0x2a6   :  { %4068 = vmatpush.bf16.msra.mxu1 %v6306_v33  ;;  %4078 = vmatpush.bf16.msra.mxu2 %v6482_v45  ;;  %v6525_v33 = vld [vmem:[#allocation6 + $0xf40] sm:$0xf]  ;;  %v6402_v19 = vor.u32 %v7211_v11, %v6399_v10  ;;  %v6229_v45 = vld [vmem:[#allocation6 + $0xce8] sm:$0xf] }
 0x2a7   :  { %4039 = vmatpush.bf16.msrb.mxu3 %v6606_v17  ;;  %v6526_v34 = vor.u32 %v7245_v53, %v6525_v33  ;;  %v6509_v17 = vld [vmem:[#allocation6 + $0xf20] sm:$0xf]  ;;  %v7251_v33 = vld [vmem:[#allocation6 + $0xf84] sm:$0xf]  ;;  %v6559_v53 = vld [vmem:[#allocation6 + $0xf90] sm:$0xf0] }
 0x2a8   :  { %4055 = vmatpush.bf16.msra.mxu0 %v6178_v49  ;;  %v6589_v49 = vld [vmem:[#allocation6 + $0xfc0] sm:$0xf] }
 0x2a9   :  { %v6590_v51 = vor.u32 %v7261_v50, %v6589_v49  ;;  %v7170_v49 = vld [vmem:[#allocation6 + $0xcf4] sm:$0xf0]  ;;  %v6386_v50 = vor.u32 %v7207_v42, %v6383_v39  ;;  %v7247_v39 = vld [vmem:[#allocation6 + $0xf64] sm:$0xf] }
 0x2aa   :  { %4069 = vmatpush.bf16.msra.mxu1 %v6290_v41  ;;  %4079 = vmatpush.bf16.msra.mxu2 %v6466_v48  ;;  %v7241_v41 = vld [vmem:[#allocation6 + $0xf2c] sm:$0xf0]  ;;  %v6230_v56 = vor.u32 %v7170_v49, %v6229_v45  ;;  %v7203_v48 = vld [vmem:[#allocation6 + $0xe04] sm:$0xf]  ;;  %v7198_v42 = vld [vmem:[#allocation6 + $0xdd4] sm:$0xf0] }
 0x2ab   :  { %v7643_v58 = vpop.f32.mrf.mxu1  ;;  %4040 = vmatpush.bf16.msrb.mxu3 %v6590_v51  ;;  %v2356_v51 = vperm.slane %v2348_v8, 0  ;;  %v6370_v0 = vor.u32 %v7203_v48, %v6367_v61  ;;  %v6149_v8 = vld [vmem:[#allocation6 + $0xc48] sm:$0xf]  ;;  %v6543_v45 = vld [vmem:[#allocation6 + $0xf70] sm:$0xf0] }
 0x2ac   :  { %4056 = vmatpush.bf16.msra.mxu0 %v6162_v60  ;;  %v7243_v48 = vld [vmem:[#allocation6 + $0xf44] sm:$0xf]  ;;  %v6527_v61 = vld [vmem:[#allocation6 + $0xf50] sm:$0xf0] }
 0x2ad   :  { %v7645_v26 = vpop.f32.mrf.mxu0 }
 0x2ae   :  { %4070 = vmatpush.bf16.msra.mxu1 %v6274_v55 }
 0x2af   :  { %4041 = vmatpush.bf16.msrb.mxu3 %v6574_v62  ;;  %v6213_v62 = vld [vmem:[#allocation6 + $0xcc8] sm:$0xf] }
 0x2b0   :  { %4057 = vmatpush.bf16.msra.mxu0 %v6146_v4  ;;  %v6447_v4 = vld [vmem:[#allocation6 + $0xeb0] sm:$0xf0] }
 0x2b1   :  { %v7647_v36 = vpop.f32.mrf.mxu2  ;;  %v6450_v6 = vor.u32 %v7223_v1, %v6447_v4  ;;  %v6607_v1 = vld [vmem:[#allocation6 + $0xff0] sm:$0xf0] }
 0x2b2   :  { %4071 = vmatpush.bf16.msra.mxu1 %v6258_v2  ;;  %v3035_v30 = vadd.f32 %v7647_v36, %v3022_v24  ;;  %v6510_v36 = vor.u32 %v7241_v41, %v6509_v17  ;;  %v3061_v2 = vadd.f32 %v7641_v9, %v2356_v51  ;;  %v6610_v5 = vor.u32 %v7263_v38, %v6607_v1  ;;  %v7150_v17 = vld [vmem:[#allocation6 + $0xc54] sm:$0xf0]  ;;  %v6341_v41 = vld [vmem:[#allocation6 + $0xdc8] sm:$0xf] }
 0x2b3   :  { %v3075_v12 = vpop.f32.mrf.mxu1  ;;  %4080 = vmatpush.bf16.msra.mxu2 %v6450_v6  ;;  %v2349_v24 = vperm.slane %v7654_v44, 4  ;;  %v6342_v54 = vor.u32 %v7198_v42, %v6341_v41  ;;  %v6530_v38 = vor.u32 %v7243_v48, %v6527_v61  ;;  %v6261_v41 = vld [vmem:[#allocation6 + $0xd28] sm:$0xf]  ;;  %v7178_v42 = vld [vmem:[#allocation6 + $0xd34] sm:$0xf0] }
 0x2b4   :  { %4058 = vmatpush.bf16.msra.mxu0 %v6130_v16  ;;  %v6558_v12 = vor.u32 %v7253_v25, %v6557_v7  ;;  %v6431_v16 = vld [vmem:[#allocation6 + $0xe90] sm:$0xf0]  ;;  %v3074_v7 = vadd.f32 %v7643_v58, %v3061_v2  ;;  %v6214_v25 = vor.u32 %v7166_v63, %v6213_v62  ;;  %v6117_v2 = vld [vmem:[#allocation6 + $0xc08] sm:$0xf]  ;;  %v7222_v48 = vld [vmem:[#allocation6 + $0xe94] sm:$0xf0] }
 0x2b5   :  { %v3114_v15 = vpop.f32.mrf.mxu0  ;;  %v6434_v20 = vor.u32 %v7219_v46, %v6431_v16  ;;  %v6591_v46 = vld [vmem:[#allocation6 + $0xfd0] sm:$0xf0]  ;;  %v7152_v61 = vld [vmem:[#allocation6 + $0xc6c] sm:$0xf] }
 0x2b6   :  { %v6242_v15 = vor.u32 %v7171_v40, %v6239_v13  ;;  %4042 = vmatpush.bf16.msrb.mxu3 %v6558_v12  ;;  %v6197_v12 = vld [vmem:[#allocation6 + $0xca8] sm:$0xf]  ;;  %v7162_v40 = vld [vmem:[#allocation6 + $0xcb4] sm:$0xf0]  ;;  %v7259_v13 = vld [vmem:[#allocation6 + $0xfc4] sm:$0xf] }
 0x2b7   :  { %4081 = vmatpush.bf16.msra.mxu2 %v6434_v20  ;;  %v6594_v9 = vor.u32 %v7259_v13, %v6591_v46  ;;  %v6181_v20 = vld [vmem:[#allocation6 + $0xc88] sm:$0xf]  ;;  %v6575_v58 = vld [vmem:[#allocation6 + $0xfb0] sm:$0xf0]  ;;  %v6231_v13 = vld [vmem:[#allocation6 + $0xcf8] sm:$0xf0] }
 0x2b8   :  { %4059 = vmatpush.bf16.msra.mxu0 %v6114_v28  ;;  %4072 = vmatpush.bf16.msra.mxu1 %v6242_v15  ;;  %v6415_v28 = vld [vmem:[#allocation6 + $0xe70] sm:$0xf0] }
 0x2b9   :  { %v3036_v31 = vpop.f32.mrf.mxu2  ;;  %v6418_v29 = vor.u32 %v7215_v57, %v6415_v28  ;;  %v6578_v57 = vor.u32 %v7255_v22, %v6575_v58  ;;  %v6182_v28 = vor.u32 %v7158_v21, %v6181_v20  ;;  %v7235_v20 = vld [vmem:[#allocation6 + $0xf04] sm:$0xf]  ;;  %v6495_v21 = vld [vmem:[#allocation6 + $0xf10] sm:$0xf0]  ;;  %v7234_v22 = vld [vmem:[#allocation6 + $0xef4] sm:$0xf0] }
 0x2ba   :  { %4043 = vmatpush.bf16.msrb.mxu3 %v6542_v27  ;;  %v7164_v58 = vld [vmem:[#allocation6 + $0xccc] sm:$0xf] }
 0x2bb   :  { %v7652_v35 = vpop.f32.mrf.mxu1  ;;  %4082 = vmatpush.bf16.msra.mxu2 %v6418_v29  ;;  %v6165_v29 = vld [vmem:[#allocation6 + $0xc68] sm:$0xf] }
 0x2be   :  { %4044 = vmatpush.bf16.msrb.mxu3 %v6526_v34  ;;  %v6562_v34 = vor.u32 %v7251_v33, %v6559_v53  ;;  %v6277_v53 = vld [vmem:[#allocation6 + $0xd48] sm:$0xf] }
 0x2bf   :  { %4083 = vmatpush.bf16.msra.mxu2 %v6402_v19 }
 0x2c1   :  { %v7657_v60 = vpop.f32.mrf.mxu2 }
 0x2c2   :  { %4045 = vmatpush.bf16.msrb.mxu3 %v6510_v36  ;;  %v3087_v15 = vadd.f32 %v7657_v60, %v3074_v7  ;;  %v6357_v60 = vld [vmem:[#allocation6 + $0xde8] sm:$0xf]  ;;  %v7190_v7 = vld [vmem:[#allocation6 + $0xd94] sm:$0xf0] }
 0x2c3   :  { %v3127_v23 = vpop.f32.mrf.mxu1  ;;  %4084 = vmatpush.bf16.msra.mxu2 %v6386_v50  ;;  %v6546_v50 = vor.u32 %v7247_v39, %v6543_v45  ;;  %v6453_v39 = vld [vmem:[#allocation6 + $0xea8] sm:$0xf]  ;;  %v7226_v45 = vld [vmem:[#allocation6 + $0xeb4] sm:$0xf0] }
 0x2c6   :  { %4046 = vmatpush.bf16.msrb.mxu3 %v6494_v59  ;;  %v7194_v59 = vld [vmem:[#allocation6 + $0xdb4] sm:$0xf0] }
 0x2c7   :  { %4085 = vmatpush.bf16.msra.mxu2 %v6370_v0 }
 0x2c9   :  { %v3088_v3 = vpop.f32.mrf.mxu2 }
 0x2ca   :  { %4091 = vmatpush.bf16.msra.mxu3 %v6610_v5  ;;  %v6198_v3 = vor.u32 %v7162_v40, %v6197_v12  ;;  %v7142_v5 = vld [vmem:[#allocation6 + $0xc14] sm:$0xf0]  ;;  %v6511_v12 = vld [vmem:[#allocation6 + $0xf30] sm:$0xf0]  ;;  %v7168_v40 = vld [vmem:[#allocation6 + $0xcec] sm:$0xf] }
 0x2cb   :  { %v7659_v43 = vpop.f32.mrf.mxu0  ;;  %v6118_v46 = vor.u32 %v7142_v5, %v6117_v2  ;;  %v6421_v2 = vld [vmem:[#allocation6 + $0xe68] sm:$0xf] }
 0x2ce   :  { %4092 = vmatpush.bf16.msra.mxu3 %v6594_v9  ;;  %v6293_v9 = vld [vmem:[#allocation6 + $0xd68] sm:$0xf] }
 0x2d1   :  { %v3047_v31 = vpop.f32.mrf.mxu3 }
 0x2d2   :  { %v3048_v52 = vadd.f32 %v3047_v31, %v3035_v30  ;;  %v7154_v30 = vld [vmem:[#allocation6 + $0xc74] sm:$0xf0]  ;;  %4093 = vmatpush.bf16.msra.mxu3 %v6578_v57 }
 0x2d3   :  { %v3166_v32 = vpop.f32.mrf.mxu0  ;;  %v7202_v31 = vld [vmem:[#allocation6 + $0xdf4] sm:$0xf0] }
 0x2d4   :  { %7331 = vtanh.f32 %v3048_v52  ;;  %v7665_v37 = vpop.f32.mrf.mxu2  ;;  %v2357_v52 = vperm.slane %v2349_v24, 0  ;;  %v6166_v32 = vor.u32 %v7154_v30, %v6165_v29  ;;  %v6358_v19 = vor.u32 %v7202_v31, %v6357_v60  ;;  %v6215_v24 = vld [vmem:[#allocation6 + $0xcd8] sm:$0xf0] }
 0x2d5   :  { %v6218_v33 = vor.u32 %v7164_v58, %v6215_v24 }
 0x2d6   :  { %4094 = vmatpush.bf16.msra.mxu3 %v6562_v34  ;;  %v3113_v49 = vadd.f32 %v7645_v26, %v2357_v52  ;;  %v7182_v52 = vld [vmem:[#allocation6 + $0xd54] sm:$0xf0]  ;;  %v6469_v34 = vld [vmem:[#allocation6 + $0xec8] sm:$0xf] }
 0x2d8   :  { %v3126_v51 = vadd.f32 %v7652_v35, %v3113_v49  ;;  %v7156_v49 = vld [vmem:[#allocation6 + $0xc8c] sm:$0xf] }
 0x2d9   :  { %v3049_v14 = vpop.f32.mrf.mxu3 }
 0x2da   :  { %v7332_v55 = vpop.eup %7331  ;;  %v6150_v14 = vor.u32 %v7150_v17, %v6149_v8  ;;  %4095 = vmatpush.bf16.msra.mxu3 %v6546_v50  ;;  %v3139_v26 = vadd.f32 %v7665_v37, %v3126_v51  ;;  %v6183_v50 = vld [vmem:[#allocation6 + $0xc98] sm:$0xf0]  ;;  %v2350_v51 = vperm.slane %v7654_v44, 6 }
 0x2db   :  { %v7667_v23 = vpack.c.bf16 %v7332_v55, %v7332_v55  ;;  %v7670_v4 = vpop.f32.mrf.mxu1  ;;  %v7146_v55 = vld [vmem:[#allocation6 + $0xc34] sm:$0xf0] }
 0x2dc   :  { %v3140_v6 = vpop.f32.mrf.mxu2  ;;  %v6134_v35 = vor.u32 %v7146_v55, %v6133_v47  ;;  %v6186_v47 = vor.u32 %v7156_v49, %v6183_v50  ;;  %v6245_v55 = vld [vmem:[#allocation6 + $0xd08] sm:$0xf] }
 0x2dd   :  { %4008 = vmatmul.bf16.vlgmr.msrb.gmra.mxu0 %v7667_v23  ;;  %v6309_v6 = vld [vmem:[#allocation6 + $0xd88] sm:$0xf] }
 0x2de   :  { %4104 = vmatpush.bf16.msrb.mxu0 %v6230_v56  ;;  %v6325_v56 = vld [vmem:[#allocation6 + $0xda8] sm:$0xf]  ;;  %4096 = vmatpush.bf16.msra.mxu3 %v6530_v38  ;;  %v2358_v38 = vperm.slane %v2350_v51, 0 }
 0x2df   :  { %v6326_v1 = vor.u32 %v7194_v59, %v6325_v56  ;;  %v7174_v56 = vld [vmem:[#allocation6 + $0xd14] sm:$0xf0]  ;;  %v6437_v59 = vld [vmem:[#allocation6 + $0xe88] sm:$0xf] }
 0x2e0   :  { %v6438_v44 = vor.u32 %v7222_v48, %v6437_v59  ;;  %v6279_v59 = vld [vmem:[#allocation6 + $0xd58] sm:$0xf0]  ;;  %v7228_v48 = vld [vmem:[#allocation6 + $0xecc] sm:$0xf] }
 0x2e1   :  { %v3099_v16 = vpop.f32.mrf.mxu3 }
 0x2e2   :  { %v3100_v18 = vadd.f32 %v3099_v16, %v3087_v15  ;;  %4105 = vmatpush.bf16.msrb.mxu0 %v6214_v25  ;;  %v7239_v25 = vld [vmem:[#allocation6 + $0xf24] sm:$0xf]  ;;  %v6310_v15 = vor.u32 %v7190_v7, %v6309_v6  ;;  %v7186_v16 = vld [vmem:[#allocation6 + $0xd74] sm:$0xf0]  ;;  %v7148_v7 = vld [vmem:[#allocation6 + $0xc4c] sm:$0xf] }
 0x2e3   :  { %v3179_v27 = vpop.f32.mrf.mxu1  ;;  %v6514_v37 = vor.u32 %v7239_v25, %v6511_v12  ;;  %v6294_v30 = vor.u32 %v7186_v16, %v6293_v9  ;;  %v7218_v6 = vld [vmem:[#allocation6 + $0xe74] sm:$0xf0]  ;;  %v6151_v25 = vld [vmem:[#allocation6 + $0xc58] sm:$0xf0]  ;;  %v3165_v12 = vadd.f32 %v7659_v43, %v2358_v38  ;;  %v6405_v9 = vld [vmem:[#allocation6 + $0xe48] sm:$0xf] }
 0x2e4   :  { %7333 = vtanh.f32 %v3100_v18  ;;  %v6234_v18 = vor.u32 %v7168_v40, %v6231_v13  ;;  %v6498_v27 = vor.u32 %v7235_v20, %v6495_v21  ;;  %v7196_v40 = vld [vmem:[#allocation6 + $0xdcc] sm:$0xf]  ;;  %v6343_v13 = vld [vmem:[#allocation6 + $0xdd8] sm:$0xf0] }
 0x2e5   :  { %4097 = vmatpush.bf16.msra.mxu3 %v6514_v37  ;;  %v3178_v37 = vadd.f32 %v7670_v4, %v3165_v12  ;;  %v6346_v16 = vor.u32 %v7196_v40, %v6343_v13  ;;  %v6135_v20 = vld [vmem:[#allocation6 + $0xc38] sm:$0xf0]  ;;  %v7192_v43 = vld [vmem:[#allocation6 + $0xdac] sm:$0xf]  ;;  %v7254_v12 = vld [vmem:[#allocation6 + $0xf94] sm:$0xf0] }
 0x2e6   :  { %4106 = vmatpush.bf16.msrb.mxu0 %v6198_v3  ;;  %v6485_v3 = vld [vmem:[#allocation6 + $0xee8] sm:$0xf]  ;;  %v7172_v40 = vld [vmem:[#allocation6 + $0xd0c] sm:$0xf]  ;;  %v6247_v13 = vld [vmem:[#allocation6 + $0xd18] sm:$0xf0] }
 0x2e7   :  { %v6486_v31 = vor.u32 %v7234_v22, %v6485_v3  ;;  %v7144_v3 = vld [vmem:[#allocation6 + $0xc2c] sm:$0xf]  ;;  %v6327_v22 = vld [vmem:[#allocation6 + $0xdb8] sm:$0xf0] }
 0x2e9   :  { %v3101_v11 = vpop.f32.mrf.mxu3  ;;  %4098 = vmatpush.bf16.msra.mxu3 %v6498_v27  ;;  %v6138_v27 = vor.u32 %v7144_v3, %v6135_v20  ;;  %v7250_v3 = vld [vmem:[#allocation6 + $0xf74] sm:$0xf0]  ;;  %v7216_v20 = vld [vmem:[#allocation6 + $0xe6c] sm:$0xf] }
 0x2ea   :  { %v7334_v10 = vpop.eup %7333  ;;  %4107 = vmatpush.bf16.msrb.mxu0 %v6182_v28  ;;  %v7230_v11 = vld [vmem:[#allocation6 + $0xed4] sm:$0xf0] }
 0x2eb   :  { %v7676_v36 = vpack.c.bf16 %v7334_v10, %v7334_v10  ;;  %v7160_v10 = vld [vmem:[#allocation6 + $0xcac] sm:$0xf]  ;;  %v6470_v8 = vor.u32 %v7230_v11, %v6469_v34  ;;  %v6373_v34 = vld [vmem:[#allocation6 + $0xe08] sm:$0xf]  ;;  %v7206_v11 = vld [vmem:[#allocation6 + $0xe14] sm:$0xf0] }
 0x2ec   :  { %v6374_v49 = vor.u32 %v7206_v11, %v6373_v34  ;;  %v7238_v34 = vld [vmem:[#allocation6 + $0xf14] sm:$0xf0]  ;;  %v7204_v11 = vld [vmem:[#allocation6 + $0xe0c] sm:$0xf] }
 0x2ed   :  { %4021 = vmatmul.bf16.vlgmr.msrb.gmra.mxu1 %v7676_v36  ;;  %4060 = vmatmul.bf16.vlgmr.msra.gmra.mxu0 %v7667_v23 }
 0x2ee   :  { %4108 = vmatpush.bf16.msrb.mxu0 %v6166_v32  ;;  %4117 = vmatpush.bf16.msrb.mxu1 %v6358_v19  ;;  %v6199_v32 = vld [vmem:[#allocation6 + $0xcb8] sm:$0xf0]  ;;  %v6278_v19 = vor.u32 %v7182_v52, %v6277_v53 }
 0x2ef   :  { %v6202_v17 = vor.u32 %v7160_v10, %v6199_v32  ;;  %v6613_v32 = vld [vmem:[#allocation6 + $0xfe8] sm:$0xf] }
 0x2f1   :  { %v3151_v62 = vpop.f32.mrf.mxu3 }
 0x2f2   :  { %v3152_v63 = vadd.f32 %v3151_v62, %v3139_v26  ;;  %v7683_v0 = vpop.f32.mrf.mxu2  ;;  %4109 = vmatpush.bf16.msrb.mxu0 %v6150_v14  ;;  %4118 = vmatpush.bf16.msrb.mxu1 %v6342_v54  ;;  %v6262_v14 = vor.u32 %v7178_v42, %v6261_v41  ;;  %v6454_v54 = vor.u32 %v7226_v45, %v6453_v39  ;;  %v6167_v26 = vld [vmem:[#allocation6 + $0xc78] sm:$0xf0]  ;;  %v7200_v62 = vld [vmem:[#allocation6 + $0xdec] sm:$0xf] }
 0x2f3   :  { %v3191_v21 = vadd.f32 %v7683_v0, %v3178_v37  ;;  %v7188_v0 = vld [vmem:[#allocation6 + $0xd8c] sm:$0xf]  ;;  %v6487_v42 = vld [vmem:[#allocation6 + $0xef8] sm:$0xf0] }
 0x2f4   :  { %7335 = vtanh.f32 %v3152_v63  ;;  %v6359_v63 = vld [vmem:[#allocation6 + $0xdf8] sm:$0xf0]  ;;  %v7232_v41 = vld [vmem:[#allocation6 + $0xeec] sm:$0xf] }
 0x2f5   :  { %v6362_v5 = vor.u32 %v7200_v62, %v6359_v63  ;;  %v6581_v63 = vld [vmem:[#allocation6 + $0xfa8] sm:$0xf]  ;;  %v7220_v37 = vld [vmem:[#allocation6 + $0xe8c] sm:$0xf] }
 0x2f6   :  { %4110 = vmatpush.bf16.msrb.mxu0 %v6134_v35  ;;  %4119 = vmatpush.bf16.msrb.mxu1 %v6326_v1  ;;  %v6246_v35 = vor.u32 %v7174_v56, %v6245_v55  ;;  %v6170_v1 = vor.u32 %v7152_v61, %v6167_v26  ;;  %v7262_v55 = vld [vmem:[#allocation6 + $0xfd4] sm:$0xf0]  ;;  %v7180_v56 = vld [vmem:[#allocation6 + $0xd4c] sm:$0xf]  ;;  %v6471_v61 = vld [vmem:[#allocation6 + $0xed8] sm:$0xf0] }
 0x2f7   :  { %v6282_v38 = vor.u32 %v7180_v56, %v6279_v59  ;;  %v6474_v62 = vor.u32 %v7228_v48, %v6471_v61  ;;  %v6551_v56 = vld [vmem:[#allocation6 + $0xf78] sm:$0xf0]  ;;  %v7244_v48 = vld [vmem:[#allocation6 + $0xf4c] sm:$0xf] }
 0x2f8   :  { %v6535_v61 = vld [vmem:[#allocation6 + $0xf58] sm:$0xf0] }
 0x2f9   :  { %v3153_v57 = vpop.f32.mrf.mxu3 }
 0x2fa   :  { %v7336_v28 = vpop.eup %7335  ;;  %v3192_v29 = vpop.f32.mrf.mxu2  ;;  %4111 = vmatpush.bf16.msrb.mxu0 %v6118_v46  ;;  %4120 = vmatpush.bf16.msrb.mxu1 %v6310_v15  ;;  %v6422_v46 = vor.u32 %v7218_v6, %v6421_v2  ;;  %v6154_v15 = vor.u32 %v7148_v7, %v6151_v25  ;;  %v6389_v57 = vld [vmem:[#allocation6 + $0xe28] sm:$0xf]  ;;  %v7224_v2 = vld [vmem:[#allocation6 + $0xeac] sm:$0xf] }
 0x2fb   :  { %v7685_v60 = vpack.c.bf16 %v7336_v28, %v7336_v28  ;;  %v6330_v28 = vor.u32 %v7192_v43, %v6327_v22  ;;  %v7210_v29 = vld [vmem:[#allocation6 + $0xe34] sm:$0xf0]  ;;  %v6565_v25 = vld [vmem:[#allocation6 + $0xf88] sm:$0xf] }
 0x2fc   :  { %v6390_v53 = vor.u32 %v7210_v29, %v6389_v57  ;;  %v6517_v29 = vld [vmem:[#allocation6 + $0xf28] sm:$0xf] }
 0x2fd   :  { %4034 = vmatmul.bf16.vlgmr.msrb.gmra.mxu2 %v7685_v60  ;;  %4073 = vmatmul.bf16.vlgmr.msra.gmra.mxu1 %v7676_v36 }
 0x2fe   :  { %4156 = vmatpush.bf16.msra.mxu0 %v6234_v18  ;;  %4121 = vmatpush.bf16.msrb.mxu1 %v6294_v30  ;;  %v7214_v18 = vld [vmem:[#allocation6 + $0xe54] sm:$0xf0]  ;;  %v7140_v30 = vld [vmem:[#allocation6 + $0xc0c] sm:$0xf] }
 0x2ff   :  { %4112 = vmatmul.bf16.vlgmr.msrb.gmra.mxu0 %v7667_v23  ;;  %4130 = vmatpush.bf16.msrb.mxu2 %v6486_v31  ;;  %v6406_v24 = vor.u32 %v7214_v18, %v6405_v9  ;;  %v6119_v31 = vld [vmem:[#allocation6 + $0xc18] sm:$0xf0]  ;;  %v6250_v9 = vor.u32 %v7172_v40, %v6247_v13  ;;  %v6549_v18 = vld [vmem:[#allocation6 + $0xf68] sm:$0xf]  ;;  %v7271_v13 = vld [vmem:[#allocation7 + $0x20] sm:$0xff] }
 0x300   :  { %v6122_v52 = vor.u32 %v7140_v30, %v6119_v31  ;;  %v6550_v43 = vor.u32 %v7250_v3, %v6549_v18  ;;  %v7242_v30 = vld [vmem:[#allocation6 + $0xf34] sm:$0xf0]  ;;  %v7208_v31 = vld [vmem:[#allocation6 + $0xe2c] sm:$0xf] }
 0x301   :  { %v7268_v3 = vld [vmem:[#allocation7 + $0x8] sm:$0xff] }
 0x302   :  { %4157 = vmatpush.bf16.msra.mxu0 %v6218_v33  ;;  %4122 = vmatpush.bf16.msrb.mxu1 %v6278_v19  ;;  %v6311_v33 = vld [vmem:[#allocation6 + $0xd98] sm:$0xf0]  ;;  %v7266_v19 = vld [vmem:[#allocation6 + $0xff4] sm:$0xf0] }
 0x303   :  { %4131 = vmatpush.bf16.msrb.mxu2 %v6470_v8  ;;  %v6314_v10 = vor.u32 %v7188_v0, %v6311_v33  ;;  %v7184_v8 = vld [vmem:[#allocation6 + $0xd6c] sm:$0xf]  ;;  %v6614_v50 = vor.u32 %v7266_v19, %v6613_v32  ;;  %v6391_v0 = vld [vmem:[#allocation6 + $0xe38] sm:$0xf0]  ;;  %v6518_v33 = vor.u32 %v7242_v30, %v6517_v29  ;;  %v7277_v30 = vld [vmem:[#allocation7 + $0x50] sm:$0xff] }
 0x304   :  { %v7264_v32 = vld [vmem:[#allocation6 + $0xfec] sm:$0xf]  ;;  %v6615_v19 = vld [vmem:[#allocation6 + $0xff8] sm:$0xf0] }
 0x306   :  { %4158 = vmatpush.bf16.msra.mxu0 %v6202_v17  ;;  %4123 = vmatpush.bf16.msrb.mxu1 %v6262_v14  ;;  %v6295_v17 = vld [vmem:[#allocation6 + $0xd78] sm:$0xf0] }
 0x307   :  { %4132 = vmatpush.bf16.msrb.mxu2 %v6454_v54  ;;  %v6298_v14 = vor.u32 %v7184_v8, %v6295_v17  ;;  %v6490_v54 = vor.u32 %v7232_v41, %v6487_v42  ;;  %v6618_v17 = vor.u32 %v7264_v32, %v6615_v19  ;;  %v7260_v41 = vld [vmem:[#allocation6 + $0xfcc] sm:$0xf]  ;;  %v6599_v42 = vld [vmem:[#allocation6 + $0xfd8] sm:$0xf0]  ;;  %v7287_v32 = vld [vmem:[#allocation7 + $0xa0] sm:$0xff] }
 0x30a   :  { %4159 = vmatpush.bf16.msra.mxu0 %v6186_v47  ;;  %4124 = vmatpush.bf16.msrb.mxu1 %v6246_v35  ;;  %v6597_v47 = vld [vmem:[#allocation6 + $0xfc8] sm:$0xf]  ;;  %v7258_v35 = vld [vmem:[#allocation6 + $0xfb4] sm:$0xf0] }
 0x30b   :  { %4133 = vmatpush.bf16.msrb.mxu2 %v6438_v44  ;;  %v6598_v26 = vor.u32 %v7262_v55, %v6597_v47  ;;  %v7176_v44 = vld [vmem:[#allocation6 + $0xd2c] sm:$0xf]  ;;  %v6582_v6 = vor.u32 %v7258_v35, %v6581_v63 }
 0x30c   :  { %v7248_v55 = vld [vmem:[#allocation6 + $0xf6c] sm:$0xf] }
 0x30d   :  { %4086 = vmatmul.bf16.vlgmr.msra.gmra.mxu2 %v7685_v60  ;;  %4125 = vmatmul.bf16.vlgmr.msrb.gmra.mxu1 %v7676_v36  ;;  %v6554_v59 = vor.u32 %v7248_v55, %v6551_v56  ;;  %v7236_v35 = vld [vmem:[#allocation6 + $0xf0c] sm:$0xf] }
 0x30e   :  { %4160 = vmatpush.bf16.msra.mxu0 %v6170_v1  ;;  %4169 = vmatpush.bf16.msra.mxu1 %v6362_v5  ;;  %v6263_v1 = vld [vmem:[#allocation6 + $0xd38] sm:$0xf0] }
 0x30f   :  { %4134 = vmatpush.bf16.msrb.mxu2 %v6422_v46  ;;  %v6455_v5 = vld [vmem:[#allocation6 + $0xeb8] sm:$0xf0] }
 0x310   :  { %v6458_v7 = vor.u32 %v7224_v2, %v6455_v5  ;;  %v6439_v46 = vld [vmem:[#allocation6 + $0xe98] sm:$0xf0] }
 0x311   :  { %v3203_v58 = vpop.f32.mrf.mxu3  ;;  %v7274_v5 = vld [vmem:[#allocation7 + $0x38] sm:$0xff] }
 0x312   :  { %v3204_v4 = vadd.f32 %v3203_v58, %v3191_v21  ;;  %4161 = vmatpush.bf16.msra.mxu0 %v6154_v15  ;;  %4170 = vmatpush.bf16.msra.mxu1 %v6346_v16  ;;  %v6566_v15 = vor.u32 %v7254_v12, %v6565_v25  ;;  %v6442_v16 = vor.u32 %v7220_v37, %v6439_v46  ;;  %v6423_v21 = vld [vmem:[#allocation6 + $0xe78] sm:$0xf0]  ;;  %v6533_v58 = vld [vmem:[#allocation6 + $0xf48] sm:$0xf] }
 0x313   :  { %4135 = vmatpush.bf16.msrb.mxu2 %v6406_v24  ;;  %v6426_v22 = vor.u32 %v7216_v20, %v6423_v21  ;;  %v7212_v24 = vld [vmem:[#allocation6 + $0xe4c] sm:$0xf]  ;;  %v7270_v37 = vld [vmem:[#allocation7 + $0x18] sm:$0xff] }
 0x314   :  { %7337 = vtanh.f32 %v3204_v4  ;;  %v7246_v4 = vld [vmem:[#allocation6 + $0xf54] sm:$0xf0]  ;;  %v7272_v25 = vld [vmem:[#allocation7 + $0x28] sm:$0xff] }
 0x315   :  { %v6534_v57 = vor.u32 %v7246_v4, %v6533_v58  ;;  %v7282_v46 = vld [vmem:[#allocation7 + $0x78] sm:$0xff]  ;;  %v7280_v20 = vld [vmem:[#allocation7 + $0x68] sm:$0xff]  ;;  %v7279_v58 = vld [vmem:[#allocation7 + $0x60] sm:$0xff] }
 0x316   :  { %4162 = vmatpush.bf16.msra.mxu0 %v6138_v27  ;;  %4171 = vmatpush.bf16.msra.mxu1 %v6330_v28  ;;  %v6407_v27 = vld [vmem:[#allocation6 + $0xe58] sm:$0xf0] }
 0x317   :  { %4136 = vmatpush.bf16.msrb.mxu2 %v6390_v53  ;;  %v6410_v28 = vor.u32 %v7212_v24, %v6407_v27  ;;  %v6394_v53 = vor.u32 %v7208_v31, %v6391_v0  ;;  %v6106_v24 = vld [vmem:[%s7737_s4 + $0xc] sm:$0xf]  ;;  %v7278_v27 = vld [vmem:[#allocation7 + $0x58] sm:$0xff]  ;;  %v7289_v31 = vld [vmem:[#allocation7 + $0xb0] sm:$0xff] }
 0x318   :  { %v7717_v29 = vunpack.c.l.bf16 %v6106_v24 }
 0x319   :  { %v3205_v39 = vpop.f32.mrf.mxu3 }
 0x31a   :  { %v7338_v45 = vpop.eup %7337  ;;  %4163 = vmatpush.bf16.msra.mxu0 %v6122_v52  ;;  %4172 = vmatpush.bf16.msra.mxu1 %v6314_v10  ;;  %v6501_v52 = vld [vmem:[#allocation6 + $0xf08] sm:$0xf]  ;;  %v6375_v10 = vld [vmem:[#allocation6 + $0xe18] sm:$0xf0]  ;;  %v6602_v39 = vor.u32 %v7260_v41, %v6599_v42  ;;  %v3348_v0 = vperm.slane %v7717_v29, 0 }
 0x31b   :  { %v7696_v51 = vpack.c.bf16 %v7338_v45, %v7338_v45  ;;  %4137 = vmatpush.bf16.msrb.mxu2 %v6374_v49  ;;  %v6502_v8 = vor.u32 %v7238_v34, %v6501_v52  ;;  %v7256_v45 = vld [vmem:[#allocation6 + $0xfac] sm:$0xf]  ;;  %v6583_v49 = vld [vmem:[#allocation6 + $0xfb8] sm:$0xf0] }
 0x31c   :  { %v7288_v52 = vld [vmem:[#allocation7 + $0xa8] sm:$0xff] }
 0x31d   :  { %4047 = vmatmul.bf16.vlgmr.msrb.gmra.mxu3 %v7696_v51  ;;  %4164 = vmatmul.bf16.vlgmr.msra.gmra.mxu0 %v7667_v23  ;;  %v6266_v23 = vor.u32 %v7176_v44, %v6263_v1 }
 0x31e   :  { %4143 = vmatpush.bf16.msrb.mxu3 %v6614_v50  ;;  %4173 = vmatpush.bf16.msra.mxu1 %v6298_v14  ;;  %v6586_v50 = vor.u32 %v7256_v45, %v6583_v49  ;;  %v7252_v14 = vld [vmem:[#allocation6 + $0xf8c] sm:$0xf]  ;;  %v7285_v45 = vld [vmem:[#allocation7 + $0x90] sm:$0xff] }
 0x31f   :  { %4182 = vmatpush.bf16.msra.mxu2 %v6490_v54  ;;  %v6567_v54 = vld [vmem:[#allocation6 + $0xf98] sm:$0xf0]  ;;  %4472 = vmatpush.bf16.msrb.mxu0 %v7274_v5 }
 0x320   :  { %4138 = vmatmul.bf16.vlgmr.msrb.gmra.mxu2 %v7685_v60  ;;  %v6570_v47 = vor.u32 %v7252_v14, %v6567_v54  ;;  %v3349_v14 = vperm.slane %v7717_v29, 2 }
 0x322   :  { %4144 = vmatpush.bf16.msrb.mxu3 %v6598_v26  ;;  %4174 = vmatpush.bf16.msra.mxu1 %v6282_v38  ;;  %v6538_v26 = vor.u32 %v7244_v48, %v6535_v61  ;;  %v7240_v38 = vld [vmem:[#allocation6 + $0xf2c] sm:$0xf]  ;;  %v3357_v55 = vperm.slane %v3349_v14, 0  ;;  %v7298_v48 = vld [vmem:[#allocation7 + $0xf8] sm:$0xff] }
 0x323   :  { %4183 = vmatpush.bf16.msra.mxu2 %v6474_v62  ;;  %v6519_v62 = vld [vmem:[#allocation6 + $0xf38] sm:$0xf0] }
 0x324   :  { %v6522_v63 = vor.u32 %v7240_v38, %v6519_v62 }
 0x326   :  { %4145 = vmatpush.bf16.msrb.mxu3 %v6582_v6  ;;  %4175 = vmatpush.bf16.msra.mxu1 %v6266_v23 }
 0x327   :  { %4184 = vmatpush.bf16.msra.mxu2 %v6458_v7  ;;  %v7273_v7 = vld [vmem:[#allocation7 + $0x30] sm:$0xff] }
 0x328   :  { %4473 = vmatpush.bf16.msrb.mxu0 %v7273_v7  ;;  %v3350_v7 = vperm.slane %v7717_v29, 4 }
 0x32a   :  { %4146 = vmatpush.bf16.msrb.mxu3 %v6566_v15  ;;  %4176 = vmatpush.bf16.msra.mxu1 %v6250_v9  ;;  %v7269_v9 = vld [vmem:[#allocation7 + $0x10] sm:$0xff] }
 0x32b   :  { %4185 = vmatpush.bf16.msra.mxu2 %v6442_v16  ;;  %v7281_v16 = vld [vmem:[#allocation7 + $0x70] sm:$0xff] }
 0x32c   :  { %4474 = vmatpush.bf16.msrb.mxu0 %v7272_v25 }
 0x32d   :  { %4099 = vmatmul.bf16.vlgmr.msra.gmra.mxu3 %v7696_v51  ;;  %4177 = vmatmul.bf16.vlgmr.msra.gmra.mxu1 %v7676_v36  ;;  %v6378_v36 = vor.u32 %v7204_v11, %v6375_v10  ;;  %v3356_v11 = vperm.slane %v3348_v0, 0  ;;  %v7275_v10 = vld [vmem:[#allocation7 + $0x40] sm:$0xff] }
 0x32e   :  { %4147 = vmatpush.bf16.msrb.mxu3 %v6550_v43  ;;  %4485 = vmatpush.bf16.msrb.mxu1 %v7282_v46 }
 0x32f   :  { %4186 = vmatpush.bf16.msra.mxu2 %v6426_v22  ;;  %v7267_v22 = vld [vmem:[#allocation7] sm:$0xff] }
 0x330   :  { %4475 = vmatpush.bf16.msrb.mxu0 %v7271_v13 }
 0x332   :  { %4148 = vmatpush.bf16.msrb.mxu3 %v6534_v57  ;;  %4486 = vmatpush.bf16.msrb.mxu1 %v7281_v16  ;;  %v7290_v57 = vld [vmem:[#allocation7 + $0xb8] sm:$0xff] }
 0x333   :  { %4187 = vmatpush.bf16.msra.mxu2 %v6410_v28 }
 0x334   :  { %4476 = vmatpush.bf16.msrb.mxu0 %v7270_v37 }
 0x336   :  { %4149 = vmatpush.bf16.msrb.mxu3 %v6518_v33  ;;  %4487 = vmatpush.bf16.msrb.mxu1 %v7280_v20 }
 0x337   :  { %4188 = vmatpush.bf16.msra.mxu2 %v6394_v53  ;;  %v7276_v53 = vld [vmem:[#allocation7 + $0x48] sm:$0xff] }
 0x338   :  { %4477 = vmatpush.bf16.msrb.mxu0 %v7269_v9 }
 0x33a   :  { %4150 = vmatpush.bf16.msrb.mxu3 %v6502_v8  ;;  %4488 = vmatpush.bf16.msrb.mxu1 %v7279_v58 }
 0x33b   :  { %4189 = vmatpush.bf16.msra.mxu2 %v6378_v36 }
 0x33c   :  { %4478 = vmatpush.bf16.msrb.mxu0 %v7268_v3  ;;  %v7292_v3 = vld [vmem:[#allocation7 + $0xc8] sm:$0xff] }
 0x33d   :  { %4151 = vmatmul.bf16.vlgmr.msrb.gmra.mxu3 %v7696_v51 }
 0x33e   :  { %4195 = vmatpush.bf16.msra.mxu3 %v6618_v17  ;;  %4190 = vmatmul.bf16.vlgmr.msra.gmra.mxu2 %v7685_v60  ;;  %v6503_v60 = vld [vmem:[#allocation6 + $0xf18] sm:$0xf0] }
 0x33f   :  { %v6506_v44 = vor.u32 %v7236_v35, %v6503_v60  ;;  %4489 = vmatpush.bf16.msrb.mxu1 %v7278_v27  ;;  %4498 = vmatpush.bf16.msrb.mxu2 %v7290_v57  ;;  %v7286_v17 = vld [vmem:[#allocation7 + $0x98] sm:$0xff]  ;;  %v7297_v35 = vld [vmem:[#allocation7 + $0xf0] sm:$0xff] }
 0x340   :  { %4479 = vmatpush.bf16.msrb.mxu0 %v7267_v22 }
 0x342   :  { %4196 = vmatpush.bf16.msra.mxu3 %v6602_v39 }
 0x343   :  { %4490 = vmatpush.bf16.msrb.mxu1 %v7277_v30  ;;  %4499 = vmatpush.bf16.msrb.mxu2 %v7289_v31 }
 0x346   :  { %4197 = vmatpush.bf16.msra.mxu3 %v6586_v50 }
 0x347   :  { %4491 = vmatpush.bf16.msrb.mxu1 %v7276_v53  ;;  %4500 = vmatpush.bf16.msrb.mxu2 %v7288_v52 }
 0x34a   :  { %4198 = vmatpush.bf16.msra.mxu3 %v6570_v47  ;;  %v7284_v47 = vld [vmem:[#allocation7 + $0x88] sm:$0xff] }
 0x34b   :  { %4492 = vmatpush.bf16.msrb.mxu1 %v7275_v10  ;;  %4501 = vmatpush.bf16.msrb.mxu2 %v7287_v32 }
 0x34e   :  { %4199 = vmatpush.bf16.msra.mxu3 %v6554_v59  ;;  %v7283_v59 = vld [vmem:[#allocation7 + $0x80] sm:$0xff] }
 0x34f   :  { %4502 = vmatpush.bf16.msrb.mxu2 %v7286_v17 }
 0x352   :  { %4200 = vmatpush.bf16.msra.mxu3 %v6538_v26 }
 0x353   :  { %4503 = vmatpush.bf16.msrb.mxu2 %v7285_v45 }
 0x356   :  { %4201 = vmatpush.bf16.msra.mxu3 %v6522_v63 }
 0x357   :  { %4504 = vmatpush.bf16.msrb.mxu2 %v7284_v47 }
 0x35a   :  { %4202 = vmatpush.bf16.msra.mxu3 %v6506_v44  ;;  %v4009_v1 = vpop.f32.mrf.mxu0  ;;  %v7296_v44 = vld [vmem:[#allocation7 + $0xe8] sm:$0xff] }
 0x35b   :  { %v4010_v8 = vadd.f32 %v4009_v1, %v3356_v11  ;;  %4505 = vmatpush.bf16.msrb.mxu2 %v7283_v59 }
 0x35d   :  { %4203 = vmatmul.bf16.vlgmr.msra.gmra.mxu3 %v7696_v51 }
 0x35e   :  { %4511 = vmatpush.bf16.msrb.mxu3 %v7298_v48 }
 0x362   :  { %v4011_v2 = vpop.f32.mrf.mxu0  ;;  %4512 = vmatpush.bf16.msrb.mxu3 %v7297_v35 }
 0x366   :  { %4513 = vmatpush.bf16.msrb.mxu3 %v7296_v44 }
 0x36a   :  { %v4022_v6 = vpop.f32.mrf.mxu1  ;;  %v7706_v23 = vpop.f32.mrf.mxu0 }
 0x36b   :  { %v4023_v41 = vadd.f32 %v4022_v6, %v4010_v8  ;;  %v4062_v38 = vadd.f32 %v7706_v23, %v3357_v55  ;;  %v7295_v6 = vld [vmem:[#allocation7 + $0xe0] sm:$0xff]  ;;  %v3358_v23 = vperm.slane %v3350_v7, 0 }
 0x36c   :  { %4514 = vmatpush.bf16.msrb.mxu3 %v7295_v6 }
 0x372   :  { %v4024_v12 = vpop.f32.mrf.mxu1  ;;  %v4063_v40 = vpop.f32.mrf.mxu0 }
 0x373   :  { %v7294_v12 = vld [vmem:[#allocation7 + $0xd8] sm:$0xff] }
 0x374   :  { %4515 = vmatpush.bf16.msrb.mxu3 %v7294_v12 }
 0x37a   :  { %v7708_v15 = vpop.f32.mrf.mxu1 }
 0x37b   :  { %v4075_v60 = vadd.f32 %v7708_v15, %v4062_v38  ;;  %v7293_v15 = vld [vmem:[#allocation7 + $0xd0] sm:$0xff] }
 0x37c   :  { %v7710_v51 = vpop.f32.mrf.mxu0  ;;  %4516 = vmatpush.bf16.msrb.mxu3 %v7293_v15 }
 0x37d   :  { %v4114_v46 = vadd.f32 %v7710_v51, %v3358_v23  ;;  %v3351_v51 = vperm.slane %v7717_v29, 6 }
 0x37f   :  { %v3359_v27 = vperm.slane %v3351_v51, 0 }
 0x380   :  { %v4035_v18 = vpop.f32.mrf.mxu2  ;;  %4517 = vmatpush.bf16.msrb.mxu3 %v7292_v3 }
 0x381   :  { %v4036_v42 = vadd.f32 %v4035_v18, %v4023_v41 }
 0x382   :  { %v4076_v21 = vpop.f32.mrf.mxu1 }
 0x384   :  { %v4115_v43 = vpop.f32.mrf.mxu0 }
 0x385   :  { %v7291_v43 = vld [vmem:[#allocation7 + $0xc0] sm:$0xff] }
 0x386   :  { %4518 = vmatpush.bf16.msrb.mxu3 %v7291_v43 }
 0x388   :  { %v4037_v4 = vpop.f32.mrf.mxu2 }
 0x38a   :  { %v7715_v28 = vpop.f32.mrf.mxu1 }
 0x38b   :  { %v4127_v9 = vadd.f32 %v7715_v28, %v4114_v46 }
 0x390   :  { %v4087_v33 = vpop.f32.mrf.mxu2 }
 0x391   :  { %v4088_v1 = vadd.f32 %v4087_v33, %v4075_v60 }
 0x392   :  { %v4128_v34 = vpop.f32.mrf.mxu1 }
 0x398   :  { %v4089_v36 = vpop.f32.mrf.mxu2 }
 0x39a   :  { %v7720_v19 = vpop.f32.mrf.mxu0 }
 0x39b   :  { %v4166_v57 = vadd.f32 %v7720_v19, %v3359_v27 }
 0x3a0   :  { %v4048_v39 = vpop.f32.mrf.mxu3 }
 0x3a1   :  { %v4049_v49 = vadd.f32 %v4048_v39, %v4036_v42 }
 0x3a2   :  { %v4167_v50 = vpop.f32.mrf.mxu0 }
 0x3a3   :  { %7339 = vtanh.f32 %v4049_v49  ;;  %v4139_v54 = vpop.f32.mrf.mxu2 }
 0x3a4   :  { %v4140_v16 = vadd.f32 %v4139_v54, %v4127_v9 }
 0x3a8   :  { %v4050_v56 = vpop.f32.mrf.mxu3 }
 0x3a9   :  { %v7340_v61 = vpop.eup %7339 }
 0x3aa   :  { %v4212_v26 = vpack.c.bf16 %v7340_v61, %v7340_v61  ;;  %v4178_v62 = vpop.f32.mrf.mxu1 }
 0x3ab   :  { %v4141_v63 = vpop.f32.mrf.mxu2  ;;  %v4179_v28 = vadd.f32 %v4178_v62, %v4166_v57 }
 0x3ac   :  { %4480 = vmatmul.bf16.vlgmr.msrb.gmra.mxu0 %v4212_v26 }
 0x3b0   :  { %v4100_v2 = vpop.f32.mrf.mxu3 }
 0x3b1   :  { %v4101_v5 = vadd.f32 %v4100_v2, %v4088_v1 }
 0x3b2   :  { %v4180_v25 = vpop.f32.mrf.mxu1 }
 0x3b3   :  { %7341 = vtanh.f32 %v4101_v5 }
 0x3b8   :  { %v4102_v40 = vpop.f32.mrf.mxu3 }
 0x3b9   :  { %v7342_v13 = vpop.eup %7341 }
 0x3ba   :  { %v4213_v37 = vpack.c.bf16 %v7342_v13, %v7342_v13 }
 0x3bc   :  { %4493 = vmatmul.bf16.vlgmr.msrb.gmra.mxu1 %v4213_v37 }
 0x3c0   :  { %v4152_v18 = vpop.f32.mrf.mxu3 }
 0x3c1   :  { %v4153_v20 = vadd.f32 %v4152_v18, %v4140_v16  ;;  %v4191_v21 = vpop.f32.mrf.mxu2 }
 0x3c2   :  { %v4192_v30 = vadd.f32 %v4191_v21, %v4179_v28 }
 0x3c3   :  { %7343 = vtanh.f32 %v4153_v20 }
 0x3c8   :  { %v4154_v22 = vpop.f32.mrf.mxu3 }
 0x3c9   :  { %v7344_v58 = vpop.eup %7343  ;;  %v4193_v4 = vpop.f32.mrf.mxu2 }
 0x3ca   :  { %v4214_v24 = vpack.c.bf16 %v7344_v58, %v7344_v58 }
 0x3cc   :  { %4506 = vmatmul.bf16.vlgmr.msrb.gmra.mxu2 %v4214_v24 }
 0x3e0   :  { %v4204_v31 = vpop.f32.mrf.mxu3 }
 0x3e1   :  { %v4205_v0 = vadd.f32 %v4204_v31, %v4192_v30 }
 0x3e3   :  { %7345 = vtanh.f32 %v4205_v0 }
 0x3e8   :  { %v4206_v33 = vpop.f32.mrf.mxu3 }
 0x3e9   :  { %v7346_v53 = vpop.eup %7345 }
 0x3ea   :  { %v4215_v52 = vpack.c.bf16 %v7346_v53, %v7346_v53 }
 0x3ec   :  { %4519 = vmatmul.bf16.vlgmr.msrb.gmra.mxu3 %v4215_v52 }
 0x429   :  { %v4481_v34 = vpop.f32.mrf.mxu0 }
 0x431   :  { %v4483_v11 = vpop.f32.mrf.mxu0 }
 0x439   :  { %v4494_v10 = vpop.f32.mrf.mxu1 }
 0x43a   :  { %v4495_v17 = vadd.f32 %v4494_v10, %v4481_v34 }
 0x441   :  { %v4496_v32 = vpop.f32.mrf.mxu1 }
 0x44f   :  { %v4507_v8 = vpop.f32.mrf.mxu2 }
 0x450   :  { %v4508_v29 = vadd.f32 %v4507_v8, %v4495_v17 }
 0x457   :  { %v4509_v36 = vpop.f32.mrf.mxu2 }
 0x46f   :  { %v4520_v41 = vpop.f32.mrf.mxu3 }
 0x470   :  { %v4521_v42 = vadd.f32 %v4520_v41, %v4508_v29 }
 0x472   :  { %4524 = vst [vmem:[%s7739_s6] sm:$0xff] %v4521_v42 }
 0x477   :  { %v4522_v19 = vpop.f32.mrf.mxu3 }
 0x478   :  { %4529 = vsyncpa [#allocation3], 1 }
 0x479   :  { %4530 = vsyncpa [#allocation5], 1 }
 0x47a   :  { %4531 = vsyncpa [#allocation8], 1 }

</bundles_post_ra>
